<compile_context>
chip_gen: v6e
topology: v6e:2x2x1
jax: 0.10.0
libtpu: 0.0.40
codegen_flags: <defaults>
</compile_context>

<pallas_src>
import functools

import jax
import jax.numpy as jnp
from jax import lax
from jax.experimental import pallas as pl
from jax.experimental.pallas import tpu as pltpu


def _window_attention_kernel(x_ref, wq_ref, wkv_ref, wo_ref, bo_ref, o_ref, *,
                             heads, dim_head, scale):
    """Fused windowed attention for one (batch, window) tile.

    x_ref  : (1, w, w, C)   input window, channels last
    wq_ref : (C, inner)     to_q  1x1-conv weight (transposed)
    wkv_ref: (C, 2*inner)   to_kv 1x1-conv weight (transposed)
    wo_ref : (inner, C)     to_out 1x1-conv weight (transposed)
    bo_ref : (1, C)         to_out bias
    o_ref  : (1, w, w, C)   output window, channels last
    """
    _, w1, w2, C = x_ref.shape
    seq = w1 * w2
    inner = heads * dim_head
    hp = lax.Precision.HIGHEST

    # (1, w, w, C) -> (seq, C): layout-preserving collapse into the sublane dim.
    x = x_ref[...].astype(jnp.float32).reshape(seq, C)

    wq = wq_ref[...].astype(jnp.float32)
    wkv = wkv_ref[...].astype(jnp.float32)

    # Per-pixel 1x1-conv projections (single MXU pass each).
    q = jnp.dot(x, wq, preferred_element_type=jnp.float32, precision=hp)    # (seq, inner)
    kv = jnp.dot(x, wkv, preferred_element_type=jnp.float32, precision=hp)  # (seq, 2*inner)
    k = kv[:, :inner]
    v = kv[:, inner:]

    # Per-head attention; heads is a small static constant -> unrolled loop.
    outs = []
    for h in range(heads):
        sl = slice(h * dim_head, (h + 1) * dim_head)
        qh, kh, vh = q[:, sl], k[:, sl], v[:, sl]
        # q @ k^T without materializing a transpose.
        sim = lax.dot_general(qh, kh, (((1,), (1,)), ((), ())),
                              preferred_element_type=jnp.float32,
                              precision=hp) * scale                         # (seq, seq)
        sim = sim - jnp.max(sim, axis=-1, keepdims=True)
        p = jnp.exp(sim)
        denom = jnp.sum(p, axis=-1, keepdims=True)
        attn = p * pl.reciprocal(denom, approx=False)                       # EUP
        outs.append(jnp.dot(attn, vh, preferred_element_type=jnp.float32,
                            precision=hp))                                  # (seq, d)
    out = jnp.concatenate(outs, axis=-1)                                    # (seq, inner)

    wo = wo_ref[...].astype(jnp.float32)
    bo = bo_ref[...].astype(jnp.float32)
    y = jnp.dot(out, wo, preferred_element_type=jnp.float32, precision=hp) + bo
    o_ref[...] = y.reshape(1, w1, w2, C).astype(o_ref.dtype)


def attention_pallas(x_nchw, wq, wkv, wo, bo, *, heads, dim_head, window_size):
    """Uformer Attention.forward (skip/time_emb/pos_emb = None).

    x_nchw: (B, C, H, W)
    wq    : (inner, C)    to_q  1x1-conv weight (out, in)
    wkv   : (2*inner, C)  to_kv 1x1-conv weight (out, in)
    wo    : (C, inner)    to_out 1x1-conv weight (out, in)
    bo    : (C,)          to_out bias
    Returns (B, C, H, W).
    """
    B, C, H, W = x_nchw.shape
    w = window_size
    inner = heads * dim_head
    assert H % w == 0 and W % w == 0, "spatial dims must be divisible by window"
    assert w % 8 == 0 or w == H, "window size must tile the sublane axis"
    assert wq.shape == (inner, C) and wkv.shape == (2 * inner, C)
    assert wo.shape == (C, inner) and bo.shape == (C,)

    # Channels-last so the 1x1 convs are plain matmuls and each attention
    # window is a rectangular BlockSpec tile (window gather = free DMA).
    x_nhwc = jnp.transpose(x_nchw, (0, 2, 3, 1))        # (B, H, W, C)

    wq_t = wq.T                                         # (C, inner)
    wkv_t = wkv.T                                       # (C, 2*inner)
    wo_t = wo.T                                         # (inner, C)
    bo_2d = bo.reshape(1, C)

    scale = float(dim_head) ** -0.5
    grid = (B, H // w, W // w)

    out_nhwc = pl.pallas_call(
        functools.partial(_window_attention_kernel,
                          heads=heads, dim_head=dim_head, scale=scale),
        out_shape=jax.ShapeDtypeStruct((B, H, W, C), x_nchw.dtype),
        grid_spec=pltpu.PrefetchScalarGridSpec(
            num_scalar_prefetch=0,
            grid=grid,
            in_specs=[
                pl.BlockSpec((1, w, w, C), lambda b, i, j: (b, i, j, 0)),
                pl.BlockSpec((C, inner), lambda b, i, j: (0, 0)),       # resident
                pl.BlockSpec((C, 2 * inner), lambda b, i, j: (0, 0)),   # resident
                pl.BlockSpec((inner, C), lambda b, i, j: (0, 0)),       # resident
                pl.BlockSpec((1, C), lambda b, i, j: (0, 0)),           # resident
            ],
            out_specs=pl.BlockSpec((1, w, w, C), lambda b, i, j: (b, i, j, 0)),
        ),
        compiler_params=pltpu.CompilerParams(
            dimension_semantics=("parallel", "parallel", "parallel"),
        ),
    )(x_nhwc, wq_t, wkv_t, wo_t, bo_2d)

    # back to the module's NCHW output layout
    return jnp.transpose(out_nhwc, (0, 3, 1, 2))


def attention_ref(x, wq, wkv, wo, bo, *, heads, dim_head, window_size):
    """Pure-JAX reference mirroring the PyTorch module exactly (default path)."""
    B, C, H, W = x.shape
    inner = heads * dim_head
    w = window_size
    nx, ny = H // w, W // w
    scale = float(dim_head) ** -0.5
    hp = lax.Precision.HIGHEST

    q = jnp.einsum('bchw,oc->bohw', x, wq, precision=hp)
    kv = jnp.einsum('bchw,oc->bohw', x, wkv, precision=hp)
    k, v = kv[:, :inner], kv[:, inner:]

    def to_windows(t):
        # 'b (h c) x y -> (b h) x y c' then '(x w1) (y w2) -> windows'
        t = t.reshape(B, heads, dim_head, H, W)
        t = jnp.transpose(t, (0, 1, 3, 4, 2))                        # b h X Y c
        t = t.reshape(B * heads, nx, w, ny, w, dim_head)
        t = jnp.transpose(t, (0, 1, 3, 2, 4, 5))                     # bh x y w1 w2 c
        return t.reshape(B * heads * nx * ny, w * w, dim_head)

    q, k, v = map(to_windows, (q, k, v))
    sim = jnp.einsum('bid,bjd->bij', q, k, precision=hp) * scale
    attn = jax.nn.softmax(sim, axis=-1)
    out = jnp.einsum('bij,bjd->bid', attn, v, precision=hp)

    # '(b h x y) (w1 w2) c -> b (h c) (x w1) (y w2)'
    out = out.reshape(B, heads, nx, ny, w, w, dim_head)
    out = jnp.transpose(out, (0, 1, 6, 2, 4, 3, 5))                  # b h c x w1 y w2
    out = out.reshape(B, inner, H, W)
    return jnp.einsum('bchw,oc->bohw', out, wo, precision=hp) + bo.reshape(1, -1, 1, 1)


if __name__ == "__main__":
    B, C, H, W = 2, 4, 16, 16
    heads, dim_head, window_size = 2, 8, 8
    inner = heads * dim_head

    key = jax.random.PRNGKey(0)
    kx, kq, kkv, ko, kb = jax.random.split(key, 5)
    x = jax.random.normal(kx, (B, C, H, W), dtype=jnp.float32)
    wq = jax.random.normal(kq, (inner, C), dtype=jnp.float32) * 0.5
    wkv = jax.random.normal(kkv, (2 * inner, C), dtype=jnp.float32) * 0.5
    wo = jax.random.normal(ko, (C, inner), dtype=jnp.float32) * 0.25
    bo = jax.random.normal(kb, (C,), dtype=jnp.float32) * 0.1

    out = attention_pallas(x, wq, wkv, wo, bo, heads=heads, dim_head=dim_head,
                           window_size=window_size)
    out = jax.block_until_ready(out)

    ref = attention_ref(x, wq, wkv, wo, bo, heads=heads, dim_head=dim_head,
                        window_size=window_size)
    assert out.shape == (B, C, H, W)
    max_err = float(jnp.max(jnp.abs(out - ref)))
    assert jnp.allclose(out, ref, atol=1e-3, rtol=1e-3), f"mismatch: {max_err}"

    print("KERNEL_OK")
</pallas_src>

<mosaic_0001>
module attributes {stable_mosaic.version = 11 : i64} {
  func.func @_window_attention_kernel(%arg0: i32, %arg1: i32, %arg2: i32, %arg3: memref<1x8x8x4xf32, #tpu.memory_space<vmem>>, %arg4: memref<4x16xf32, #tpu.memory_space<vmem>>, %arg5: memref<4x32xf32, #tpu.memory_space<vmem>>, %arg6: memref<16x4xf32, #tpu.memory_space<vmem>>, %arg7: memref<1x4xf32, #tpu.memory_space<vmem>>, %arg8: memref<1x8x8x4xf32, #tpu.memory_space<vmem>>) attributes {dimension_semantics = [#tpu.dimension_semantics<parallel>, #tpu.dimension_semantics<parallel>, #tpu.dimension_semantics<parallel>], iteration_bounds = array<i64: 2, 2, 2>, scalar_prefetch = 0 : i64, scratch_operands = 0 : i64, tpu.core_type = #tpu.core_type<tc>, window_params = [{transform_indices = @transform_0, window_bounds = array<i64: 1, 8, 8, 4>}, {pipeline_mode = #tpu.pipeline_mode<synchronous>, transform_indices = @transform_1, window_bounds = array<i64: 4, 16>}, {pipeline_mode = #tpu.pipeline_mode<synchronous>, transform_indices = @transform_2, window_bounds = array<i64: 4, 32>}, {pipeline_mode = #tpu.pipeline_mode<synchronous>, transform_indices = @transform_3, window_bounds = array<i64: 16, 4>}, {pipeline_mode = #tpu.pipeline_mode<synchronous>, transform_indices = @transform_4, window_bounds = array<i64: 1, 4>}, {transform_indices = @transform_5, window_bounds = array<i64: 1, 8, 8, 4>}]} {
    %c0 = arith.constant 0 : index
    %c0_0 = arith.constant 0 : index
    %c0_1 = arith.constant 0 : index
    %c0_2 = arith.constant 0 : index
    %0 = vector.load %arg3[%c0, %c0_0, %c0_1, %c0_2] : memref<1x8x8x4xf32, #tpu.memory_space<vmem>>, vector<1x8x8x4xf32>
    %1 = vector.shape_cast %0 : vector<1x8x8x4xf32> to vector<64x4xf32>
    %c0_3 = arith.constant 0 : index
    %c0_4 = arith.constant 0 : index
    %2 = vector.load %arg4[%c0_3, %c0_4] : memref<4x16xf32, #tpu.memory_space<vmem>>, vector<4x16xf32>
    %c0_5 = arith.constant 0 : index
    %c0_6 = arith.constant 0 : index
    %3 = vector.load %arg5[%c0_5, %c0_6] : memref<4x32xf32, #tpu.memory_space<vmem>>, vector<4x32xf32>
    %cst = arith.constant dense<0.000000e+00> : vector<64x16xf32>
    %4 = tpu.matmul %1, %2, %cst {dimension_numbers = #tpu.dot_dimension_numbers<[1], [0], [0], [1], [0, 0, 1, 1], [], []>, precision = #tpu.contract_precision<fp32>} : vector<64x4xf32>, vector<4x16xf32>, vector<64x16xf32> -> vector<64x16xf32>
    %cst_7 = arith.constant dense<0.000000e+00> : vector<64x32xf32>
    %5 = tpu.matmul %1, %3, %cst_7 {dimension_numbers = #tpu.dot_dimension_numbers<[1], [0], [0], [1], [0, 0, 1, 1], [], []>, precision = #tpu.contract_precision<fp32>} : vector<64x4xf32>, vector<4x32xf32>, vector<64x32xf32> -> vector<64x32xf32>
    %6 = vector.extract_strided_slice %5 {offsets = [0, 0], sizes = [64, 16], strides = [1, 1]} : vector<64x32xf32> to vector<64x16xf32>
    %7 = vector.extract_strided_slice %5 {offsets = [0, 16], sizes = [64, 16], strides = [1, 1]} : vector<64x32xf32> to vector<64x16xf32>
    %8 = vector.extract_strided_slice %4 {offsets = [0, 0], sizes = [64, 8], strides = [1, 1]} : vector<64x16xf32> to vector<64x8xf32>
    %9 = vector.extract_strided_slice %6 {offsets = [0, 0], sizes = [64, 8], strides = [1, 1]} : vector<64x16xf32> to vector<64x8xf32>
    %10 = vector.extract_strided_slice %7 {offsets = [0, 0], sizes = [64, 8], strides = [1, 1]} : vector<64x16xf32> to vector<64x8xf32>
    %cst_8 = arith.constant dense<0.000000e+00> : vector<64x64xf32>
    %11 = tpu.matmul %8, %9, %cst_8 {dimension_numbers = #tpu.dot_dimension_numbers<[1], [1], [0], [0], [0, 0, 1, 0], [], []>, precision = #tpu.contract_precision<fp32>} : vector<64x8xf32>, vector<64x8xf32>, vector<64x64xf32> -> vector<64x64xf32>
    %cst_9 = arith.constant 0.353553385 : f32
    %12 = vector.broadcast %cst_9 : f32 to vector<64x64xf32>
    %13 = arith.mulf %11, %12 : vector<64x64xf32>
    %cst_10 = arith.constant dense<0xFF800000> : vector<64xf32>
    %14 = vector.multi_reduction <maximumf>, %13, %cst_10 [1] : vector<64x64xf32> to vector<64xf32>
    %15 = vector.shape_cast %14 : vector<64xf32> to vector<64x1xf32>
    %16 = vector.broadcast %15 : vector<64x1xf32> to vector<64x64xf32>
    %17 = arith.subf %13, %16 : vector<64x64xf32>
    %18 = math.exp %17 : vector<64x64xf32>
    %cst_11 = arith.constant dense<0.000000e+00> : vector<64xf32>
    %19 = vector.multi_reduction <add>, %18, %cst_11 [1] : vector<64x64xf32> to vector<64xf32>
    %20 = vector.shape_cast %19 : vector<64xf32> to vector<64x1xf32>
    %21 = tpu.reciprocal %20 : vector<64x1xf32> -> vector<64x1xf32>
    %22 = vector.broadcast %21 : vector<64x1xf32> to vector<64x64xf32>
    %23 = arith.mulf %18, %22 : vector<64x64xf32>
    %cst_12 = arith.constant dense<0.000000e+00> : vector<64x8xf32>
    %24 = tpu.matmul %23, %10, %cst_12 {dimension_numbers = #tpu.dot_dimension_numbers<[1], [0], [0], [1], [0, 0, 1, 1], [], []>, precision = #tpu.contract_precision<fp32>} : vector<64x64xf32>, vector<64x8xf32>, vector<64x8xf32> -> vector<64x8xf32>
    %25 = vector.extract_strided_slice %4 {offsets = [0, 8], sizes = [64, 8], strides = [1, 1]} : vector<64x16xf32> to vector<64x8xf32>
    %26 = vector.extract_strided_slice %6 {offsets = [0, 8], sizes = [64, 8], strides = [1, 1]} : vector<64x16xf32> to vector<64x8xf32>
    %27 = vector.extract_strided_slice %7 {offsets = [0, 8], sizes = [64, 8], strides = [1, 1]} : vector<64x16xf32> to vector<64x8xf32>
    %cst_13 = arith.constant dense<0.000000e+00> : vector<64x64xf32>
    %28 = tpu.matmul %25, %26, %cst_13 {dimension_numbers = #tpu.dot_dimension_numbers<[1], [1], [0], [0], [0, 0, 1, 0], [], []>, precision = #tpu.contract_precision<fp32>} : vector<64x8xf32>, vector<64x8xf32>, vector<64x64xf32> -> vector<64x64xf32>
    %cst_14 = arith.constant 0.353553385 : f32
    %29 = vector.broadcast %cst_14 : f32 to vector<64x64xf32>
    %30 = arith.mulf %28, %29 : vector<64x64xf32>
    %cst_15 = arith.constant dense<0xFF800000> : vector<64xf32>
    %31 = vector.multi_reduction <maximumf>, %30, %cst_15 [1] : vector<64x64xf32> to vector<64xf32>
    %32 = vector.shape_cast %31 : vector<64xf32> to vector<64x1xf32>
    %33 = vector.broadcast %32 : vector<64x1xf32> to vector<64x64xf32>
    %34 = arith.subf %30, %33 : vector<64x64xf32>
    %35 = math.exp %34 : vector<64x64xf32>
    %cst_16 = arith.constant dense<0.000000e+00> : vector<64xf32>
    %36 = vector.multi_reduction <add>, %35, %cst_16 [1] : vector<64x64xf32> to vector<64xf32>
    %37 = vector.shape_cast %36 : vector<64xf32> to vector<64x1xf32>
    %38 = tpu.reciprocal %37 : vector<64x1xf32> -> vector<64x1xf32>
    %39 = vector.broadcast %38 : vector<64x1xf32> to vector<64x64xf32>
    %40 = arith.mulf %35, %39 : vector<64x64xf32>
    %cst_17 = arith.constant dense<0.000000e+00> : vector<64x8xf32>
    %41 = tpu.matmul %40, %27, %cst_17 {dimension_numbers = #tpu.dot_dimension_numbers<[1], [0], [0], [1], [0, 0, 1, 1], [], []>, precision = #tpu.contract_precision<fp32>} : vector<64x64xf32>, vector<64x8xf32>, vector<64x8xf32> -> vector<64x8xf32>
    %42 = tpu.concatenate %24, %41 in 1 : vector<64x8xf32>, vector<64x8xf32> -> vector<64x16xf32>
    %c0_18 = arith.constant 0 : index
    %c0_19 = arith.constant 0 : index
    %43 = vector.load %arg6[%c0_18, %c0_19] : memref<16x4xf32, #tpu.memory_space<vmem>>, vector<16x4xf32>
    %c0_20 = arith.constant 0 : index
    %c0_21 = arith.constant 0 : index
    %44 = vector.load %arg7[%c0_20, %c0_21] : memref<1x4xf32, #tpu.memory_space<vmem>>, vector<1x4xf32>
    %cst_22 = arith.constant dense<0.000000e+00> : vector<64x4xf32>
    %45 = tpu.matmul %42, %43, %cst_22 {dimension_numbers = #tpu.dot_dimension_numbers<[1], [0], [0], [1], [0, 0, 1, 1], [], []>, precision = #tpu.contract_precision<fp32>} : vector<64x16xf32>, vector<16x4xf32>, vector<64x4xf32> -> vector<64x4xf32>
    %46 = vector.broadcast %44 : vector<1x4xf32> to vector<64x4xf32>
    %47 = arith.addf %45, %46 : vector<64x4xf32>
    %48 = vector.shape_cast %47 : vector<64x4xf32> to vector<1x8x8x4xf32>
    %c0_23 = arith.constant 0 : index
    %c0_24 = arith.constant 0 : index
    %c0_25 = arith.constant 0 : index
    %c0_26 = arith.constant 0 : index
    %49 = vector.load %arg8[%c0_23, %c0_24, %c0_25, %c0_26] : memref<1x8x8x4xf32, #tpu.memory_space<vmem>>, vector<1x8x8x4xf32>
    tpu.vector_store %arg8[%c0_23, %c0_24, %c0_25, %c0_26], %48 {strides = array<i32>} : memref<1x8x8x4xf32, #tpu.memory_space<vmem>>, vector<1x8x8x4xf32>,
    return
  }
  func.func @transform_0(%arg0: i32, %arg1: i32, %arg2: i32) -> (i32, i32, i32, i32) {
    %c0_i32 = arith.constant 0 : i32
    %c0_i32_0 = arith.constant 0 : i32
    return %arg0, %arg1, %arg2, %c0_i32 : i32, i32, i32, i32
  }
  func.func @transform_1(%arg0: i32, %arg1: i32, %arg2: i32) -> (i32, i32) {
    %c0_i32 = arith.constant 0 : i32
    %c0_i32_0 = arith.constant 0 : i32
    %c0_i32_1 = arith.constant 0 : i32
    return %c0_i32, %c0_i32_0 : i32, i32
  }
  func.func @transform_2(%arg0: i32, %arg1: i32, %arg2: i32) -> (i32, i32) {
    %c0_i32 = arith.constant 0 : i32
    %c0_i32_0 = arith.constant 0 : i32
    %c0_i32_1 = arith.constant 0 : i32
    return %c0_i32, %c0_i32_0 : i32, i32
  }
  func.func @transform_3(%arg0: i32, %arg1: i32, %arg2: i32) -> (i32, i32) {
    %c0_i32 = arith.constant 0 : i32
    %c0_i32_0 = arith.constant 0 : i32
    %c0_i32_1 = arith.constant 0 : i32
    return %c0_i32, %c0_i32_0 : i32, i32
  }
  func.func @transform_4(%arg0: i32, %arg1: i32, %arg2: i32) -> (i32, i32) {
    %c0_i32 = arith.constant 0 : i32
    %c0_i32_0 = arith.constant 0 : i32
    %c0_i32_1 = arith.constant 0 : i32
    return %c0_i32, %c0_i32_0 : i32, i32
  }
  func.func @transform_5(%arg0: i32, %arg1: i32, %arg2: i32) -> (i32, i32, i32, i32) {
    %c0_i32 = arith.constant 0 : i32
    %c0_i32_0 = arith.constant 0 : i32
    return %arg0, %arg1, %arg2, %c0_i32 : i32, i32, i32, i32
  }
}

</mosaic_0001>

<bundles_post_ra>
// kernel: tpu_custom_call.1
= control target key start
LH: loop header
LB: loop body
LE: loop exit
PB: predicated region body
PF: predicated region fallthrough
CT: control target
= control target key end

     0   :  { %s8361_s18 = smov 0   ;;  %s8363_s19 = smov 0   ;;  %s10406_s0 = inlined_call_operand.vmem [shape: f32[2,16,16,4], index: 0, kind: input, shape index: {}]   ;;  %s10407_s1 = inlined_call_operand.vmem [shape: f32[4,16], index: 1, kind: input, shape index: {}]   ;;  %s10408_s2 = inlined_call_operand.vmem [shape: f32[4,32], index: 2, kind: input, shape index: {}]   ;;  %s10409_s3 = inlined_call_operand.vmem [shape: f32[16,4], index: 3, kind: input, shape index: {}]   ;;  %s10410_s4 = inlined_call_operand.vmem [shape: f32[1,4], index: 4, kind: input, shape index: {}]   ;;  %s10411_s5 = inlined_call_operand.vmem [shape: f32[2,16,16,4], index: 5, kind: output, shape index: {}]  }
   0x1   :  { %s8365_s20 = smov 0   ;;  %s8367_s21 = smov 0  }
   0x2   :  { %s8369_s22 = smov 0   ;;  %s8371_s23 = smov 0  }
   0x3   :  { %s8373_s24 = smov 0   ;;  %s8375_s25 = smov 0  }
   0x4   :  { %s8377_s26 = smov 0  }
   0x5 LB: > { %s27_s27 = sadd.s32 1, %s8313_s23  ;;  %s30_s28 = sadd.s32 1, %s8317_s24  ;;  %s8325_s26 = sphi %s8377_s26, %s15_s26   ;;  %s8321_s25 = sphi %s8375_s25, %s10480_s25   ;;  %s8317_s24 = sphi %s8373_s24, %s10479_s24   ;;  %s8313_s23 = sphi %s8371_s23, %s10478_s23   ;;  %s8309_s22 = sphi %s8369_s22, %s10477_s22   ;;  %s8305_s21 = sphi %s8367_s21, %s10476_s21   ;;  %s8301_s20 = sphi %s8365_s20, %s10475_s20   ;;  %s8297_s19 = sphi %s8363_s19, %s10474_s19   ;;  %s8293_s18 = sphi %s8361_s18, %s10473_s18  }
   0x6   : > { %p28_p0 = scmp.ge.s32.totalorder %s27_s27, 2  ;;  %s6605_s29 = sadd.s32 4294967295, %s8325_s26  }
   0x7   : > { %s34_s30 = sadd.s32 1, %s8321_s25  ;;  %p52_p1 = scmp.ne.s32.totalorder %s8297_s19, %s8293_s18 }
   0x8   : > { %s10482_s27 = smov (%p28_p0, %s27_s27), 0  ;;  %s10484_s28 = smov (!%p28_p0, %s30_s28), %s8317_s24 }
   0x9   : > { %p32_p2 = scmp.ge.s32.totalorder %s10484_s28, 2  ;;  %p53_p3 = scmp.eq.s32.totalorder %s8325_s26, 0 }
   0xa   : > { %p170_p4 = scmp.eq.s32.totalorder %s6605_s29, 7  ;;  %s41_s9 = ssub.s32 %s8313_s23, %s10482_s27 }
   0xb   : > { %s10486_s28 = smov (%p32_p2, %s10484_s28), 0  ;;  %s10488_s30 = smov (!%p32_p2, %s34_s30), %s8321_s25 }
   0xc   : > { %p8419_p5 = por %p53_p3, %p52_p1  ;;  %p36_p6 = scmp.ge.s32.totalorder %s10488_s30, 2 }
   0xd   : > { %p8423_p7 = por %p170_p4, %p52_p1  ;;  %s39_s8 = ssub.s32 %s8317_s24, %s10486_s28 }
   0xe   : > { %s10490_s30 = smov (%p36_p6, %s10488_s30), 0  ;;  %s45_s13 = sadd.s32 1, %s8297_s19 }
   0xf   : > { %s38_s10 = ssub.s32 %s8321_s25, %s10490_s30  ;;  %p6608_p9 = scmp.ge.s32.totalorder %s8325_s26, 8 }
  0x10   : > { %s40_s11 = sor.u32 %s39_s8, %s38_s10 }
  0x11   : > { %s42_s12 = sor.u32 %s41_s9, %s40_s11  ;;  %204 = sbr.rel (%p6608_p9) target bundleno = 33 (0x21), region = 32 }
  0x12   : > { %p43_p8 = scmp.eq.s32.totalorder %s42_s12, 0 }
  0x14   : > { %s8437_s14 = scalar_select %p43_p8, %s8297_s19, %s45_s13  }
  0x16   : > { %207 = sbr.rel (!%p8419_p5) target bundleno = 33 (0x21), region = 36  ;;  %s209_s15 = sand.u32 (%p8419_p5), 1, %s8297_s19  }
  0x17   : > { %s6625_s16 = sshll.u32 (%p8419_p5), %s8317_s24, 4  ;;  %s6609_s17 = sshll.u32 (%p8419_p5), %s209_s15, 6 }
  0x18   : > { %s214_s29 = sadd.s32 (%p8419_p5), %s8313_s23, %s6625_s16  ;;  %s6612_s8 = sshll.u32 (%p8419_p5), %s8321_s25, 5 }
  0x19   : > { %s216_s9 = sadd.s32 (%p8419_p5), %s6612_s8, %s214_s29  ;;  %s211_s6 = scalar_lea.vmem (%p8419_p5), [#allocation2], %s6609_s17 }
  0x1a   : > { %s6613_s10 = sshll.u32 (%p8419_p5), %s216_s9, 3 }
  0x1b   : > { %s218_s13 = scalar_lea.vmem %s10406_s0, %s6613_s10 }
  0x1c   : > { %v261_v0 = vld [vmem:[%s218_s13] sm:$0xff]  ;;  %v263_v1 = vld [vmem:[%s218_s13 + $0x10] sm:$0xff] }
  0x1d   : > { %v265_v2 = vld [vmem:[%s218_s13 + $0x20] sm:$0xff]  ;;  %262 = vst [vmem:[%s211_s6] sm:$0xff] %v261_v0  ;;  %264 = vst [vmem:[%s211_s6 + $0x8] sm:$0xff] %v263_v1  ;;  %v267_v3 = vld [vmem:[%s218_s13 + $0x30] sm:$0xff] }
  0x1e   : > { %266 = vst [vmem:[%s211_s6 + $0x10] sm:$0xff] %v265_v2  ;;  %v269_v4 = vld [vmem:[%s218_s13 + $0x40] sm:$0xff]  ;;  %v271_v5 = vld [vmem:[%s218_s13 + $0x50] sm:$0xff]  ;;  %268 = vst [vmem:[%s211_s6 + $0x18] sm:$0xff] %v267_v3 }
  0x1f   : > { %270 = vst [vmem:[%s211_s6 + $0x20] sm:$0xff] %v269_v4  ;;  %272 = vst [vmem:[%s211_s6 + $0x28] sm:$0xff] %v271_v5  ;;  %v273_v6 = vld [vmem:[%s218_s13 + $0x60] sm:$0xff]  ;;  %v275_v7 = vld [vmem:[%s218_s13 + $0x70] sm:$0xff] }
  0x20   : > { %274 = vst [vmem:[%s211_s6 + $0x30] sm:$0xff] %v273_v6  ;;  %276 = vst [vmem:[%s211_s6 + $0x38] sm:$0xff] %v275_v7 }
  0x21 PF: > { %p6614_p10 = scmp.ge.s32.totalorder %s8325_s26, 1  ;;  %p281_p11 = scmp.lt.s32.totalorder %s8325_s26, 9 }
  0x23   : > { %p282_p12 = pnand %p6614_p10, %p281_p11 }
  0x25   : > { %285 = sbr.rel (%p282_p12) target bundleno = 2283 (0x8eb), region = 74 }
  0x2a   : > { %v324_v8 = vld [vmem:[%s10407_s1] sm:$0xf]  ;;  %vm351_vm0 = vcmask 1043456   ;;  %s288_s17 = sand.u32 1, %s8293_s18   ;;  %vm326_vm1 = vcmask 31744   ;;  %vm1852_vm2 = vcmask 64512  }
  0x2b   : > { %v353_v9 = vsel %vm351_vm0, %v324_v8, 0  ;;  %s8455_s29 = sshll.u32 %s288_s17, 6  ;;  %v325_v10 = vld [vmem:[%s10408_s2] sm:$0xf]  ;;  %vm2747_vm3 = vcmask 523264   ;;  %s8327_s18 = smov 112  }
  0x2c   : > { %v8460_v11 = vand.u32 4294901760, %v353_v9  ;;  %v8462_v12 = vsel %vm351_vm0, %v325_v10, 0  ;;  %s8465_s10 = scalar_lea.vmem [#allocation2], %s8455_s29  ;;  %s8328_s11 = smov 120   ;;  %vm5655_vm4 = vcmask 130048  }
  0x2d   : > { %v316_v13 = vld [vmem:[%s8465_s10] sm:$0xff]  ;;  %v317_v14 = vld [vmem:[%s8465_s10 + $0x8] sm:$0xff]  ;;  %v318_v15 = vld [vmem:[%s8465_s10 + $0x10] sm:$0xff]  ;;  %v8471_v16 = vand.u32 4294901760, %v8462_v12  ;;  %s8329_s12 = smov 104   ;;  %s8330_s17 = smov 8  }
  0x2e   : > { %7179 = vmatprep.subr.mxu0 %v8460_v11  ;;  %v533_v17 = vsub.f32 %v353_v9, %v8460_v11  ;;  %v328_v18 = vsel %vm326_vm1, %v316_v13, 0  ;;  %v331_v19 = vsel %vm326_vm1, %v317_v14, 0  ;;  %v334_v20 = vsel %vm326_vm1, %v318_v15, 0  ;;  %v319_v21 = vld [vmem:[%s8465_s10 + $0x18] sm:$0xff]  ;;  %v320_v22 = vld [vmem:[%s8465_s10 + $0x20] sm:$0xff]  ;;  %v321_v23 = vld [vmem:[%s8465_s10 + $0x28] sm:$0xff] }
  0x2f   : > { %7180 = vmatpush3.msra.mxu0 %v8460_v11  ;;  %v8482_v24 = vand.u32 4294901760, %v328_v18  ;;  %v8484_v25 = vand.u32 4294901760, %v331_v19  ;;  %v8486_v26 = vand.u32 4294901760, %v334_v20  ;;  %v337_v27 = vsel %vm326_vm1, %v319_v21, 0  ;;  %v322_v28 = vld [vmem:[%s8465_s10 + $0x30] sm:$0xff]  ;;  %v323_v45 = vld [vmem:[%s8465_s10 + $0x38] sm:$0xff] }
  0x30   : > { %v8490_v29 = vand.u32 4294901760, %v533_v17  ;;  %7207 = vmatprep.subr.mxu0 %v533_v17  ;;  %v8492_v30 = vand.u32 4294901760, %v337_v27  ;;  %v340_v31 = vsel %vm326_vm1, %v320_v22, 0  ;;  %v343_v32 = vsel %vm326_vm1, %v321_v23, 0  ;;  %s10343_s10 = scalar_lea.vmem [#allocation3], %s8455_s29  ;;  %s6626_s29 = sshll.u32 (%p8423_p7), %s8305_s21, 4 }
  0x31   : > { %v8497_v33 = vsub.f32 %v328_v18, %v8482_v24  ;;  %7195 = vmatprep.mubr.f32.mxu1 %v8482_v24  ;;  %v8501_v34 = vsub.f32 %v331_v19, %v8484_v25  ;;  %v8504_v35 = vsub.f32 %v334_v20, %v8486_v26  ;;  %v8506_v36 = vand.u32 4294901760, %v340_v31 }
  0x32   : > { %v535_v37 = vsub.f32 %v533_v17, %v8490_v29  ;;  %v8510_v38 = vsub.f32 %v337_v27, %v8492_v30  ;;  %v8512_v39 = vand.u32 4294901760, %v343_v32  ;;  %v346_v40 = vsel %vm326_vm1, %v322_v28, 0 }
  0x33   : > { %v8516_v41 = vand.u32 4294901760, %v8497_v33  ;;  %v8519_v42 = vand.u32 4294901760, %v8501_v34  ;;  %v8522_v43 = vand.u32 4294901760, %v8504_v35  ;;  %v8525_v44 = vsub.f32 %v340_v31, %v8506_v36 }
  0x34   : > { %v536_v46 = vand.u32 4294901760, %v535_v37  ;;  %v8529_v47 = vand.u32 4294901760, %v8510_v38  ;;  %v8532_v48 = vsub.f32 %v343_v32, %v8512_v39  ;;  %v8534_v49 = vand.u32 4294901760, %v346_v40 }
  0x35   : > { %v424_v50 = vsub.f32 %v8497_v33, %v8516_v41  ;;  %v434_v51 = vsub.f32 %v8501_v34, %v8519_v42  ;;  %v444_v52 = vsub.f32 %v8504_v35, %v8522_v43  ;;  %v8543_v53 = vand.u32 4294901760, %v8525_v44 }
  0x36   : > { %7193 = vmatprep.subr.mxu1 %v536_v46  ;;  %v454_v54 = vsub.f32 %v8510_v38, %v8529_v47  ;;  %v8548_v55 = vand.u32 4294901760, %v8532_v48  ;;  %v8551_v56 = vsub.f32 %v346_v40, %v8534_v49  ;;  %v349_v57 = vsel %vm326_vm1, %v323_v45, 0 }
  0x37   : > { %v8554_v58 = vand.u32 4294901760, %v424_v50  ;;  %7194 = vmatpush3.msra.mxu1 %v536_v46  ;;  %v8556_v59 = vand.u32 4294901760, %v434_v51  ;;  %v8558_v60 = vand.u32 4294901760, %v444_v52  ;;  %v464_v61 = vsub.f32 %v8525_v44, %v8543_v53 }
  0x38   : > { %7196 = vmatmul.mubr.f32.vlgmr.msra.gmra.mxu1 %v8484_v25  ;;  %7221 = vmatprep.subr.mxu1 %v8460_v11  ;;  %v8565_v62 = vand.u32 4294901760, %v8551_v56  ;;  %v8567_v63 = vand.u32 4294901760, %v349_v57  ;;  %v8573_v0 = vand.u32 4294901760, %v454_v54  ;;  %v474_v1 = vsub.f32 %v8532_v48, %v8548_v55 }
  0x39   : > { %7181 = vmatprep.mubr.f32.mxu0 %v8554_v58  ;;  %7198 = vmatprep.mubr.f32.mxu1 %v8486_v26  ;;  %v8582_v3 = vsub.f32 %v8462_v12, %v8471_v16  ;;  %v8585_v4 = vand.u32 4294901760, %v464_v61 }
  0x3a   : > { %7182 = vmatmul.mubr.f32.vlgmr.msra.gmra.mxu0 %v8556_v59  ;;  %7222 = vmatpush3.msra.mxu1 %v8460_v11  ;;  %v8578_v2 = vsub.f32 %v349_v57, %v8567_v63  ;;  %v484_v5 = vsub.f32 %v8551_v56, %v8565_v62  ;;  %v8597_v7 = vand.u32 4294901760, %v474_v1 }
  0x3b   : > { %7208 = vmatpush3.msra.mxu0 %v533_v17  ;;  %7184 = vmatprep.mubr.f32.mxu0 %v8558_v60  ;;  %v8602_v9 = vand.u32 4294901760, %v8582_v3 }
  0x3c   : > { %7199 = vmatmul.mubr.f32.gmra.mxu1 %v8492_v30  ;;  %v8591_v6 = vand.u32 4294901760, %v8578_v2  ;;  %7235 = vmatprep.subr.mxu0 %v8490_v29  ;;  %v8605_v10 = vand.u32 4294901760, %v484_v5 }
  0x3d   : > { %7201 = vmatprep.mubr.f32.mxu1 %v8506_v36  ;;  %7249 = vmatprep.subr.mxu1 %v8460_v11  ;;  %v1285_v13 = vsub.f32 %v8582_v3, %v8602_v9 }
  0x3e   : > { %7185 = vmatmul.mubr.f32.gmra.mxu0 %v8573_v0  ;;  %v494_v8 = vsub.f32 %v8578_v2, %v8591_v6 }
  0x3f   : > { %7187 = vmatprep.mubr.f32.mxu0 %v8585_v4  ;;  %v1286_v14 = vand.u32 4294901760, %v1285_v13 }
  0x40   : > { %7202 = vmatmul.mubr.f32.gmra.mxu1 %v8512_v39  ;;  %v8610_v12 = vand.u32 4294901760, %v494_v8 }
  0x41   : > { %7204 = vmatprep.mubr.f32.mxu1 %v8534_v49 }
  0x42   : > { %7188 = vmatmul.mubr.f32.gmra.mxu0 %v8597_v7 }
  0x43   : > { %7190 = vmatprep.mubr.f32.mxu0 %v8605_v10 }
  0x44   : > { %7205 = vmatmul.mubr.f32.gmra.mxu1 %v8567_v63 }
  0x45   : > { %7223 = vmatprep.mubr.f32.mxu1 %v8516_v41 }
  0x46   : > { %7191 = vmatmul.mubr.f32.gmra.mxu0 %v8610_v12 }
  0x47   : > { %7209 = vmatprep.mubr.f32.mxu0 %v8497_v33 }
  0x48   : > { %7224 = vmatmul.mubr.f32.vlgmr.msra.gmra.mxu1 %v8519_v42 }
  0x49   : > { %7226 = vmatprep.mubr.f32.mxu1 %v8522_v43  ;;  %7250 = vmatpush3.msra.mxu1 %v8460_v11 }
  0x4a   : > { %7210 = vmatmul.mubr.f32.vlgmr.msra.gmra.mxu0 %v8501_v34  ;;  %7277 = vmatprep.subr.mxu1 %v1286_v14 }
  0x4b   : > { %7236 = vmatpush3.msra.mxu0 %v8490_v29  ;;  %7212 = vmatprep.mubr.f32.mxu0 %v8504_v35 }
  0x4c   : > { %7227 = vmatmul.mubr.f32.gmra.mxu1 %v8529_v47  ;;  %7263 = vmatprep.subr.mxu0 %v8471_v16 }
  0x4d   : > { %7229 = vmatprep.mubr.f32.mxu1 %v8543_v53 }
  0x4e   : > { %7213 = vmatmul.mubr.f32.gmra.mxu0 %v8510_v38 }
  0x4f   : > { %7215 = vmatprep.mubr.f32.mxu0 %v8525_v44 }
  0x50   : > { %7230 = vmatmul.mubr.f32.gmra.mxu1 %v8548_v55 }
  0x51   : > { %7232 = vmatprep.mubr.f32.mxu1 %v8565_v62 }
  0x52   : > { %7216 = vmatmul.mubr.f32.gmra.mxu0 %v8532_v48 }
  0x53   : > { %7218 = vmatprep.mubr.f32.mxu0 %v8551_v56 }
  0x54   : > { %7233 = vmatmul.mubr.f32.gmra.mxu1 %v8591_v6 }
  0x55   : > { %7251 = vmatprep.mubr.f32.mxu1 %v8482_v24 }
  0x56   : > { %7219 = vmatmul.mubr.f32.gmra.mxu0 %v8578_v2 }
  0x57   : > { %7237 = vmatprep.mubr.f32.mxu0 %v8482_v24 }
  0x58   : > { %7252 = vmatmul.mubr.f32.vlgmr.msra.gmra.mxu1 %v8484_v25 }
  0x59   : > { %7254 = vmatprep.mubr.f32.mxu1 %v8486_v26  ;;  %7278 = vmatpush3.msra.mxu1 %v1286_v14 }
  0x5a   : > { %7238 = vmatmul.mubr.f32.vlgmr.msra.gmra.mxu0 %v8484_v25  ;;  %7305 = vmatprep.subr.mxu1 %v8471_v16 }
  0x5b   : > { %7264 = vmatpush3.msra.mxu0 %v8471_v16  ;;  %7240 = vmatprep.mubr.f32.mxu0 %v8486_v26 }
  0x5c   : > { %7255 = vmatmul.mubr.f32.gmra.mxu1 %v8492_v30  ;;  %7291 = vmatprep.subr.mxu0 %v8582_v3 }
  0x5d   : > { %7257 = vmatprep.mubr.f32.mxu1 %v8506_v36 }
  0x5e   : > { %7241 = vmatmul.mubr.f32.gmra.mxu0 %v8492_v30 }
  0x5f   : > { %7243 = vmatprep.mubr.f32.mxu0 %v8506_v36 }
  0x60   : > { %7258 = vmatmul.mubr.f32.gmra.mxu1 %v8512_v39 }
  0x61   : > { %7260 = vmatprep.mubr.f32.mxu1 %v8534_v49 }
  0x62   : > { %7244 = vmatmul.mubr.f32.gmra.mxu0 %v8512_v39 }
  0x63   : > { %7246 = vmatprep.mubr.f32.mxu0 %v8534_v49 }
  0x64   : > { %7261 = vmatmul.mubr.f32.gmra.mxu1 %v8567_v63 }
  0x65   : > { %7279 = vmatprep.mubr.f32.mxu1 %v8482_v24 }
  0x66   : > { %7247 = vmatmul.mubr.f32.gmra.mxu0 %v8567_v63 }
  0x67   : > { %7265 = vmatprep.mubr.f32.mxu0 %v8554_v58 }
  0x68   : > { %7280 = vmatmul.mubr.f32.vlgmr.msra.gmra.mxu1 %v8484_v25 }
  0x69   : > { %7282 = vmatprep.mubr.f32.mxu1 %v8486_v26  ;;  %7306 = vmatpush3.msra.mxu1 %v8471_v16 }
  0x6a   : > { %7266 = vmatmul.mubr.f32.vlgmr.msra.gmra.mxu0 %v8556_v59  ;;  %7333 = vmatprep.subr.mxu1 %v8471_v16 }
  0x6b   : > { %7292 = vmatpush3.msra.mxu0 %v8582_v3  ;;  %7268 = vmatprep.mubr.f32.mxu0 %v8558_v60 }
  0x6c   : > { %7283 = vmatmul.mubr.f32.gmra.mxu1 %v8492_v30  ;;  %7319 = vmatprep.subr.mxu0 %v8602_v9 }
  0x6d   : > { %7285 = vmatprep.mubr.f32.mxu1 %v8506_v36 }
  0x6e   : > { %7269 = vmatmul.mubr.f32.gmra.mxu0 %v8573_v0 }
  0x6f   : > { %7271 = vmatprep.mubr.f32.mxu0 %v8585_v4 }
  0x70   : > { %7286 = vmatmul.mubr.f32.gmra.mxu1 %v8512_v39 }
  0x71   : > { %7288 = vmatprep.mubr.f32.mxu1 %v8534_v49 }
  0x72   : > { %7272 = vmatmul.mubr.f32.gmra.mxu0 %v8597_v7 }
  0x73   : > { %7274 = vmatprep.mubr.f32.mxu0 %v8605_v10 }
  0x74   : > { %7289 = vmatmul.mubr.f32.gmra.mxu1 %v8567_v63 }
  0x75   : > { %7307 = vmatprep.mubr.f32.mxu1 %v8516_v41 }
  0x76   : > { %7275 = vmatmul.mubr.f32.gmra.mxu0 %v8610_v12 }
  0x77   : > { %7293 = vmatprep.mubr.f32.mxu0 %v8497_v33 }
  0x78   : > { %7308 = vmatmul.mubr.f32.vlgmr.msra.gmra.mxu1 %v8519_v42 }
  0x79   : > { %7310 = vmatprep.mubr.f32.mxu1 %v8522_v43  ;;  %7334 = vmatpush3.msra.mxu1 %v8471_v16 }
  0x7a   : > { %7294 = vmatmul.mubr.f32.vlgmr.msra.gmra.mxu0 %v8501_v34 }
  0x7b   : > { %7320 = vmatpush3.msra.mxu0 %v8602_v9  ;;  %7296 = vmatprep.mubr.f32.mxu0 %v8504_v35 }
  0x7c   : > { %7311 = vmatmul.mubr.f32.gmra.mxu1 %v8529_v47 }
  0x7d   : > { %7313 = vmatprep.mubr.f32.mxu1 %v8543_v53 }
  0x7e   : > { %7297 = vmatmul.mubr.f32.gmra.mxu0 %v8510_v38 }
  0x7f   : > { %7299 = vmatprep.mubr.f32.mxu0 %v8525_v44 }
  0x80   : > { %7314 = vmatmul.mubr.f32.gmra.mxu1 %v8548_v55 }
  0x81   : > { %7316 = vmatprep.mubr.f32.mxu1 %v8565_v62 }
  0x82   : > { %7300 = vmatmul.mubr.f32.gmra.mxu0 %v8532_v48 }
  0x83   : > { %7302 = vmatprep.mubr.f32.mxu0 %v8551_v56 }
  0x84   : > { %7317 = vmatmul.mubr.f32.gmra.mxu1 %v8591_v6 }
  0x85   : > { %7335 = vmatprep.mubr.f32.mxu1 %v8482_v24 }
  0x86   : > { %7303 = vmatmul.mubr.f32.gmra.mxu0 %v8578_v2 }
  0x87   : > { %7321 = vmatprep.mubr.f32.mxu0 %v8482_v24 }
  0x88   : > { %7336 = vmatmul.mubr.f32.vlgmr.msra.gmra.mxu1 %v8484_v25 }
  0x89   : > { %7338 = vmatprep.mubr.f32.mxu1 %v8486_v26 }
  0x8a   : > { %7322 = vmatmul.mubr.f32.vlgmr.msra.gmra.mxu0 %v8484_v25 }
  0x8b   : > { %7324 = vmatprep.mubr.f32.mxu0 %v8486_v26 }
  0x8c   : > { %7339 = vmatmul.mubr.f32.gmra.mxu1 %v8492_v30 }
  0x8d   : > { %7341 = vmatprep.mubr.f32.mxu1 %v8506_v36 }
  0x8e   : > { %7325 = vmatmul.mubr.f32.gmra.mxu0 %v8492_v30 }
  0x8f   : > { %7327 = vmatprep.mubr.f32.mxu0 %v8506_v36 }
  0x90   : > { %7342 = vmatmul.mubr.f32.gmra.mxu1 %v8512_v39 }
  0x91   : > { %7344 = vmatprep.mubr.f32.mxu1 %v8534_v49 }
  0x92   : > { %7328 = vmatmul.mubr.f32.gmra.mxu0 %v8512_v39 }
  0x93   : > { %7330 = vmatprep.mubr.f32.mxu0 %v8534_v49 }
  0x94   : > { %7345 = vmatmul.mubr.f32.gmra.mxu1 %v8567_v63 }
  0x96   : > { %7331 = vmatmul.mubr.f32.gmra.mxu0 %v8567_v63 }
  0xf8   : > { %v7197_v11 = vpop.f32.mrf.mxu1 }
  0xfa   : > { %v7183_v15 = vpop.f32.mrf.mxu0  ;;  %v573_v16 = vpop.f32.mrf.mxu1 }
  0xfb   : > { %v580_v17 = vadd.f32 %v7197_v11, %v7183_v15 }
  0xfc   : > { %v427_v18 = vpop.f32.mrf.mxu0  ;;  %v7200_v19 = vpop.f32.mrf.mxu1 }
  0xfd   : > { %v574_v52 = vadd.f32 %v573_v16, %v427_v18 }
  0xfe   : > { %v7186_v20 = vpop.f32.mrf.mxu0  ;;  %v8709_v21 = vpop.f32.mrf.mxu1 }
  0xff   : > { %v592_v22 = vadd.f32 %v7200_v19, %v7186_v20 }
 0x100   : > { %v8711_v23 = vpop.f32.mrf.mxu0  ;;  %v7203_v24 = vpop.f32.mrf.mxu1 }
 0x102   : > { %v7189_v25 = vpop.f32.mrf.mxu0  ;;  %v8713_v26 = vpop.f32.mrf.mxu1 }
 0x103   : > { %v604_v27 = vadd.f32 %v7203_v24, %v7189_v25 }
 0x104   : > { %v8715_v28 = vpop.f32.mrf.mxu0  ;;  %v7206_v29 = vpop.f32.mrf.mxu1 }
 0x106   : > { %v7192_v30 = vpop.f32.mrf.mxu0  ;;  %v8717_v31 = vpop.f32.mrf.mxu1 }
 0x107   : > { %v616_v32 = vadd.f32 %v7206_v29, %v7192_v30 }
 0x108   : > { %v8719_v33 = vpop.f32.mrf.mxu0  ;;  %v7225_v34 = vpop.f32.mrf.mxu1 }
 0x10a   : > { %v7211_v35 = vpop.f32.mrf.mxu0  ;;  %v812_v36 = vpop.f32.mrf.mxu1 }
 0x10b   : > { %v697_v37 = vadd.f32 %v7211_v35, %v580_v17 }
 0x10c   : > { %v689_v38 = vpop.f32.mrf.mxu0  ;;  %v7228_v39 = vpop.f32.mrf.mxu1 }
 0x10d   : > { %v821_v40 = vadd.f32 %v7225_v34, %v697_v37  ;;  %v690_v56 = vadd.f32 %v689_v38, %v574_v52 }
 0x10e   : > { %v7214_v41 = vpop.f32.mrf.mxu0  ;;  %v8721_v42 = vpop.f32.mrf.mxu1 }
 0x10f   : > { %v711_v43 = vadd.f32 %v7214_v41, %v592_v22  ;;  %v813_v63 = vadd.f32 %v812_v36, %v690_v56 }
 0x110   : > { %v8723_v44 = vpop.f32.mrf.mxu0  ;;  %v7231_v45 = vpop.f32.mrf.mxu1 }
 0x111   : > { %v837_v46 = vadd.f32 %v7228_v39, %v711_v43 }
 0x112   : > { %v7217_v47 = vpop.f32.mrf.mxu0  ;;  %v8725_v48 = vpop.f32.mrf.mxu1 }
 0x113   : > { %10429 = vst [vmem:[#allocation4_spill] sm:$0xff] %v8725_v48  ;;  %v725_v49 = vadd.f32 %v7217_v47, %v604_v27 }
 0x114   : > { %v8727_v50 = vpop.f32.mrf.mxu0  ;;  %v7234_v51 = vpop.f32.mrf.mxu1 }
 0x115   : > { %v853_v53 = vadd.f32 %v7231_v45, %v725_v49 }
 0x116   : > { %v7220_v54 = vpop.f32.mrf.mxu0  ;;  %v8729_v55 = vpop.f32.mrf.mxu1 }
 0x117   : > { %10430 = vst [vmem:[#allocation5_spill] sm:$0xff] %v8729_v55  ;;  %v739_v57 = vadd.f32 %v7220_v54, %v616_v32 }
 0x118   : > { %v8731_v58 = vpop.f32.mrf.mxu0  ;;  %v7253_v59 = vpop.f32.mrf.mxu1 }
 0x119   : > { %10431 = vst [vmem:[#allocation6_spill] sm:$0xff] %v8731_v58  ;;  %v869_v60 = vadd.f32 %v7234_v51, %v739_v57 }
 0x11a   : > { %v7239_v61 = vpop.f32.mrf.mxu0  ;;  %v1056_v62 = vpop.f32.mrf.mxu1 }
 0x11b   : > { %v949_v0 = vadd.f32 %v7239_v61, %v821_v40 }
 0x11c   : > { %v942_v1 = vpop.f32.mrf.mxu0  ;;  %v7256_v2 = vpop.f32.mrf.mxu1 }
 0x11d   : > { %v8733_v3 = vadd.f32 %v7253_v59, %v949_v0  ;;  %v943_v4 = vadd.f32 %v942_v1, %v813_v63 }
 0x11e   : > { %v7242_v5 = vpop.f32.mrf.mxu0  ;;  %v8735_v6 = vpop.f32.mrf.mxu1 }
 0x11f   : > { %10432 = vst [vmem:[#allocation7_spill] sm:$0xff] %v8733_v3  ;;  %10433 = vst [vmem:[#allocation8_spill] sm:$0xff] %v8735_v6  ;;  %v8737_v7 = vadd.f32 %v1056_v62, %v943_v4  ;;  %v961_v8 = vadd.f32 %v7242_v5, %v837_v46 }
 0x120   : > { %v8739_v9 = vpop.f32.mrf.mxu0  ;;  %v7259_v10 = vpop.f32.mrf.mxu1 }
 0x121   : > { %10434 = vst [vmem:[#allocation9_spill] sm:$0xff] %v8737_v7  ;;  %v1854_v12 = vsel %vm1852_vm2, %v8737_v7, 0  ;;  %v8743_v13 = vadd.f32 %v7256_v2, %v961_v8 }
 0x122   : > { %v8745_v14 = vand.u32 4294901760, %v1854_v12  ;;  %v7245_v11 = vpop.f32.mrf.mxu0  ;;  %v8747_v15 = vpop.f32.mrf.mxu1 }
 0x123   : > { %10435 = vst [vmem:[#allocation10_spill] sm:$0xff] %v8743_v13  ;;  %10437 = vst [vmem:[#allocation12_spill] sm:$0xff] %v8747_v15  ;;  %v973_v16 = vadd.f32 %v7245_v11, %v853_v53 }
 0x124   : > { %10436 = vst [vmem:[#allocation11_spill] sm:$0xff] %v8745_v14  ;;  %v8750_v17 = vsub.f32 %v1854_v12, %v8745_v14  ;;  %v8752_v18 = vpop.f32.mrf.mxu0  ;;  %7391 = vmatprep.mubr.f32.mxu1 %v8745_v14  ;;  %v7262_v19 = vpop.f32.mrf.mxu1 }
 0x125   : > { %10439 = vst [vmem:[#allocation14_spill] sm:$0xff] %v8752_v18  ;;  %v8755_v20 = vadd.f32 %v7259_v10, %v973_v16 }
 0x126   : > { %10438 = vst [vmem:[#allocation13_spill] sm:$0xff] %v8750_v17  ;;  %v7248_v22 = vpop.f32.mrf.mxu0  ;;  %v8757_v24 = vpop.f32.mrf.mxu1  ;;  %v10412_v25 = vand.u32 4294901760, %v8750_v17 }
 0x127   : > { %10440 = vst [vmem:[#allocation15_spill] sm:$0xff] %v8755_v20  ;;  %10441 = vst [vmem:[#allocation16_spill] sm:$0xff] %v8757_v24  ;;  %v985_v27 = vadd.f32 %v7248_v22, %v869_v60 }
 0x128   : > { %v8760_v29 = vpop.f32.mrf.mxu0  ;;  %v7281_v30 = vpop.f32.mrf.mxu1  ;;  %v1977_v32 = vsub.f32 %v8750_v17, %v10412_v25 }
 0x129   : > { %10442 = vst [vmem:[#allocation17_spill] sm:$0xff] %v8760_v29  ;;  %v8765_v34 = vadd.f32 %v7262_v19, %v985_v27 }
 0x12a   : > { %v7267_v35 = vpop.f32.mrf.mxu0  ;;  %v8767_v36 = vpop.f32.mrf.mxu1  ;;  %v1978_v37 = vand.u32 4294901760, %v1977_v32 }
 0x12b   : > { %10443 = vst [vmem:[#allocation18_spill] sm:$0xff] %v8765_v34 }
 0x12c   : > { %v8769_v38 = vpop.f32.mrf.mxu0  ;;  %7363 = vmatprep.mubr.f32.mxu0 %v1978_v37  ;;  %v7284_v39 = vpop.f32.mrf.mxu1 }
 0x12e   : > { %v7270_v40 = vpop.f32.mrf.mxu0  ;;  %v1335_v41 = vpop.f32.mrf.mxu1 }
 0x12f   : > { %v1342_v25 = vadd.f32 %v7284_v39, %v7270_v40  ;;  %v1330_v39 = vadd.f32 %v7281_v30, %v7267_v35 }
 0x130   : > { %v1197_v43 = vpop.f32.mrf.mxu0  ;;  %v7287_v45 = vpop.f32.mrf.mxu1 }
 0x131   : > { %v1336_v6 = vadd.f32 %v1335_v41, %v1197_v43 }
 0x132   : > { %v7273_v46 = vpop.f32.mrf.mxu0  ;;  %v1347_v47 = vpop.f32.mrf.mxu1 }
 0x133   : > { %v1354_v27 = vadd.f32 %v7287_v45, %v7273_v46 }
 0x134   : > { %v1217_v49 = vpop.f32.mrf.mxu0  ;;  %v7290_v51 = vpop.f32.mrf.mxu1 }
 0x135   : > { %v1348_v7 = vadd.f32 %v1347_v47, %v1217_v49 }
 0x136   : > { %v7276_v52 = vpop.f32.mrf.mxu0  ;;  %v1359_v53 = vpop.f32.mrf.mxu1 }
 0x137   : > { %v1366_v20 = vadd.f32 %v7290_v51, %v7276_v52 }
 0x138   : > { %v1237_v54 = vpop.f32.mrf.mxu0  ;;  %v8771_v56 = vpop.f32.mrf.mxu1 }
 0x139   : > { %v1360_v3 = vadd.f32 %v1359_v53, %v1237_v54 }
 0x13a   : > { %v7295_v57 = vpop.f32.mrf.mxu0  ;;  %v8773_v59 = vpop.f32.mrf.mxu1 }
 0x13c   : > { %v8775_v60 = vpop.f32.mrf.mxu0  ;;  %v7312_v61 = vpop.f32.mrf.mxu1 }
 0x13e   : > { %v7298_v62 = vpop.f32.mrf.mxu0  ;;  %v1578_v63 = vpop.f32.mrf.mxu1 }
 0x13f   : > { %v1461_v24 = vadd.f32 %v7298_v62, %v1342_v25  ;;  %v1447_v25 = vadd.f32 %v7295_v57, %v1330_v39  ;;  %v10450_v39 = vld [vmem:[#allocation14_spill] sm:$0xff] }
 0x140   : > { %v1453_v0 = vpop.f32.mrf.mxu0  ;;  %v7315_v1 = vpop.f32.mrf.mxu1 }
 0x141   : > { %v1587_v45 = vadd.f32 %v7312_v61, %v1461_v24  ;;  %v1454_v40 = vadd.f32 %v1453_v0, %v1336_v6  ;;  %v1571_v24 = vadd.f32 %v8771_v56, %v1447_v25 }
 0x142   : > { %v7301_v2 = vpop.f32.mrf.mxu0  ;;  %v1594_v4 = vpop.f32.mrf.mxu1 }
 0x143   : > { %v1475_v14 = vadd.f32 %v7301_v2, %v1354_v27 }
 0x144   : > { %v1467_v5 = vpop.f32.mrf.mxu0  ;;  %v7318_v8 = vpop.f32.mrf.mxu1 }
 0x145   : > { %v1468_v13 = vadd.f32 %v1467_v5, %v1348_v7  ;;  %v1603_v55 = vadd.f32 %v7315_v1, %v1475_v14  ;;  %v610_v1 = vadd.f32 %v8717_v31, %v8719_v33 }
 0x146   : > { %v7304_v10 = vpop.f32.mrf.mxu0  ;;  %v1610_v12 = vpop.f32.mrf.mxu1 }
 0x147   : > { %v1489_v18 = vadd.f32 %v7304_v10, %v1366_v20  ;;  %v1595_v46 = vadd.f32 %v1594_v4, %v1468_v13 }
 0x148   : > { %v1481_v11 = vpop.f32.mrf.mxu0  ;;  %v8777_v16 = vpop.f32.mrf.mxu1 }
 0x149   : > { %v1619_v49 = vadd.f32 %v7318_v8, %v1489_v18  ;;  %v1324_v18 = vadd.f32 %v8767_v36, %v8769_v38 }
 0x14a   : > { %v7323_v19 = vpop.f32.mrf.mxu0  ;;  %v8779_v22 = vpop.f32.mrf.mxu1 }
 0x14b   : > { %10444 = vst [vmem:[#allocation19_spill] sm:$0xff] %v8779_v22  ;;  %v1440_v36 = vadd.f32 %v8775_v60, %v1324_v18  ;;  %v1699_v38 = vadd.f32 %v7323_v19, %v1571_v24  ;;  %v10456_v18 = vld [vmem:[#allocation17_spill] sm:$0xff] }
 0x14c   : > { %v8781_v32 = vpop.f32.mrf.mxu0  ;;  %v7340_v37 = vpop.f32.mrf.mxu1 }
 0x14d   : > { %10445 = vst [vmem:[#allocation20_spill] sm:$0xff] %v8781_v32  ;;  %v1482_v32 = vadd.f32 %v1481_v11, %v1360_v3  ;;  %v1579_v3 = vadd.f32 %v1578_v63, %v1454_v40 }
 0x14e   : > { %v7326_v17 = vpop.f32.mrf.mxu0  ;;  %v1818_v34 = vpop.f32.mrf.mxu1 }
 0x14f   : > { %v1711_v2 = vadd.f32 %v7326_v17, %v1587_v45  ;;  %v1611_v14 = vadd.f32 %v1610_v12, %v1482_v32  ;;  %v10449_v45 = vld [vmem:[#allocation8_spill] sm:$0xff] }
 0x150   : > { %v1704_v29 = vpop.f32.mrf.mxu0  ;;  %v7343_v15 = vpop.f32.mrf.mxu1 }
 0x151   : > { %v8791_v6 = vadd.f32 %v7340_v37, %v1711_v2  ;;  %v1705_v43 = vadd.f32 %v1704_v29, %v1579_v3 }
 0x152   : > { %v7329_v58 = vpop.f32.mrf.mxu0  ;;  %v1830_v22 = vpop.f32.mrf.mxu1 }
 0x153   : > { %v1723_v48 = vadd.f32 %v7329_v58, %v1603_v55  ;;  %v586_v55 = vadd.f32 %v8709_v21, %v8711_v23  ;;  %v1887_v56 = vsel %vm1852_vm2, %v8791_v6, 0  ;;  %v8829_v0 = vadd.f32 %v1818_v34, %v1705_v43 }
 0x154   : > { %v1716_v47 = vpop.f32.mrf.mxu0  ;;  %v7346_v53 = vpop.f32.mrf.mxu1  ;;  %v8846_v34 = vand.u32 4294901760, %v1887_v56 }
 0x155   : > { %v8783_v51 = vadd.f32 %v7343_v15, %v1723_v48  ;;  %v1717_v7 = vadd.f32 %v1716_v47, %v1595_v46  ;;  %v704_v17 = vadd.f32 %v8723_v44, %v586_v55  ;;  %v598_v44 = vadd.f32 %v8713_v26, %v8715_v28  ;;  %v10453_v55 = vld [vmem:[#allocation7_spill] sm:$0xff] }
 0x156   : > { %v7332_v52 = vpop.f32.mrf.mxu0  ;;  %v1842_v35 = vpop.f32.mrf.mxu1  ;;  %v1884_v27 = vsel %vm1852_vm2, %v8829_v0, 0 }
 0x157   : > { %v1893_v20 = vsel %vm1852_vm2, %v8783_v51, 0  ;;  %v8787_v41 = vadd.f32 %v1830_v22, %v1717_v7  ;;  %v1735_v13 = vadd.f32 %v7332_v52, %v1619_v49  ;;  %v829_v28 = vadd.f32 %v8721_v42, %v704_v17 }
 0x158   : > { %v1728_v58 = vpop.f32.mrf.mxu0  ;;  %v8799_v30 = vand.u32 4294901760, %v1893_v20  ;;  %v718_v60 = vadd.f32 %v8727_v50, %v598_v44  ;;  %v1563_v42 = vadd.f32 %v8773_v59, %v1440_v36  ;;  %v8844_v50 = vadd.f32 %v8777_v16, %v1699_v38  ;;  %v10447_v59 = vld [vmem:[#allocation6_spill] sm:$0xff]  ;;  %v10448_v16 = vld [vmem:[#allocation20_spill] sm:$0xff] }
 0x159   : > { %v8793_v48 = vadd.f32 %v7346_v53, %v1735_v13  ;;  %v1729_v15 = vadd.f32 %v1728_v58, %v1611_v14  ;;  %v1890_v21 = vsel %vm1852_vm2, %v8787_v41, 0  ;;  %v955_v8 = vadd.f32 %v8739_v9, %v829_v28  ;;  %v10446_v9 = vld [vmem:[#allocation4_spill] sm:$0xff]  ;;  %v10451_v53 = vld [vmem:[#allocation5_spill] sm:$0xff] }
 0x15a   : > { %v8817_v61 = vsub.f32 %v1893_v20, %v8799_v30  ;;  %v8819_v62 = vand.u32 4294901760, %v1890_v21  ;;  %v845_v11 = vadd.f32 %v10446_v9, %v718_v60  ;;  %v732_v19 = vadd.f32 %v10447_v59, %v610_v1  ;;  %v10452_v20 = vld [vmem:[#allocation19_spill] sm:$0xff]  ;;  %v10458_v1 = vld [vmem:[#allocation16_spill] sm:$0xff] }
 0x15b   : > { %v1899_v23 = vsel %vm1852_vm2, %v8793_v48, 0  ;;  %v8805_v54 = vadd.f32 %v1842_v35, %v1729_v15  ;;  %v1693_v22 = vadd.f32 %v10448_v16, %v1563_v42  ;;  %v8869_v46 = vadd.f32 %v10449_v45, %v955_v8  ;;  %v10454_v15 = vld [vmem:[#allocation12_spill] sm:$0xff] }
 0x15c   : > { %v8809_v57 = vand.u32 4294901760, %v1899_v23  ;;  %v8849_v10 = vsub.f32 %v1890_v21, %v8819_v62  ;;  %v8857_v12 = vand.u32 4294901760, %v8817_v61  ;;  %v967_v40 = vadd.f32 %v10450_v39, %v845_v11 }
 0x15d   : > { %v1896_v29 = vsel %vm1852_vm2, %v8805_v54, 0  ;;  %v1881_v47 = vsel %vm1852_vm2, %v8844_v50, 0  ;;  %v8875_v49 = vsub.f32 %v1887_v56, %v8846_v34  ;;  %v8877_v2 = vand.u32 4294901760, %v1884_v27  ;;  %v10457_v56 = vld [vmem:[#allocation10_spill] sm:$0xff] }
 0x15e   : > { %v8822_v63 = vsub.f32 %v1899_v23, %v8809_v57  ;;  %v8824_v26 = vand.u32 4294901760, %v1896_v29  ;;  %7347 = vmatprep.subr.mxu0 %v8809_v57  ;;  %v2088_v25 = vsub.f32 %v8817_v61, %v8857_v12  ;;  %v8882_v52 = vand.u32 4294901760, %v8849_v10 }
 0x15f   : > { %7348 = vmatpush3.xpose.msra.mxu0 %v8809_v57  ;;  %v861_v14 = vadd.f32 %v10451_v53, %v732_v19  ;;  %v8886_v13 = vadd.f32 %v10452_v20, %v1693_v22  ;;  %v1857_v58 = vsel %vm1852_vm2, %v10453_v55, 0  ;;  %v1860_v3 = vsel %vm1852_vm2, %v8869_v46, 0 }
 0x160   : > { %v8835_v4 = vsub.f32 %v1896_v29, %v8824_v26  ;;  %7349 = vmatprep.subr.mxu0 %v8824_v26  ;;  %v8839_v5 = vand.u32 4294901760, %v8822_v63  ;;  %v8895_v17 = vadd.f32 %v10454_v15, %v967_v40  ;;  %v8898_v35 = vand.u32 4294901760, %v1881_v47 }
 0x161   : > { %v979_v24 = vadd.f32 %v10456_v18, %v861_v14  ;;  %v8901_v43 = vsub.f32 %v1884_v27, %v8877_v2  ;;  %v2089_v21 = vand.u32 4294901760, %v2088_v25  ;;  %v2095_v23 = vsub.f32 %v8849_v10, %v8882_v52  ;;  %v10460_v27 = vld [vmem:[#allocation15_spill] sm:$0xff] }
 0x162   : > { %v2074_v31 = vsub.f32 %v8822_v63, %v8839_v5  ;;  %v8854_v33 = vand.u32 4294901760, %v8835_v4  ;;  %10455 = vst [vmem:[#allocation4_spill] sm:$0xff] %v8895_v17  ;;  %v8906_v44 = vand.u32 4294901760, %v8875_v49  ;;  %v1878_v36 = vsel %vm1852_vm2, %v8886_v13, 0 }
 0x163   : > { %7350 = vmatpush3.xpose.msra.mxu0 %v8824_v26  ;;  %v8911_v38 = vand.u32 4294901760, %v1857_v58  ;;  %v1863_v29 = vsel %vm1852_vm2, %v10457_v56, 0  ;;  %v8916_v28 = vand.u32 4294901760, %v1860_v3  ;;  %v1866_v60 = vsel %vm1852_vm2, %v8895_v17, 0 }
 0x164   : > { %7351 = vmatprep.subr.mxu0 %v8799_v30  ;;  %v2075_v32 = vand.u32 4294901760, %v2074_v31  ;;  %v2081_v37 = vsub.f32 %v8835_v4, %v8854_v33  ;;  %v8921_v8 = vadd.f32 %v10458_v1, %v979_v24  ;;  %v8924_v42 = vsub.f32 %v1881_v47, %v8898_v35 }
 0x165   : > { %v8926_v31 = vand.u32 4294901760, %v1878_v36  ;;  %v2096_v9 = vand.u32 4294901760, %v2095_v23  ;;  %v2102_v11 = vsub.f32 %v8875_v49, %v8906_v44  ;;  %v8931_v59 = vand.u32 4294901760, %v8901_v43 }
 0x166   : > { %7375 = vmatprep.subr.mxu1 %v2075_v32  ;;  %v2082_v7 = vand.u32 4294901760, %v2081_v37  ;;  %10459 = vst [vmem:[#allocation6_spill] sm:$0xff] %v8921_v8  ;;  %v8935_v19 = vsub.f32 %v1857_v58, %v8911_v38  ;;  %v8937_v16 = vand.u32 4294901760, %v1863_v29  ;;  %v8941_v22 = vsub.f32 %v1860_v3, %v8916_v28  ;;  %v10461_v58 = vld [vmem:[#allocation18_spill] sm:$0xff] }
 0x167   : > { %7352 = vmatpush3.xpose.msra.mxu0 %v8799_v30  ;;  %7376 = vmatpush3.xpose.msra.mxu1 %v2075_v32  ;;  %v1869_v32 = vsel %vm1852_vm2, %v10460_v27, 0  ;;  %v8945_v37 = vand.u32 4294901760, %v1866_v60  ;;  %v1872_v45 = vsel %vm1852_vm2, %v8921_v8, 0  ;;  %v8950_v39 = vsub.f32 %v1878_v36, %v8926_v31 }
 0x168   : > { %7353 = vmatprep.subr.mxu0 %v8819_v62  ;;  %7377 = vmatprep.subr.mxu1 %v2082_v7  ;;  %v2103_v40 = vand.u32 4294901760, %v2102_v11  ;;  %v2109_v47 = vsub.f32 %v8901_v43, %v8931_v59  ;;  %v10422_v25 = vand.u32 4294901760, %v8935_v19  ;;  %v8960_v53 = vsub.f32 %v1863_v29, %v8937_v16 }
 0x169   : > { %v8962_v14 = vand.u32 4294901760, %v1869_v32  ;;  %v8966_v20 = vsub.f32 %v1866_v60, %v8945_v37  ;;  %v1875_v3 = vsel %vm1852_vm2, %v10461_v58, 0  ;;  %v8970_v15 = vand.u32 4294901760, %v1872_v45 }
 0x16a   : > { %v10424_v18 = vand.u32 4294901760, %v8941_v22  ;;  %v2110_v24 = vand.u32 4294901760, %v2109_v47  ;;  %v8976_v23 = vand.u32 4294901760, %v8950_v39  ;;  %v1987_v36 = vsub.f32 %v8935_v19, %v10422_v25 }
 0x16b   : > { %7354 = vmatpush3.xpose.msra.mxu0 %v8819_v62  ;;  %7378 = vmatpush3.xpose.msra.mxu1 %v2082_v7  ;;  %v8955_v7 = vand.u32 4294901760, %v8924_v42  ;;  %v8983_v29 = vsub.f32 %v1869_v32, %v8962_v14  ;;  %v8985_v60 = vand.u32 4294901760, %v1875_v3  ;;  %v10425_v1 = vand.u32 4294901760, %v8960_v53 }
 0x16c   : > { %7355 = vmatprep.subr.mxu0 %v8846_v34  ;;  %7379 = vmatprep.subr.mxu1 %v2089_v21  ;;  %v1997_v11 = vsub.f32 %v8941_v22, %v10424_v18  ;;  %v2123_v32 = vsub.f32 %v8950_v39, %v8976_v23  ;;  %v1988_v25 = vand.u32 4294901760, %v1987_v36 }
 0x16d   : > { %v9000_v8 = vsub.f32 %v1875_v3, %v8985_v60  ;;  %v2026_v18 = vand.u32 4294901760, %v8983_v29 }
 0x16e   : > { %v2124_v36 = vand.u32 4294901760, %v2123_v32 }
 0x16f   : > { %7356 = vmatpush3.xpose.msra.mxu0 %v8846_v34  ;;  %7380 = vmatpush3.xpose.msra.mxu1 %v2089_v21  ;;  %v2116_v21 = vsub.f32 %v8924_v42, %v8955_v7 }
 0x170   : > { %7357 = vmatprep.subr.mxu0 %v8877_v2  ;;  %7381 = vmatprep.subr.mxu1 %v2096_v9 }
 0x171   : > { %v2117_v47 = vand.u32 4294901760, %v2116_v21  ;;  %v1998_v21 = vand.u32 4294901760, %v1997_v11  ;;  %v2046_v11 = vand.u32 4294901760, %v9000_v8 }
 0x173   : > { %7358 = vmatpush3.xpose.msra.mxu0 %v8877_v2  ;;  %7382 = vmatpush3.xpose.msra.mxu1 %v2096_v9  ;;  %v8990_v9 = vsub.f32 %v1872_v45, %v8970_v15  ;;  %v2007_v45 = vsub.f32 %v8960_v53, %v10425_v1  ;;  %v2027_v1 = vsub.f32 %v8983_v29, %v2026_v18 }
 0x174   : > { %7359 = vmatprep.subr.mxu0 %v8898_v35  ;;  %7383 = vmatprep.subr.mxu1 %v2103_v40 }
 0x175   : > { %v2008_v3 = vand.u32 4294901760, %v2007_v45 }
 0x177   : > { %7360 = vmatpush3.xpose.msra.mxu0 %v8898_v35  ;;  %7384 = vmatpush3.xpose.msra.mxu1 %v2103_v40  ;;  %v2016_v40 = vand.u32 4294901760, %v8966_v20 }
 0x178   : > { %7361 = vmatprep.subr.mxu0 %v8926_v31  ;;  %7385 = vmatprep.subr.mxu1 %v2110_v24 }
 0x179   : > { %v2017_v58 = vsub.f32 %v8966_v20, %v2016_v40 }
 0x17b   : > { %7362 = vmatpush3.xpose.msra.mxu0 %v8926_v31  ;;  %7386 = vmatpush3.xpose.msra.mxu1 %v2110_v24  ;;  %v2036_v24 = vand.u32 4294901760, %v8990_v9  ;;  %v2018_v17 = vand.u32 4294901760, %v2017_v58 }
 0x17c   : > { %7387 = vmatprep.subr.mxu1 %v2117_v47  ;;  %7403 = vmatprep.subr.mxu0 %v8822_v63 }
 0x17e   : > { %7364 = vmatmul.mubr.f32.vlgmr.msra.gmra.mxu0 %v1988_v25  ;;  %v2037_v25 = vsub.f32 %v8990_v9, %v2036_v24 }
 0x17f   : > { %7366 = vmatprep.mubr.f32.mxu0 %v1998_v21  ;;  %7388 = vmatpush3.xpose.msra.mxu1 %v2117_v47  ;;  %v2047_v47 = vsub.f32 %v9000_v8, %v2046_v11 }
 0x180   : > { %7404 = vmatpush3.xpose.msra.mxu0 %v8822_v63  ;;  %7389 = vmatprep.subr.mxu1 %v2124_v36  ;;  %v2028_v63 = vand.u32 4294901760, %v2027_v1  ;;  %v2038_v32 = vand.u32 4294901760, %v2037_v25 }
 0x181   : > { %7405 = vmatprep.subr.mxu0 %v8835_v4 }
 0x182   : > { %7367 = vmatmul.mubr.f32.gmra.mxu0 %v2008_v3 }
 0x183   : > { %7369 = vmatprep.mubr.f32.mxu0 %v2018_v17  ;;  %7390 = vmatpush3.xpose.msra.mxu1 %v2124_v36  ;;  %v10462_v17 = vld [vmem:[#allocation13_spill] sm:$0xff] }
 0x184   : > { %7406 = vmatpush3.xpose.msra.mxu0 %v8835_v4  ;;  %7431 = vmatprep.subr.mxu1 %v8809_v57  ;;  %v2048_v4 = vand.u32 4294901760, %v2047_v47 }
 0x185   : > { %7407 = vmatprep.subr.mxu0 %v8817_v61 }
 0x186   : > { %7370 = vmatmul.mubr.f32.gmra.mxu0 %v2028_v63  ;;  %7392 = vmatmul.mubr.f32.vlgmr.msra.gmra.mxu1 %v8911_v38 }
 0x187   : > { %7372 = vmatprep.mubr.f32.mxu0 %v2038_v32  ;;  %7394 = vmatprep.mubr.f32.mxu1 %v8916_v28 }
 0x188   : > { %7408 = vmatpush3.xpose.msra.mxu0 %v8817_v61  ;;  %7432 = vmatpush3.xpose.msra.mxu1 %v8809_v57  ;;  %v10463_v61 = vand.u32 4294901760, %v10462_v17 }
 0x189   : > { %7409 = vmatprep.subr.mxu0 %v8849_v10  ;;  %7433 = vmatprep.subr.mxu1 %v8824_v26 }
 0x18a   : > { %7373 = vmatmul.mubr.f32.gmra.mxu0 %v2048_v4  ;;  %7395 = vmatmul.mubr.f32.gmra.mxu1 %v8937_v16 }
 0x18b   : > { %7397 = vmatprep.mubr.f32.mxu1 %v8945_v37  ;;  %7419 = vmatprep.mubr.f32.mxu0 %v10462_v17 }
 0x18c   : > { %7410 = vmatpush3.xpose.msra.mxu0 %v8849_v10  ;;  %7434 = vmatpush3.xpose.msra.mxu1 %v8824_v26  ;;  %v10465_v10 = vand.u32 4294901760, %v8941_v22 }
 0x18d   : > { %7411 = vmatprep.subr.mxu0 %v8875_v49  ;;  %7435 = vmatprep.subr.mxu1 %v8799_v30 }
 0x18e   : > { %7398 = vmatmul.mubr.f32.gmra.mxu1 %v8962_v14 }
 0x18f   : > { %7400 = vmatprep.mubr.f32.mxu1 %v8970_v15 }
 0x190   : > { %7412 = vmatpush3.xpose.msra.mxu0 %v8875_v49  ;;  %7436 = vmatpush3.xpose.msra.mxu1 %v8799_v30  ;;  %v10467_v49 = vld [vmem:[#allocation11_spill] sm:$0xff] }
 0x191   : > { %7413 = vmatprep.subr.mxu0 %v8901_v43  ;;  %7437 = vmatprep.subr.mxu1 %v8819_v62 }
 0x192   : > { %7401 = vmatmul.mubr.f32.gmra.mxu1 %v8985_v60 }
 0x193   : > { %7447 = vmatprep.mubr.f32.mxu1 %v10463_v61 }
 0x194   : > { %7414 = vmatpush3.xpose.msra.mxu0 %v8901_v43  ;;  %7438 = vmatpush3.xpose.msra.mxu1 %v8819_v62 }
 0x195   : > { %7415 = vmatprep.subr.mxu0 %v8924_v42  ;;  %7439 = vmatprep.subr.mxu1 %v8846_v34 }
 0x198   : > { %7416 = vmatpush3.xpose.msra.mxu0 %v8924_v42  ;;  %7440 = vmatpush3.xpose.msra.mxu1 %v8846_v34 }
 0x199   : > { %7417 = vmatprep.subr.mxu0 %v8950_v39  ;;  %7441 = vmatprep.subr.mxu1 %v8877_v2 }
 0x19c   : > { %7418 = vmatpush3.xpose.msra.mxu0 %v8950_v39  ;;  %7442 = vmatpush3.xpose.msra.mxu1 %v8877_v2 }
 0x19d   : > { %7443 = vmatprep.subr.mxu1 %v8898_v35  ;;  %7459 = vmatprep.subr.mxu0 %v8839_v5 }
 0x19f   : > { %7420 = vmatmul.mubr.f32.vlgmr.msra.gmra.mxu0 %v8935_v19 }
 0x1a0   : > { %7422 = vmatprep.mubr.f32.mxu0 %v8941_v22  ;;  %7444 = vmatpush3.xpose.msra.mxu1 %v8898_v35 }
 0x1a1   : > { %7460 = vmatpush3.xpose.msra.mxu0 %v8839_v5  ;;  %7445 = vmatprep.subr.mxu1 %v8926_v31  ;;  %v10464_v5 = vand.u32 4294901760, %v8935_v19 }
 0x1a2   : > { %7461 = vmatprep.subr.mxu0 %v8854_v33 }
 0x1a3   : > { %7423 = vmatmul.mubr.f32.gmra.mxu0 %v8960_v53 }
 0x1a4   : > { %7425 = vmatprep.mubr.f32.mxu0 %v8966_v20  ;;  %7446 = vmatpush3.xpose.msra.mxu1 %v8926_v31 }
 0x1a5   : > { %7462 = vmatpush3.xpose.msra.mxu0 %v8854_v33  ;;  %7487 = vmatprep.subr.mxu1 %v8809_v57  ;;  %v10466_v33 = vand.u32 4294901760, %v8960_v53 }
 0x1a6   : > { %7463 = vmatprep.subr.mxu0 %v8857_v12 }
 0x1a7   : > { %7426 = vmatmul.mubr.f32.gmra.mxu0 %v8983_v29  ;;  %7448 = vmatmul.mubr.f32.vlgmr.msra.gmra.mxu1 %v10464_v5 }
 0x1a8   : > { %7428 = vmatprep.mubr.f32.mxu0 %v8990_v9  ;;  %7450 = vmatprep.mubr.f32.mxu1 %v10465_v10 }
 0x1a9   : > { %7464 = vmatpush3.xpose.msra.mxu0 %v8857_v12  ;;  %7488 = vmatpush3.xpose.msra.mxu1 %v8809_v57 }
 0x1aa   : > { %7465 = vmatprep.subr.mxu0 %v8882_v52  ;;  %7489 = vmatprep.subr.mxu1 %v8824_v26 }
 0x1ab   : > { %7429 = vmatmul.mubr.f32.gmra.mxu0 %v9000_v8  ;;  %7451 = vmatmul.mubr.f32.gmra.mxu1 %v10466_v33 }
 0x1ac   : > { %7453 = vmatprep.mubr.f32.mxu1 %v2016_v40  ;;  %7475 = vmatprep.mubr.f32.mxu0 %v10467_v49 }
 0x1ad   : > { %7466 = vmatpush3.xpose.msra.mxu0 %v8882_v52  ;;  %7490 = vmatpush3.xpose.msra.mxu1 %v8824_v26 }
 0x1ae   : > { %7467 = vmatprep.subr.mxu0 %v8906_v44  ;;  %7491 = vmatprep.subr.mxu1 %v8799_v30 }
 0x1af   : > { %7454 = vmatmul.mubr.f32.gmra.mxu1 %v2026_v18 }
 0x1b0   : > { %7456 = vmatprep.mubr.f32.mxu1 %v2036_v24 }
 0x1b1   : > { %7468 = vmatpush3.xpose.msra.mxu0 %v8906_v44  ;;  %7492 = vmatpush3.xpose.msra.mxu1 %v8799_v30 }
 0x1b2   : > { %7469 = vmatprep.subr.mxu0 %v8931_v59  ;;  %7493 = vmatprep.subr.mxu1 %v8819_v62 }
 0x1b3   : > { %7457 = vmatmul.mubr.f32.gmra.mxu1 %v2046_v11 }
 0x1b4   : > { %7503 = vmatprep.mubr.f32.mxu1 %v10467_v49 }
 0x1b5   : > { %7470 = vmatpush3.xpose.msra.mxu0 %v8931_v59  ;;  %7494 = vmatpush3.xpose.msra.mxu1 %v8819_v62 }
 0x1b6   : > { %7471 = vmatprep.subr.mxu0 %v8955_v7  ;;  %7495 = vmatprep.subr.mxu1 %v8846_v34 }
 0x1b9   : > { %7472 = vmatpush3.xpose.msra.mxu0 %v8955_v7  ;;  %7496 = vmatpush3.xpose.msra.mxu1 %v8846_v34 }
 0x1ba   : > { %7473 = vmatprep.subr.mxu0 %v8976_v23  ;;  %7497 = vmatprep.subr.mxu1 %v8877_v2 }
 0x1bd   : > { %7474 = vmatpush3.xpose.msra.mxu0 %v8976_v23  ;;  %7498 = vmatpush3.xpose.msra.mxu1 %v8877_v2 }
 0x1be   : > { %7499 = vmatprep.subr.mxu1 %v8898_v35 }
 0x1c0   : > { %7476 = vmatmul.mubr.f32.vlgmr.msra.gmra.mxu0 %v8911_v38 }
 0x1c1   : > { %7478 = vmatprep.mubr.f32.mxu0 %v8916_v28  ;;  %7500 = vmatpush3.xpose.msra.mxu1 %v8898_v35 }
 0x1c2   : > { %7501 = vmatprep.subr.mxu1 %v8926_v31 }
 0x1c4   : > { %7479 = vmatmul.mubr.f32.gmra.mxu0 %v8937_v16 }
 0x1c5   : > { %7481 = vmatprep.mubr.f32.mxu0 %v8945_v37  ;;  %7502 = vmatpush3.xpose.msra.mxu1 %v8926_v31 }
 0x1c8   : > { %7482 = vmatmul.mubr.f32.gmra.mxu0 %v8962_v14  ;;  %7504 = vmatmul.mubr.f32.vlgmr.msra.gmra.mxu1 %v8911_v38 }
 0x1c9   : > { %7484 = vmatprep.mubr.f32.mxu0 %v8970_v15  ;;  %7506 = vmatprep.mubr.f32.mxu1 %v8916_v28 }
 0x1cc   : > { %7485 = vmatmul.mubr.f32.gmra.mxu0 %v8985_v60  ;;  %7507 = vmatmul.mubr.f32.gmra.mxu1 %v8937_v16 }
 0x1cd   : > { %7509 = vmatprep.mubr.f32.mxu1 %v8945_v37 }
 0x1d0   : > { %7510 = vmatmul.mubr.f32.gmra.mxu1 %v8962_v14 }
 0x1d1   : > { %7512 = vmatprep.mubr.f32.mxu1 %v8970_v15 }
 0x1d4   : > { %7513 = vmatmul.mubr.f32.gmra.mxu1 %v8985_v60 }
 0x23e   : > { %v7365_v30 = vpop.f32.mrf.mxu0 }
 0x240   : > { %v1980_v57 = vpop.f32.mrf.mxu0 }
 0x242   : > { %v7368_v62 = vpop.f32.mrf.mxu0 }
 0x244   : > { %v2000_v34 = vpop.f32.mrf.mxu0 }
 0x246   : > { %v7393_v26 = vpop.f32.mrf.mxu1  ;;  %v7371_v2 = vpop.f32.mrf.mxu0 }
 0x247   : > { %v2168_v9 = vadd.f32 %v7393_v26, %v7365_v30 }
 0x248   : > { %v2161_v12 = vpop.f32.mrf.mxu1  ;;  %v2020_v35 = vpop.f32.mrf.mxu0 }
 0x249   : > { %v2162_v40 = vadd.f32 %v2161_v12, %v1980_v57 }
 0x24a   : > { %v7396_v52 = vpop.f32.mrf.mxu1  ;;  %v7374_v44 = vpop.f32.mrf.mxu0 }
 0x24b   : > { %v2180_v21 = vadd.f32 %v7396_v52, %v7368_v62 }
 0x24c   : > { %v2173_v43 = vpop.f32.mrf.mxu1  ;;  %v2040_v28 = vpop.f32.mrf.mxu0 }
 0x24d   : > { %v2174_v25 = vadd.f32 %v2173_v43, %v2000_v34 }
 0x24e   : > { %v7399_v38 = vpop.f32.mrf.mxu1 }
 0x24f   : > { %v2192_v4 = vadd.f32 %v7399_v38, %v7371_v2 }
 0x250   : > { %v2185_v8 = vpop.f32.mrf.mxu1 }
 0x251   : > { %v2186_v27 = vadd.f32 %v2185_v8, %v2020_v35 }
 0x252   : > { %v7402_v31 = vpop.f32.mrf.mxu1 }
 0x254   : > { %v2197_v19 = vpop.f32.mrf.mxu1 }
 0x25f   : > { %v7421_v42 = vpop.f32.mrf.mxu0 }
 0x260   : > { %v2299_v24 = vadd.f32 %v7421_v42, %v2168_v9 }
 0x261   : > { %v2291_v59 = vpop.f32.mrf.mxu0 }
 0x262   : > { %v2292_v36 = vadd.f32 %v2291_v59, %v2162_v40  ;;  %v2204_v59 = vadd.f32 %v7402_v31, %v7374_v44 }
 0x263   : > { %v7424_v16 = vpop.f32.mrf.mxu0 }
 0x264   : > { %v2313_v63 = vadd.f32 %v7424_v16, %v2180_v21 }
 0x265   : > { %v2305_v37 = vpop.f32.mrf.mxu0 }
 0x266   : > { %v2306_v5 = vadd.f32 %v2305_v37, %v2174_v25  ;;  %v2198_v37 = vadd.f32 %v2197_v19, %v2040_v28 }
 0x267   : > { %v7449_v22 = vpop.f32.mrf.mxu1  ;;  %v7427_v7 = vpop.f32.mrf.mxu0 }
 0x268   : > { %v2430_v47 = vadd.f32 %v7449_v22, %v2299_v24  ;;  %v2327_v30 = vadd.f32 %v7427_v7, %v2192_v4 }
 0x269   : > { %v2421_v39 = vpop.f32.mrf.mxu1  ;;  %v2319_v14 = vpop.f32.mrf.mxu0 }
 0x26a   : > { %v2422_v32 = vadd.f32 %v2421_v39, %v2292_v36  ;;  %v2320_v34 = vadd.f32 %v2319_v14, %v2186_v27 }
 0x26b   : > { %v7452_v53 = vpop.f32.mrf.mxu1  ;;  %v7430_v58 = vpop.f32.mrf.mxu0 }
 0x26c   : > { %v2446_v10 = vadd.f32 %v7452_v53, %v2313_v63  ;;  %v2341_v53 = vadd.f32 %v7430_v58, %v2204_v59 }
 0x26d   : > { %v2437_v20 = vpop.f32.mrf.mxu1  ;;  %v2333_v18 = vpop.f32.mrf.mxu0 }
 0x26e   : > { %v2438_v62 = vadd.f32 %v2437_v20, %v2306_v5  ;;  %v2334_v40 = vadd.f32 %v2333_v18, %v2198_v37 }
 0x26f   : > { %v7455_v15 = vpop.f32.mrf.mxu1 }
 0x270   : > { %v2462_v43 = vadd.f32 %v7455_v15, %v2327_v30 }
 0x271   : > { %v2453_v23 = vpop.f32.mrf.mxu1 }
 0x273   : > { %v7458_v60 = vpop.f32.mrf.mxu1 }
 0x274   : > { %v2478_v44 = vadd.f32 %v7458_v60, %v2341_v53 }
 0x275   : > { %v2469_v3 = vpop.f32.mrf.mxu1 }
 0x276   : > { %v2470_v28 = vadd.f32 %v2469_v3, %v2334_v40 }
 0x280   : > { %v7477_v29 = vpop.f32.mrf.mxu0 }
 0x281   : > { %v2579_v33 = vadd.f32 %v7477_v29, %v2430_v47  ;;  %v2454_v29 = vadd.f32 %v2453_v23, %v2320_v34 }
 0x282   : > { %v2572_v1 = vpop.f32.mrf.mxu0 }
 0x283   : > { %v2573_v49 = vadd.f32 %v2572_v1, %v2422_v32 }
 0x284   : > { %v7480_v45 = vpop.f32.mrf.mxu0 }
 0x285   : > { %v2591_v12 = vadd.f32 %v7480_v45, %v2446_v10 }
 0x286   : > { %v2584_v11 = vpop.f32.mrf.mxu0 }
 0x287   : > { %v2585_v22 = vadd.f32 %v2584_v11, %v2438_v62 }
 0x288   : > { %v7483_v17 = vpop.f32.mrf.mxu0  ;;  %v7505_v61 = vpop.f32.mrf.mxu1 }
 0x289   : > { %v2700_v52 = vadd.f32 %v7505_v61, %v2579_v33  ;;  %v2603_v35 = vadd.f32 %v7483_v17, %v2462_v43 }
 0x28a   : > { %v2596_v57 = vpop.f32.mrf.mxu0  ;;  %v2693_v26 = vpop.f32.mrf.mxu1 }
 0x28b   : > { %v2694_v42 = vadd.f32 %v2693_v26, %v2573_v49  ;;  %v2740_v7 = vmul.f32 0.35355338, %v2700_v52  ;;  %v2597_v31 = vadd.f32 %v2596_v57, %v2454_v29 }
 0x28c   : > { %v7508_v16 = vpop.f32.mrf.mxu1  ;;  %v7486_v38 = vpop.f32.mrf.mxu0 }
 0x28d   : > { %v2739_v2 = vmul.f32 0.35355338, %v2694_v42  ;;  %v2712_v39 = vadd.f32 %v7508_v16, %v2591_v12  ;;  %v2615_v58 = vadd.f32 %v7486_v38, %v2478_v44  ;;  %v2751_v24 = vsel %vm2747_vm3, %v2740_v7, -inf }
 0x28e   : > { %v2705_v8 = vpop.f32.mrf.mxu1  ;;  %v2608_v14 = vpop.f32.mrf.mxu0 }
 0x28f   : > { %v2742_v1 = vmul.f32 0.35355338, %v2712_v39  ;;  %v2706_v20 = vadd.f32 %v2705_v8, %v2585_v22  ;;  %v2748_v9 = vsel %vm2747_vm3, %v2739_v2, -inf  ;;  %v2609_v36 = vadd.f32 %v2608_v14, %v2470_v28 }
 0x290   : > { %v7511_v27 = vpop.f32.mrf.mxu1  ;;  %2749 = vmax.xlane.f32.xlu0 %v2748_v9 }
 0x291   : > { %v2741_v15 = vmul.f32 0.35355338, %v2706_v20  ;;  %v2724_v45 = vadd.f32 %v7511_v27, %v2603_v35  ;;  %v2757_v21 = vsel %vm2747_vm3, %v2742_v1, -inf }
 0x292   : > { %v2717_v19 = vpop.f32.mrf.mxu1  ;;  %2758 = vmax.xlane.f32.xlu1 %v2757_v21 }
 0x293   : > { %v2718_v23 = vadd.f32 %v2717_v19, %v2597_v31  ;;  %v2744_v18 = vmul.f32 0.35355338, %v2724_v45  ;;  %v2754_v63 = vsel %vm2747_vm3, %v2741_v15, -inf }
 0x294   : > { %v7514_v11 = vpop.f32.mrf.mxu1  ;;  %2752 = vmax.xlane.f32.xlu0 %v2751_v24 }
 0x295   : > { %v2743_v60 = vmul.f32 0.35355338, %v2718_v23  ;;  %v2736_v25 = vadd.f32 %v7514_v11, %v2615_v58  ;;  %v2763_v61 = vsel %vm2747_vm3, %v2744_v18, -inf }
 0x296   : > { %v2729_v47 = vpop.f32.mrf.mxu1  ;;  %2755 = vmax.xlane.f32.xlu1 %v2754_v63 }
 0x297   : > { %v2730_v32 = vadd.f32 %v2729_v47, %v2609_v36  ;;  %v2760_v4 = vsel %vm2747_vm3, %v2743_v60, -inf  ;;  %v2746_v3 = vmul.f32 0.35355338, %v2736_v25 }
 0x298   : > { %2761 = vmax.xlane.f32.xlu0 %v2760_v4 }
 0x299   : > { %v2745_v17 = vmul.f32 0.35355338, %v2730_v32  ;;  %v2769_v10 = vsel %vm2747_vm3, %v2746_v3, -inf }
 0x29a   : > { %2764 = vmax.xlane.f32.xlu1 %v2763_v61 }
 0x29b   : > { %v2766_v5 = vsel %vm2747_vm3, %v2745_v17, -inf }
 0x29c   : > { %2767 = vmax.xlane.f32.xlu0 %v2766_v5 }
 0x29e   : > { %2770 = vmax.xlane.f32.xlu1 %v2769_v10 }
 0x2af   : > { %2848 = vrot.lane.b32.xlu1 %v8805_v54, %s8327_s18 }
 0x2b2   : > { %2850 = vrot.lane.b32.xlu0 %v8793_v48, %s8327_s18 }
 0x2b3   : > { %2846 = vrot.lane.b32.xlu1 %v8783_v51, %s8327_s18 }
 0x2b6   : > { %2842 = vrot.lane.b32.xlu0 %v8791_v6, %s8327_s18 }
 0x2b7   : > { %2844 = vrot.lane.b32.xlu1 %v8787_v41, %s8327_s18 }
 0x2bb   : > { %2840 = vrot.lane.b32.xlu1 %v8829_v0, %s8327_s18 }
 0x319   : > { %v2750_v33 = vpop.xlane.xlu0 %2749 }
 0x31a   : > { %v2772_v49 = vsub.f32 %v2739_v2, %v2750_v33 }
 0x31b   : > { %v2759_v30 = vpop.xlane.xlu1 %2758 }
 0x31c   : > { %v2780_v57 = vmul.f32 1.442695, %v2772_v49  ;;  %v2775_v26 = vsub.f32 %v2742_v1, %v2759_v30 }
 0x31d   : > { %v2753_v62 = vpop.xlane.xlu0 %2752 }
 0x31e   : > { %8191 = vpow2.f32 %v2780_v57  ;;  %v2773_v12 = vsub.f32 %v2740_v7, %v2753_v62  ;;  %v2786_v52 = vmul.f32 1.442695, %v2775_v26 }
 0x31f   : > { %v2756_v42 = vpop.xlane.xlu1 %2755 }
 0x320   : > { %v2782_v59 = vmul.f32 1.442695, %v2773_v12  ;;  %v2774_v34 = vsub.f32 %v2741_v15, %v2756_v42 }
 0x321   : > { %v2762_v43 = vpop.xlane.xlu0 %2761 }
 0x322   : > { %8193 = vpow2.f32 %v2782_v59  ;;  %v2784_v16 = vmul.f32 1.442695, %v2774_v34  ;;  %v2776_v22 = vsub.f32 %v2743_v60, %v2762_v43 }
 0x323   : > { %8195 = vpow2.f32 %v2786_v52  ;;  %v2765_v38 = vpop.xlane.xlu1 %2764 }
 0x324   : > { %8197 = vpow2.f32 %v2784_v16  ;;  %v2788_v39 = vmul.f32 1.442695, %v2776_v22  ;;  %v2777_v37 = vsub.f32 %v2744_v18, %v2765_v38 }
 0x325   : > { %v2768_v2 = vpop.xlane.xlu0 %2767 }
 0x326   : > { %8199 = vpow2.f32 %v2788_v39  ;;  %v2790_v53 = vmul.f32 1.442695, %v2777_v37  ;;  %v2778_v29 = vsub.f32 %v2745_v17, %v2768_v2 }
 0x327   : > { %v2771_v35 = vpop.xlane.xlu1 %2770 }
 0x328   : > { %8201 = vpow2.f32 %v2790_v53  ;;  %v2792_v8 = vmul.f32 1.442695, %v2778_v29  ;;  %v2779_v7 = vsub.f32 %v2746_v3, %v2771_v35 }
 0x329   : > { %v2851_v1 = vpop.permute.xlu0 %2850 }
 0x32a   : > { %8203 = vpow2.f32 %v2792_v8  ;;  %v2794_v20 = vmul.f32 1.442695, %v2779_v7  ;;  %v9151_v9 = vand.u32 4294901760, %v2851_v1 }
 0x32b   : > { %v9153_v40 = vpop.eup %8191  ;;  %v2849_v44 = vpop.permute.xlu1 %2848 }
 0x32c   : > { %8205 = vpow2.f32 %v2794_v20  ;;  %v9156_v27 = vsub.f32 %v2851_v1, %v9151_v9  ;;  %v9158_v31 = vand.u32 4294901760, %v2849_v44  ;;  %7515 = vmatprep.subr.mxu0 %v9151_v9  ;;  %v2796_v14 = vsel %vm2747_vm3, %v9153_v40, 0.0  ;;  %v10468_v1 = vld [vmem:[#allocation9_spill] sm:$0xff]  ;;  %v10469_v20 = vld [vmem:[#allocation15_spill] sm:$0xff] }
 0x32d   : > { %2797 = vadd.xlane.f32.xlu0 %v2796_v14  ;;  %7516 = vmatpush3.msra.mxu0 %v9151_v9  ;;  %v2843_v15 = vpop.permute.xlu0 %2842  ;;  %v10471_v14 = vld [vmem:[#allocation18_spill] sm:$0xff] }
 0x32e   : > { %v9165_v45 = vsub.f32 %v2849_v44, %v9158_v31  ;;  %v9167_v21 = vand.u32 4294901760, %v2843_v15  ;;  %7517 = vmatprep.subr.mxu0 %v9158_v31  ;;  %v9171_v28 = vand.u32 4294901760, %v9156_v27  ;;  %v10470_v44 = vld [vmem:[#allocation4_spill] sm:$0xff] }
 0x32f   : > { %v9173_v19 = vpop.eup %8193  ;;  %v2847_v58 = vpop.permute.xlu1 %2846  ;;  %7518 = vmatpush3.msra.mxu0 %v9158_v31 }
 0x330   : > { %v9176_v23 = vpop.eup %8195  ;;  %v9178_v24 = vand.u32 4294901760, %v2847_v58  ;;  %v2799_v36 = vsel %vm2747_vm3, %v9173_v19, 0.0  ;;  %v3057_v11 = vsub.f32 %v9156_v27, %v9171_v28  ;;  %v9187_v60 = vand.u32 4294901760, %v9165_v45 }
 0x331   : > { %v9184_v18 = vpop.eup %8197  ;;  %2800 = vadd.xlane.f32.xlu1 %v2799_v36  ;;  %v9190_v25 = vsub.f32 %v2843_v15, %v9167_v21  ;;  %v2805_v5 = vsel %vm2747_vm3, %v9176_v23, 0.0  ;;  %v10472_v15 = vld [vmem:[#allocation6_spill] sm:$0xff] }
 0x332   : > { %v9193_v63 = vsub.f32 %v2847_v58, %v9178_v24  ;;  %7519 = vmatprep.subr.mxu0 %v9178_v24  ;;  %v2802_v47 = vsel %vm2747_vm3, %v9184_v18, 0.0  ;;  %v3058_v32 = vand.u32 4294901760, %v3057_v11  ;;  %v3064_v17 = vsub.f32 %v9165_v45, %v9187_v60 }
 0x333   : > { %v9198_v4 = vpop.eup %8199  ;;  %v2845_v3 = vpop.permute.xlu1 %2844  ;;  %2803 = vadd.xlane.f32.xlu0 %v2802_v47  ;;  %7520 = vmatpush3.msra.mxu0 %v9178_v24  ;;  %v9221_v62 = vand.u32 4294901760, %v9190_v25 }
 0x334   : > { %v9203_v61 = vand.u32 4294901760, %v2845_v3  ;;  %7543 = vmatprep.subr.mxu1 %v3058_v32  ;;  %v9208_v10 = vand.u32 4294901760, %v9193_v63  ;;  %v3065_v49 = vand.u32 4294901760, %v3064_v17  ;;  %v2808_v57 = vsel %vm2747_vm3, %v9198_v4, 0.0 }
 0x335   : > { %v9210_v33 = vpop.eup %8201  ;;  %2806 = vadd.xlane.f32.xlu1 %v2805_v5  ;;  %7544 = vmatpush3.msra.mxu1 %v3058_v32  ;;  %v3085_v37 = vsub.f32 %v9190_v25, %v9221_v62 }
 0x336   : > { %v9213_v30 = vsub.f32 %v2845_v3, %v9203_v61  ;;  %7521 = vmatprep.subr.mxu0 %v9203_v61  ;;  %v3071_v26 = vsub.f32 %v9193_v63, %v9208_v10  ;;  %7545 = vmatprep.subr.mxu1 %v3065_v49  ;;  %v2811_v59 = vsel %vm2747_vm3, %v9210_v33, 0.0 }
 0x337   : > { %v9223_v12 = vpop.eup %8203  ;;  %v2841_v52 = vpop.permute.xlu1 %2840  ;;  %2809 = vadd.xlane.f32.xlu0 %v2808_v57  ;;  %7522 = vmatpush3.msra.mxu0 %v9203_v61  ;;  %v3086_v35 = vand.u32 4294901760, %v3085_v37 }
 0x338   : > { %v9225_v42 = vand.u32 4294901760, %v2841_v52  ;;  %7546 = vmatpush3.msra.mxu1 %v3065_v49  ;;  %v3072_v34 = vand.u32 4294901760, %v3071_v26  ;;  %v9231_v43 = vand.u32 4294901760, %v9213_v30  ;;  %7523 = vmatprep.subr.mxu0 %v9167_v21  ;;  %v2814_v38 = vsel %vm2747_vm3, %v9223_v12, 0.0 }
 0x339   : > { %v9233_v16 = vpop.eup %8205  ;;  %2812 = vadd.xlane.f32.xlu1 %v2811_v59  ;;  %7524 = vmatpush3.msra.mxu0 %v9167_v21 }
 0x33a   : > { %v9237_v22 = vsub.f32 %v2841_v52, %v9225_v42  ;;  %7547 = vmatprep.subr.mxu1 %v3072_v34  ;;  %v3078_v39 = vsub.f32 %v9213_v30, %v9231_v43  ;;  %7525 = vmatprep.subr.mxu0 %v9225_v42  ;;  %v2817_v2 = vsel %vm2747_vm3, %v9233_v16, 0.0 }
 0x33b   : > { %2815 = vadd.xlane.f32.xlu0 %v2814_v38  ;;  %7526 = vmatpush3.msra.mxu0 %v9225_v42 }
 0x33c   : > { %7548 = vmatpush3.msra.mxu1 %v3072_v34  ;;  %v3079_v53 = vand.u32 4294901760, %v3078_v39  ;;  %v9251_v29 = vand.u32 4294901760, %v9237_v22 }
 0x33d   : > { %2818 = vadd.xlane.f32.xlu1 %v2817_v2 }
 0x33e   : > { %7549 = vmatprep.subr.mxu1 %v3079_v53  ;;  %v3092_v8 = vsub.f32 %v9237_v22, %v9251_v29 }
 0x33f   : > { %7550 = vmatpush3.msra.mxu1 %v3079_v53 }
 0x340   : > { %7551 = vmatprep.subr.mxu1 %v3086_v35  ;;  %v3093_v7 = vand.u32 4294901760, %v3092_v8 }
 0x341   : > { %7552 = vmatpush3.msra.mxu1 %v3086_v35 }
 0x342   : > { %7553 = vmatprep.subr.mxu1 %v3093_v7 }
 0x343   : > { %7554 = vmatpush3.msra.mxu1 %v3093_v7 }
 0x34e   : > { %2836 = vrot.lane.b32.xlu1 %v8886_v13, %s8327_s18 }
 0x351   : > { %2838 = vrot.lane.b32.xlu0 %v8844_v50, %s8327_s18  ;;  %s6621_s18 = sshll.u32 (%p8423_p7), %s8309_s22, 5 }
 0x352   : > { %3750 = vrot.lane.b32.xlu1 %v8805_v54, %s8328_s11 }
 0x355   : > { %3752 = vrot.lane.b32.xlu0 %v8793_v48, %s8328_s11 }
 0x356   : > { %3746 = vrot.lane.b32.xlu1 %v8787_v41, %s8328_s11 }
 0x359   : > { %3748 = vrot.lane.b32.xlu0 %v8783_v51, %s8328_s11 }
 0x35a   : > { %3742 = vrot.lane.b32.xlu1 %v8829_v0, %s8328_s11 }
 0x35d   : > { %3744 = vrot.lane.b32.xlu0 %v8791_v6, %s8328_s11 }
 0x35e   : > { %3738 = vrot.lane.b32.xlu1 %v8886_v13, %s8328_s11 }
 0x361   : > { %3740 = vrot.lane.b32.xlu0 %v8844_v50, %s8328_s11 }
 0x362   : > { %3724 = vrot.lane.b32.xlu1 %v10453_v55, %s8328_s11 }
 0x365   : > { %3722 = vrot.lane.b32.xlu0 %v10468_v1, %s8328_s11 }
 0x366   : > { %3728 = vrot.lane.b32.xlu1 %v10457_v56, %s8328_s11 }
 0x369   : > { %3726 = vrot.lane.b32.xlu0 %v8869_v46, %s8328_s11 }
 0x36a   : > { %3732 = vrot.lane.b32.xlu1 %v10469_v20, %s8328_s11 }
 0x36d   : > { %3730 = vrot.lane.b32.xlu0 %v10470_v44, %s8328_s11 }
 0x36e   : > { %3736 = vrot.lane.b32.xlu1 %v10471_v14, %s8328_s11 }
 0x371   : > { %3734 = vrot.lane.b32.xlu0 %v10472_v15, %s8328_s11  ;;  %s6457_s11 = sadd.s32 (%p8423_p7), %s8301_s20, %s6626_s29 }
 0x372   : > { %s6459_s7 = sadd.s32 (%p8423_p7), %s6621_s18, %s6457_s11 }
 0x3b6   : > { %v2798_v58 = vpop.xlane.xlu0 %2797 }
 0x3b7   : > { %8207 = vrcp.f32 %v2798_v58 }
 0x3ba   : > { %v2801_v36 = vpop.xlane.xlu1 %2800 }
 0x3bb   : > { %8209 = vrcp.f32 %v2801_v36 }
 0x3bc   : > { %v2804_v11 = vpop.xlane.xlu0 %2803 }
 0x3bd   : > { %8211 = vrcp.f32 %v2804_v11 }
 0x3be   : > { %v2807_v55 = vpop.xlane.xlu1 %2806 }
 0x3bf   : > { %8213 = vrcp.f32 %v2807_v55 }
 0x3c0   : > { %v2810_v47 = vpop.xlane.xlu0 %2809 }
 0x3c1   : > { %8215 = vrcp.f32 %v2810_v47 }
 0x3c2   : > { %v2813_v56 = vpop.xlane.xlu1 %2812 }
 0x3c3   : > { %8217 = vrcp.f32 %v2813_v56 }
 0x3c4   : > { %v8208_v32 = vpop.eup %8207  ;;  %v2816_v46 = vpop.xlane.xlu0 %2815 }
 0x3c5   : > { %v2828_v3 = vmul.f32 %v8208_v32, %v9153_v40  ;;  %8219 = vrcp.f32 %v2816_v46 }
 0x3c6   : > { %v2819_v17 = vpop.xlane.xlu1 %2818 }
 0x3c7   : > { %v2861_v5 = vsel %vm2747_vm3, %v2828_v3, 0  ;;  %8221 = vrcp.f32 %v2819_v17 }
 0x3c8   : > { %v8210_v49 = vpop.eup %8209  ;;  %v2839_v57 = vpop.permute.xlu0 %2838  ;;  %v9277_v26 = vand.u32 4294901760, %v2861_v5 }
 0x3c9   : > { %v2829_v52 = vmul.f32 %v8210_v49, %v9173_v19  ;;  %v9280_v59 = vand.u32 4294901760, %v2839_v57 }
 0x3ca   : > { %v8212_v34 = vpop.eup %8211  ;;  %v2837_v38 = vpop.permute.xlu1 %2836  ;;  %7559 = vmatprep.mubr.f32.mxu1 %v9277_v26  ;;  %v9284_v39 = vsub.f32 %v2861_v5, %v9277_v26 }
 0x3cb   : > { %v2864_v40 = vsel %vm2747_vm3, %v2829_v52, 0  ;;  %v9288_v37 = vsub.f32 %v2839_v57, %v9280_v59  ;;  %v9290_v2 = vand.u32 4294901760, %v2837_v38  ;;  %7527 = vmatprep.subr.mxu0 %v9280_v59  ;;  %v2830_v19 = vmul.f32 %v8212_v34, %v9184_v18 }
 0x3cc   : > { %v8214_v53 = vpop.eup %8213  ;;  %v9294_v35 = vand.u32 4294901760, %v2864_v40  ;;  %7528 = vmatpush3.msra.mxu0 %v9280_v59  ;;  %v2959_v8 = vand.u32 4294901760, %v9284_v39 }
 0x3cd   : > { %v9299_v7 = vsub.f32 %v2837_v38, %v9290_v2  ;;  %7529 = vmatprep.subr.mxu0 %v9290_v2  ;;  %v9303_v1 = vand.u32 4294901760, %v9288_v37  ;;  %v2867_v20 = vsel %vm2747_vm3, %v2830_v19, 0  ;;  %v2831_v36 = vmul.f32 %v8214_v53, %v9176_v23 }
 0x3ce   : > { %7530 = vmatpush3.msra.mxu0 %v9290_v2  ;;  %v2960_v18 = vsub.f32 %v9284_v39, %v2959_v8  ;;  %v9311_v44 = vsub.f32 %v2864_v40, %v9294_v35  ;;  %v9313_v14 = vand.u32 4294901760, %v2867_v20  ;;  %v8216_v47 = vpop.eup %8215 }
 0x3cf   : > { %7571 = vmatprep.subr.mxu0 %v9156_v27  ;;  %v3099_v15 = vsub.f32 %v9288_v37, %v9303_v1  ;;  %v9319_v58 = vand.u32 4294901760, %v9299_v7  ;;  %v2870_v5 = vsel %vm2747_vm3, %v2831_v36, 0  ;;  %v2832_v38 = vmul.f32 %v8216_v47, %v9198_v4 }
 0x3d0   : > { %v2961_v11 = vand.u32 4294901760, %v2960_v18  ;;  %v2969_v55 = vand.u32 4294901760, %v9311_v44  ;;  %v9326_v46 = vsub.f32 %v2867_v20, %v9313_v14  ;;  %v8218_v3 = vpop.eup %8217  ;;  %v9333_v52 = vand.u32 4294901760, %v2870_v5 }
 0x3d1   : > { %v3100_v56 = vand.u32 4294901760, %v3099_v15  ;;  %v3106_v32 = vsub.f32 %v9299_v7, %v9319_v58  ;;  %v2833_v53 = vmul.f32 %v8218_v3, %v9210_v33  ;;  %v2873_v20 = vsel %vm2747_vm3, %v2832_v38, 0 }
 0x3d2   : > { %7531 = vmatprep.mubr.f32.mxu0 %v2961_v11  ;;  %v2970_v17 = vsub.f32 %v9311_v44, %v2969_v55  ;;  %v8220_v23 = vpop.eup %8219  ;;  %v2979_v57 = vand.u32 4294901760, %v9326_v46  ;;  %v9340_v19 = vsub.f32 %v2870_v5, %v9333_v52  ;;  %v9348_v11 = vand.u32 4294901760, %v2873_v20 }
 0x3d3   : > { %7555 = vmatprep.subr.mxu1 %v3100_v56  ;;  %v3107_v49 = vand.u32 4294901760, %v3106_v32  ;;  %v2834_v18 = vmul.f32 %v8220_v23, %v9223_v12  ;;  %v2876_v33 = vsel %vm2747_vm3, %v2833_v53, 0 }
 0x3d4   : > { %7556 = vmatpush3.msra.mxu1 %v3100_v56  ;;  %v2971_v34 = vand.u32 4294901760, %v2970_v17  ;;  %v2980_v40 = vsub.f32 %v9326_v46, %v2979_v57  ;;  %v8222_v15 = vpop.eup %8221  ;;  %v2989_v36 = vand.u32 4294901760, %v9340_v19  ;;  %v9359_v12 = vsub.f32 %v2873_v20, %v9348_v11 }
 0x3d5   : > { %7557 = vmatprep.subr.mxu1 %v3107_v49  ;;  %v2879_v47 = vsel %vm2747_vm3, %v2834_v18, 0  ;;  %v9361_v56 = vand.u32 4294901760, %v2876_v33  ;;  %v2835_v3 = vmul.f32 %v8222_v15, %v9233_v16 }
 0x3d6   : > { %7532 = vmatmul.mubr.f32.vlgmr.msra.gmra.mxu0 %v2971_v34  ;;  %7558 = vmatpush3.msra.mxu1 %v3107_v49  ;;  %v2981_v4 = vand.u32 4294901760, %v2980_v40  ;;  %v9365_v32 = vand.u32 4294901760, %v2879_v47  ;;  %v2999_v5 = vand.u32 4294901760, %v9359_v12 }
 0x3d7   : > { %7572 = vmatpush3.msra.mxu0 %v9156_v27  ;;  %7560 = vmatmul.mubr.f32.vlgmr.msra.gmra.mxu1 %v9294_v35  ;;  %v2990_v27 = vsub.f32 %v9340_v19, %v2989_v36  ;;  %v9372_v23 = vsub.f32 %v2876_v33, %v9361_v56  ;;  %v2882_v49 = vsel %vm2747_vm3, %v2835_v3, 0 }
 0x3d8   : > { %7573 = vmatprep.subr.mxu0 %v9165_v45  ;;  %7599 = vmatprep.subr.mxu1 %v9151_v9  ;;  %v3000_v16 = vsub.f32 %v9359_v12, %v2999_v5  ;;  %v9385_v38 = vand.u32 4294901760, %v2882_v49 }
 0x3d9   : > { %7534 = vmatprep.mubr.f32.mxu0 %v2981_v4  ;;  %7562 = vmatprep.mubr.f32.mxu1 %v9313_v14  ;;  %v2991_v17 = vand.u32 4294901760, %v2990_v27  ;;  %v3009_v34 = vand.u32 4294901760, %v9372_v23 }
 0x3da   : > { %7574 = vmatpush3.msra.mxu0 %v9165_v45  ;;  %7600 = vmatpush3.msra.mxu1 %v9151_v9  ;;  %v9377_v45 = vsub.f32 %v2879_v47, %v9365_v32  ;;  %v3001_v40 = vand.u32 4294901760, %v3000_v16  ;;  %v9396_v20 = vsub.f32 %v2882_v49, %v9385_v38  ;;  %v3753_v47 = vpop.permute.xlu0 %3752 }
 0x3db   : > { %7575 = vmatprep.subr.mxu0 %v9193_v63  ;;  %7601 = vmatprep.subr.mxu1 %v9158_v31  ;;  %v3010_v53 = vsub.f32 %v9372_v23, %v3009_v34 }
 0x3dc   : > { %7576 = vmatpush3.msra.mxu0 %v9193_v63  ;;  %7602 = vmatpush3.msra.mxu1 %v9158_v31  ;;  %v3019_v63 = vand.u32 4294901760, %v9377_v45 }
 0x3dd   : > { %7535 = vmatmul.mubr.f32.gmra.mxu0 %v2991_v17  ;;  %7563 = vmatmul.mubr.f32.gmra.mxu1 %v9333_v52  ;;  %v3011_v15 = vand.u32 4294901760, %v3010_v53 }
 0x3de   : > { %7577 = vmatprep.subr.mxu0 %v9213_v30  ;;  %7603 = vmatprep.subr.mxu1 %v9178_v24  ;;  %v3020_v18 = vsub.f32 %v9377_v45, %v3019_v63 }
 0x3df   : > { %7565 = vmatprep.mubr.f32.mxu1 %v9348_v11  ;;  %7578 = vmatpush3.msra.mxu0 %v9213_v30  ;;  %v3029_v30 = vand.u32 4294901760, %v9396_v20 }
 0x3e0   : > { %7604 = vmatpush3.msra.mxu1 %v9178_v24  ;;  %7579 = vmatprep.subr.mxu0 %v9190_v25  ;;  %v3021_v4 = vand.u32 4294901760, %v3020_v18 }
 0x3e1   : > { %7537 = vmatprep.mubr.f32.mxu0 %v3001_v40  ;;  %7605 = vmatprep.subr.mxu1 %v9203_v61  ;;  %v3030_v33 = vsub.f32 %v9396_v20, %v3029_v30 }
 0x3e2   : > { %7580 = vmatpush3.msra.mxu0 %v9190_v25  ;;  %7606 = vmatpush3.msra.mxu1 %v9203_v61  ;;  %v3749_v25 = vpop.permute.xlu0 %3748 }
 0x3e3   : > { %7538 = vmatmul.mubr.f32.gmra.mxu0 %v3011_v15  ;;  %7566 = vmatmul.mubr.f32.gmra.mxu1 %v9361_v56  ;;  %v3031_v27 = vand.u32 4294901760, %v3030_v33 }
 0x3e4   : > { %7581 = vmatprep.subr.mxu0 %v9237_v22  ;;  %7607 = vmatprep.subr.mxu1 %v9167_v21 }
 0x3e5   : > { %7540 = vmatprep.mubr.f32.mxu0 %v3021_v4  ;;  %7568 = vmatprep.mubr.f32.mxu1 %v9365_v32 }
 0x3e6   : > { %7582 = vmatpush3.msra.mxu0 %v9237_v22  ;;  %7608 = vmatpush3.msra.mxu1 %v9167_v21  ;;  %v3751_v22 = vpop.permute.xlu1 %3750 }
 0x3e7   : > { %7583 = vmatprep.subr.mxu0 %v9288_v37  ;;  %7609 = vmatprep.subr.mxu1 %v9225_v42 }
 0x3e8   : > { %7541 = vmatmul.mubr.f32.gmra.mxu0 %v3031_v27  ;;  %7610 = vmatpush3.msra.mxu1 %v9225_v42 }
 0x3e9   : > { %7584 = vmatpush3.msra.mxu0 %v9288_v37  ;;  %7569 = vmatmul.mubr.f32.gmra.mxu1 %v9385_v38  ;;  %v3782_v37 = vsel %vm1852_vm2, %v3751_v22, 0 }
 0x3ea   : > { %7585 = vmatprep.subr.mxu0 %v9299_v7  ;;  %7587 = vmatprep.mubr.f32.mxu0 %v9284_v39  ;;  %v3745_v39 = vpop.permute.xlu0 %3744 }
 0x3eb   : > { %7611 = vmatprep.subr.mxu1 %v9280_v59  ;;  %7586 = vmatpush3.msra.mxu0 %v9299_v7 }
 0x3ec   : > { %7612 = vmatpush3.msra.mxu1 %v9280_v59  ;;  %7615 = vmatprep.mubr.f32.mxu1 %v2959_v8 }
 0x3ed   : > { %7613 = vmatprep.subr.mxu1 %v9290_v2  ;;  %7627 = vmatprep.subr.mxu0 %v9171_v28 }
 0x3ee   : > { %7588 = vmatmul.mubr.f32.vlgmr.msra.gmra.mxu0 %v9311_v44  ;;  %7614 = vmatpush3.msra.mxu1 %v9290_v2  ;;  %v9455_v8 = vpop.permute.xlu0 %3740 }
 0x3ef   : > { %7628 = vmatpush3.msra.mxu0 %v9171_v28  ;;  %7590 = vmatprep.mubr.f32.mxu0 %v9326_v46  ;;  %v3784_v28 = vsel %vm1852_vm2, %v3753_v47, 0 }
 0x3f0   : > { %7616 = vmatmul.mubr.f32.vlgmr.msra.gmra.mxu1 %v2969_v55  ;;  %7629 = vmatprep.subr.mxu0 %v9187_v60 }
 0x3f1   : > { %7655 = vmatprep.subr.mxu1 %v9151_v9  ;;  %7618 = vmatprep.mubr.f32.mxu1 %v2979_v57 }
 0x3f2   : > { %7630 = vmatpush3.msra.mxu0 %v9187_v60  ;;  %7656 = vmatpush3.msra.mxu1 %v9151_v9  ;;  %v9453_v9 = vand.u32 4294901760, %v3784_v28  ;;  %v3747_v60 = vpop.permute.xlu1 %3746  ;;  %v3723_v55 = vpop.permute.xlu0 %3722 }
 0x3f3   : > { %7631 = vmatprep.subr.mxu0 %v9208_v10  ;;  %7657 = vmatprep.subr.mxu1 %v9158_v31  ;;  %v3754_v46 = vsel %vm1852_vm2, %v3723_v55, 0 }
 0x3f4   : > { %7591 = vmatmul.mubr.f32.gmra.mxu0 %v9340_v19  ;;  %7658 = vmatpush3.msra.mxu1 %v9158_v31  ;;  %v9462_v31 = vand.u32 4294901760, %v3782_v37  ;;  %v9470_v7 = vsub.f32 %v3784_v28, %v9453_v9 }
 0x3f5   : > { %7632 = vmatpush3.msra.mxu0 %v9208_v10  ;;  %7593 = vmatprep.mubr.f32.mxu0 %v9359_v12  ;;  %v3780_v10 = vsel %vm1852_vm2, %v3749_v25, 0 }
 0x3f6   : > { %7619 = vmatmul.mubr.f32.gmra.mxu1 %v2989_v36  ;;  %7633 = vmatprep.subr.mxu0 %v9231_v43  ;;  %v3743_v44 = vpop.permute.xlu1 %3742  ;;  %v9510_v36 = vand.u32 4294901760, %v3754_v46 }
 0x3f7   : > { %7659 = vmatprep.subr.mxu1 %v9178_v24  ;;  %7621 = vmatprep.mubr.f32.mxu1 %v2999_v5  ;;  %v3774_v17 = vsel %vm1852_vm2, %v3743_v44, 0 }
 0x3f8   : > { %7634 = vmatpush3.msra.mxu0 %v9231_v43  ;;  %7660 = vmatpush3.msra.mxu1 %v9178_v24  ;;  %v9478_v24 = vsub.f32 %v3782_v37, %v9462_v31  ;;  %v9480_v43 = vand.u32 4294901760, %v3780_v10 }
 0x3f9   : > { %7635 = vmatprep.subr.mxu0 %v9221_v62  ;;  %7661 = vmatprep.subr.mxu1 %v9203_v61 }
 0x3fa   : > { %7594 = vmatmul.mubr.f32.gmra.mxu0 %v9372_v23  ;;  %7662 = vmatpush3.msra.mxu1 %v9203_v61  ;;  %v3778_v61 = vsel %vm1852_vm2, %v3747_v60, 0  ;;  %v9497_v57 = vsub.f32 %v3780_v10, %v9480_v43 }
 0x3fb   : > { %7636 = vmatpush3.msra.mxu0 %v9221_v62  ;;  %7596 = vmatprep.mubr.f32.mxu0 %v9377_v45  ;;  %v9491_v62 = vand.u32 4294901760, %v9470_v7  ;;  %v9499_v19 = vand.u32 4294901760, %v3778_v61  ;;  %v9541_v45 = vand.u32 4294901760, %v3774_v17 }
 0x3fc   : > { %7622 = vmatmul.mubr.f32.gmra.mxu1 %v3009_v34  ;;  %7637 = vmatprep.subr.mxu0 %v9251_v29  ;;  %v9529_v5 = vand.u32 4294901760, %v9497_v57 }
 0x3fd   : > { %7663 = vmatprep.subr.mxu1 %v9167_v21  ;;  %7624 = vmatprep.mubr.f32.mxu1 %v3019_v63  ;;  %v9521_v3 = vsub.f32 %v3778_v61, %v9499_v19  ;;  %v9557_v40 = vsub.f32 %v3774_v17, %v9541_v45 }
 0x3fe   : > { %7638 = vmatpush3.msra.mxu0 %v9251_v29  ;;  %7664 = vmatpush3.msra.mxu1 %v9167_v21  ;;  %v3776_v21 = vsel %vm1852_vm2, %v3745_v39, 0  ;;  %v9506_v29 = vand.u32 4294901760, %v9478_v24  ;;  %v3973_v34 = vsub.f32 %v9497_v57, %v9529_v5 }
 0x3ff   : > { %7639 = vmatprep.subr.mxu0 %v9303_v1  ;;  %7665 = vmatprep.subr.mxu1 %v9225_v42  ;;  %v9516_v12 = vand.u32 4294901760, %v3776_v21  ;;  %v9551_v63 = vand.u32 4294901760, %v9521_v3  ;;  %v9590_v39 = vand.u32 4294901760, %v9557_v40 }
 0x400   : > { %7597 = vmatmul.mubr.f32.gmra.mxu0 %v9396_v20  ;;  %7666 = vmatpush3.msra.mxu1 %v9225_v42  ;;  %v3739_v42 = vpop.permute.xlu1 %3738  ;;  %v3974_v18 = vand.u32 4294901760, %v3973_v34 }
 0x401   : > { %7640 = vmatpush3.msra.mxu0 %v9303_v1  ;;  %7625 = vmatmul.mubr.f32.gmra.mxu1 %v3029_v30  ;;  %v3959_v1 = vsub.f32 %v9470_v7, %v9491_v62  ;;  %v9539_v23 = vsub.f32 %v3776_v21, %v9516_v12  ;;  %v3770_v20 = vsel %vm1852_vm2, %v3739_v42, 0  ;;  %v3980_v15 = vsub.f32 %v9521_v3, %v9551_v63 }
 0x402   : > { %7641 = vmatprep.subr.mxu0 %v9319_v58  ;;  %7643 = vmatprep.mubr.f32.mxu0 %v9277_v26  ;;  %v9579_v33 = vand.u32 4294901760, %v3770_v20  ;;  %v3994_v55 = vsub.f32 %v9557_v40, %v9590_v39 }
 0x403   : > { %7667 = vmatprep.subr.mxu1 %v9280_v59  ;;  %7642 = vmatpush3.msra.mxu0 %v9319_v58  ;;  %v3966_v58 = vsub.f32 %v9478_v24, %v9506_v29  ;;  %v9569_v30 = vand.u32 4294901760, %v9539_v23  ;;  %v3981_v25 = vand.u32 4294901760, %v3980_v15 }
 0x404   : > { %7668 = vmatpush3.msra.mxu1 %v9280_v59  ;;  %7671 = vmatprep.mubr.f32.mxu1 %v9277_v26  ;;  %v9534_v26 = vsub.f32 %v3754_v46, %v9510_v36  ;;  %v3960_v59 = vand.u32 4294901760, %v3959_v1  ;;  %v3725_v49 = vpop.permute.xlu1 %3724  ;;  %v9595_v37 = vsub.f32 %v3770_v20, %v9579_v33  ;;  %v3995_v17 = vand.u32 4294901760, %v3994_v55 }
 0x405   : > { %7669 = vmatprep.subr.mxu1 %v9290_v2  ;;  %7683 = vmatprep.subr.mxu0 %v9453_v9  ;;  %v3967_v16 = vand.u32 4294901760, %v3966_v58  ;;  %v3756_v47 = vsel %vm1852_vm2, %v3725_v49, 0  ;;  %v3987_v22 = vsub.f32 %v9539_v23, %v9569_v30 }
 0x406   : > { %7644 = vmatmul.mubr.f32.vlgmr.msra.gmra.mxu0 %v9294_v35  ;;  %7670 = vmatpush3.msra.mxu1 %v9290_v2  ;;  %v3772_v2 = vsel %vm1852_vm2, %v9455_v8, 0  ;;  %v9597_v60 = vand.u32 4294901760, %v3756_v47 }
 0x407   : > { %7684 = vmatpush3.xpose.msra.mxu0 %v9453_v9  ;;  %7646 = vmatprep.mubr.f32.mxu0 %v9313_v14  ;;  %v9559_v53 = vand.u32 4294901760, %v3772_v2  ;;  %v3988_v44 = vand.u32 4294901760, %v3987_v22 }
 0x408   : > { %7672 = vmatmul.mubr.f32.vlgmr.msra.gmra.mxu1 %v9294_v35  ;;  %7685 = vmatprep.subr.mxu0 %v9462_v31  ;;  %v3861_v35 = vand.u32 4294901760, %v9534_v26  ;;  %v3729_v4 = vpop.permute.xlu1 %3728 }
 0x409   : > { %7711 = vmatprep.subr.mxu1 %v3960_v59  ;;  %7674 = vmatprep.mubr.f32.mxu1 %v9313_v14  ;;  %v3727_v14 = vpop.permute.xlu0 %3726  ;;  %v3760_v8 = vsel %vm1852_vm2, %v3729_v4, 0 }
 0x40a   : > { %7712 = vmatpush3.xpose.msra.mxu1 %v3960_v59  ;;  %7647 = vmatmul.mubr.f32.gmra.mxu0 %v9333_v52  ;;  %v3758_v27 = vsel %vm1852_vm2, %v3727_v14, 0  ;;  %v9615_v21 = vand.u32 4294901760, %v3760_v8  ;;  %v9624_v59 = vand.u32 4294901760, %v9595_v37 }
 0x40b   : > { %7713 = vmatprep.subr.mxu1 %v3967_v16  ;;  %7686 = vmatpush3.xpose.msra.mxu0 %v9462_v31 }
 0x40c   : > { %7649 = vmatprep.mubr.f32.mxu0 %v9348_v11  ;;  %7675 = vmatmul.mubr.f32.gmra.mxu1 %v9333_v52  ;;  %v3862_v52 = vsub.f32 %v9534_v26, %v3861_v35  ;;  %v3733_v10 = vpop.permute.xlu1 %3732  ;;  %v9633_v20 = vsub.f32 %v3760_v8, %v9615_v21 }
 0x40d   : > { %7687 = vmatprep.subr.mxu0 %v9480_v43  ;;  %7677 = vmatprep.mubr.f32.mxu1 %v9348_v11  ;;  %v9577_v11 = vsub.f32 %v3772_v2, %v9559_v53  ;;  %v3731_v28 = vpop.permute.xlu0 %3730  ;;  %v3764_v49 = vsel %vm1852_vm2, %v3733_v10, 0 }
 0x40e   : > { %7714 = vmatpush3.xpose.msra.mxu1 %v3967_v16  ;;  %7650 = vmatmul.mubr.f32.gmra.mxu0 %v9361_v56  ;;  %v3762_v46 = vsel %vm1852_vm2, %v3731_v28, 0  ;;  %v9637_v15 = vand.u32 4294901760, %v3764_v49  ;;  %v3891_v28 = vand.u32 4294901760, %v9633_v20 }
 0x40f   : > { %7715 = vmatprep.subr.mxu1 %v3974_v18  ;;  %7688 = vmatpush3.xpose.msra.mxu0 %v9480_v43  ;;  %v9608_v61 = vand.u32 4294901760, %v9577_v11  ;;  %v9626_v2 = vand.u32 4294901760, %v3762_v46 }
 0x410   : > { %7652 = vmatprep.mubr.f32.mxu0 %v9365_v32  ;;  %7678 = vmatmul.mubr.f32.gmra.mxu1 %v9361_v56  ;;  %v3863_v56 = vand.u32 4294901760, %v3862_v52  ;;  %v3737_v34 = vpop.permute.xlu1 %3736  ;;  %v4008_v52 = vsub.f32 %v9595_v37, %v9624_v59 }
 0x411   : > { %7689 = vmatprep.subr.mxu0 %v9499_v19  ;;  %7680 = vmatprep.mubr.f32.mxu1 %v9365_v32  ;;  %v9599_v32 = vand.u32 4294901760, %v3758_v27  ;;  %v3735_v42 = vpop.permute.xlu0 %3734  ;;  %v4001_v58 = vsub.f32 %v9577_v11, %v9608_v61 }
 0x412   : > { %7716 = vmatpush3.xpose.msra.mxu1 %v3974_v18  ;;  %7653 = vmatmul.mubr.f32.gmra.mxu0 %v9385_v38  ;;  %v3766_v16 = vsel %vm1852_vm2, %v3735_v42, 0  ;;  %v4009_v10 = vand.u32 4294901760, %v4008_v52 }
 0x413   : > { %7717 = vmatprep.subr.mxu1 %v3981_v25  ;;  %7690 = vmatpush3.xpose.msra.mxu0 %v9499_v19  ;;  %v9619_v1 = vsub.f32 %v3758_v27, %v9599_v32  ;;  %v4002_v4 = vand.u32 4294901760, %v4001_v58  ;;  %v9644_v27 = vand.u32 4294901760, %v3766_v16 }
 0x414   : > { %7681 = vmatmul.mubr.f32.gmra.mxu1 %v9385_v38  ;;  %7691 = vmatprep.subr.mxu0 %v9516_v12  ;;  %v9613_v38 = vsub.f32 %v3756_v47, %v9597_v60  ;;  %v9642_v47 = vsub.f32 %v3762_v46, %v9626_v2 }
 0x415   : > { %7699 = vmatprep.mubr.f32.mxu0 %v3863_v56  ;;  %7727 = vmatprep.mubr.f32.mxu1 %v9510_v36  ;;  %v3881_v18 = vand.u32 4294901760, %v9619_v1  ;;  %v9654_v56 = vsub.f32 %v3764_v49, %v9637_v15  ;;  %v9663_v46 = vsub.f32 %v3766_v16, %v9644_v27 }
 0x416   : > { %7718 = vmatpush3.xpose.msra.mxu1 %v3981_v25  ;;  %v3871_v14 = vand.u32 4294901760, %v9613_v38  ;;  %v3768_v25 = vsel %vm1852_vm2, %v3737_v34, 0  ;;  %v3901_v55 = vand.u32 4294901760, %v9642_v47  ;;  %v3892_v34 = vsub.f32 %v9633_v20, %v3891_v28 }
 0x417   : > { %7719 = vmatprep.subr.mxu1 %v3988_v44  ;;  %7692 = vmatpush3.xpose.msra.mxu0 %v9516_v12  ;;  %v9656_v8 = vand.u32 4294901760, %v3768_v25  ;;  %v3921_v16 = vand.u32 4294901760, %v9663_v46 }
 0x418   : > { %7693 = vmatprep.subr.mxu0 %v9541_v45  ;;  %v3872_v22 = vsub.f32 %v9613_v38, %v3871_v14 }
 0x419   : > { %v9669_v58 = vsub.f32 %v3768_v25, %v9656_v8  ;;  %v3893_v25 = vand.u32 4294901760, %v3892_v34 }
 0x41a   : > { %7720 = vmatpush3.xpose.msra.mxu1 %v3988_v44  ;;  %v3882_v44 = vsub.f32 %v9619_v1, %v3881_v18  ;;  %v3873_v42 = vand.u32 4294901760, %v3872_v22 }
 0x41b   : > { %7721 = vmatprep.subr.mxu1 %v3995_v17  ;;  %7694 = vmatpush3.xpose.msra.mxu0 %v9541_v45  ;;  %v3931_v52 = vand.u32 4294901760, %v9669_v58 }
 0x41c   : > { %7695 = vmatprep.subr.mxu0 %v9559_v53  ;;  %v3883_v49 = vand.u32 4294901760, %v3882_v44 }
 0x41e   : > { %7722 = vmatpush3.xpose.msra.mxu1 %v3995_v17  ;;  %v3911_v17 = vand.u32 4294901760, %v9654_v56 }
 0x41f   : > { %7723 = vmatprep.subr.mxu1 %v4002_v4  ;;  %7696 = vmatpush3.xpose.msra.mxu0 %v9559_v53 }
 0x420   : > { %7697 = vmatprep.subr.mxu0 %v9579_v33  ;;  %v3912_v22 = vsub.f32 %v9654_v56, %v3911_v17 }
 0x422   : > { %7724 = vmatpush3.xpose.msra.mxu1 %v4002_v4  ;;  %v3902_v4 = vsub.f32 %v9642_v47, %v3901_v55  ;;  %v3913_v44 = vand.u32 4294901760, %v3912_v22 }
 0x423   : > { %7725 = vmatprep.subr.mxu1 %v4009_v10  ;;  %7698 = vmatpush3.xpose.msra.mxu0 %v9579_v33 }
 0x424   : > { %7739 = vmatprep.subr.mxu0 %v9470_v7 }
 0x426   : > { %7726 = vmatpush3.xpose.msra.mxu1 %v4009_v10  ;;  %7700 = vmatmul.mubr.f32.vlgmr.msra.gmra.mxu0 %v3873_v42  ;;  %v3903_v10 = vand.u32 4294901760, %v3902_v4  ;;  %v3932_v42 = vsub.f32 %v9669_v58, %v3931_v52 }
 0x427   : > { %7767 = vmatprep.subr.mxu1 %v9453_v9  ;;  %7702 = vmatprep.mubr.f32.mxu0 %v3883_v49 }
 0x428   : > { %7740 = vmatpush3.xpose.msra.mxu0 %v9470_v7  ;;  %v3922_v7 = vsub.f32 %v9663_v46, %v3921_v16 }
 0x429   : > { %7728 = vmatmul.mubr.f32.vlgmr.msra.gmra.mxu1 %v9597_v60  ;;  %7741 = vmatprep.subr.mxu0 %v9478_v24 }
 0x42a   : > { %7730 = vmatprep.mubr.f32.mxu1 %v9599_v32  ;;  %7768 = vmatpush3.xpose.msra.mxu1 %v9453_v9  ;;  %v3923_v49 = vand.u32 4294901760, %v3922_v7 }
 0x42b   : > { %7703 = vmatmul.mubr.f32.gmra.mxu0 %v3893_v25  ;;  %7769 = vmatprep.subr.mxu1 %v9462_v31 }
 0x42c   : > { %7705 = vmatprep.mubr.f32.mxu0 %v3903_v10  ;;  %7742 = vmatpush3.xpose.msra.mxu0 %v9478_v24  ;;  %v3933_v24 = vand.u32 4294901760, %v3932_v42 }
 0x42d   : > { %7731 = vmatmul.mubr.f32.gmra.mxu1 %v9615_v21  ;;  %7743 = vmatprep.subr.mxu0 %v9497_v57 }
 0x42e   : > { %7733 = vmatprep.mubr.f32.mxu1 %v9626_v2  ;;  %7770 = vmatpush3.xpose.msra.mxu1 %v9462_v31 }
 0x42f   : > { %7706 = vmatmul.mubr.f32.gmra.mxu0 %v3913_v44  ;;  %7771 = vmatprep.subr.mxu1 %v9480_v43 }
 0x430   : > { %7708 = vmatprep.mubr.f32.mxu0 %v3923_v49  ;;  %7744 = vmatpush3.xpose.msra.mxu0 %v9497_v57 }
 0x431   : > { %7734 = vmatmul.mubr.f32.gmra.mxu1 %v9637_v15  ;;  %7745 = vmatprep.subr.mxu0 %v9521_v3 }
 0x432   : > { %7736 = vmatprep.mubr.f32.mxu1 %v9644_v27  ;;  %7772 = vmatpush3.xpose.msra.mxu1 %v9480_v43 }
 0x433   : > { %7709 = vmatmul.mubr.f32.gmra.mxu0 %v3933_v24  ;;  %7773 = vmatprep.subr.mxu1 %v9499_v19 }
 0x434   : > { %7746 = vmatpush3.xpose.msra.mxu0 %v9521_v3  ;;  %7755 = vmatprep.mubr.f32.mxu0 %v9534_v26 }
 0x435   : > { %7737 = vmatmul.mubr.f32.gmra.mxu1 %v9656_v8  ;;  %7747 = vmatprep.subr.mxu0 %v9539_v23 }
 0x436   : > { %7774 = vmatpush3.xpose.msra.mxu1 %v9499_v19  ;;  %7783 = vmatprep.mubr.f32.mxu1 %v3861_v35 }
 0x437   : > { %7775 = vmatprep.subr.mxu1 %v9516_v12 }
 0x438   : > { %7748 = vmatpush3.xpose.msra.mxu0 %v9539_v23 }
 0x439   : > { %7749 = vmatprep.subr.mxu0 %v9557_v40 }
 0x43a   : > { %7776 = vmatpush3.xpose.msra.mxu1 %v9516_v12 }
 0x43b   : > { %7777 = vmatprep.subr.mxu1 %v9541_v45 }
 0x43c   : > { %7750 = vmatpush3.xpose.msra.mxu0 %v9557_v40 }
 0x43d   : > { %7751 = vmatprep.subr.mxu0 %v9577_v11 }
 0x43e   : > { %7778 = vmatpush3.xpose.msra.mxu1 %v9541_v45 }
 0x43f   : > { %7779 = vmatprep.subr.mxu1 %v9559_v53 }
 0x440   : > { %7752 = vmatpush3.xpose.msra.mxu0 %v9577_v11 }
 0x441   : > { %7753 = vmatprep.subr.mxu0 %v9595_v37 }
 0x442   : > { %7780 = vmatpush3.xpose.msra.mxu1 %v9559_v53 }
 0x443   : > { %7781 = vmatprep.subr.mxu1 %v9579_v33 }
 0x444   : > { %7754 = vmatpush3.xpose.msra.mxu0 %v9595_v37 }
 0x445   : > { %7795 = vmatprep.subr.mxu0 %v9491_v62 }
 0x446   : > { %7782 = vmatpush3.xpose.msra.mxu1 %v9579_v33 }
 0x447   : > { %7756 = vmatmul.mubr.f32.vlgmr.msra.gmra.mxu0 %v9613_v38  ;;  %7823 = vmatprep.subr.mxu1 %v9453_v9 }
 0x448   : > { %7758 = vmatprep.mubr.f32.mxu0 %v9619_v1  ;;  %7796 = vmatpush3.xpose.msra.mxu0 %v9491_v62 }
 0x449   : > { %7784 = vmatmul.mubr.f32.vlgmr.msra.gmra.mxu1 %v3871_v14  ;;  %7797 = vmatprep.subr.mxu0 %v9506_v29 }
 0x44a   : > { %7786 = vmatprep.mubr.f32.mxu1 %v3881_v18  ;;  %7824 = vmatpush3.xpose.msra.mxu1 %v9453_v9 }
 0x44b   : > { %7759 = vmatmul.mubr.f32.gmra.mxu0 %v9633_v20  ;;  %7825 = vmatprep.subr.mxu1 %v9462_v31 }
 0x44c   : > { %7761 = vmatprep.mubr.f32.mxu0 %v9642_v47  ;;  %7798 = vmatpush3.xpose.msra.mxu0 %v9506_v29 }
 0x44d   : > { %7787 = vmatmul.mubr.f32.gmra.mxu1 %v3891_v28  ;;  %7799 = vmatprep.subr.mxu0 %v9529_v5 }
 0x44e   : > { %7789 = vmatprep.mubr.f32.mxu1 %v3901_v55  ;;  %7826 = vmatpush3.xpose.msra.mxu1 %v9462_v31 }
 0x44f   : > { %7762 = vmatmul.mubr.f32.gmra.mxu0 %v9654_v56  ;;  %7827 = vmatprep.subr.mxu1 %v9480_v43 }
 0x450   : > { %7764 = vmatprep.mubr.f32.mxu0 %v9663_v46  ;;  %7800 = vmatpush3.xpose.msra.mxu0 %v9529_v5 }
 0x451   : > { %7790 = vmatmul.mubr.f32.gmra.mxu1 %v3911_v17  ;;  %7801 = vmatprep.subr.mxu0 %v9551_v63 }
 0x452   : > { %7792 = vmatprep.mubr.f32.mxu1 %v3921_v16  ;;  %7828 = vmatpush3.xpose.msra.mxu1 %v9480_v43 }
 0x453   : > { %7765 = vmatmul.mubr.f32.gmra.mxu0 %v9669_v58  ;;  %7829 = vmatprep.subr.mxu1 %v9499_v19 }
 0x454   : > { %7802 = vmatpush3.xpose.msra.mxu0 %v9551_v63  ;;  %7811 = vmatprep.mubr.f32.mxu0 %v9510_v36 }
 0x455   : > { %7793 = vmatmul.mubr.f32.gmra.mxu1 %v3931_v52  ;;  %7803 = vmatprep.subr.mxu0 %v9569_v30 }
 0x456   : > { %7830 = vmatpush3.xpose.msra.mxu1 %v9499_v19  ;;  %7839 = vmatprep.mubr.f32.mxu1 %v9510_v36 }
 0x457   : > { %7831 = vmatprep.subr.mxu1 %v9516_v12 }
 0x458   : > { %7804 = vmatpush3.xpose.msra.mxu0 %v9569_v30 }
 0x459   : > { %7805 = vmatprep.subr.mxu0 %v9590_v39 }
 0x45a   : > { %7832 = vmatpush3.xpose.msra.mxu1 %v9516_v12 }
 0x45b   : > { %7833 = vmatprep.subr.mxu1 %v9541_v45 }
 0x45c   : > { %7806 = vmatpush3.xpose.msra.mxu0 %v9590_v39 }
 0x45d   : > { %7807 = vmatprep.subr.mxu0 %v9608_v61 }
 0x45e   : > { %7834 = vmatpush3.xpose.msra.mxu1 %v9541_v45 }
 0x45f   : > { %7835 = vmatprep.subr.mxu1 %v9559_v53 }
 0x460   : > { %7808 = vmatpush3.xpose.msra.mxu0 %v9608_v61 }
 0x461   : > { %7809 = vmatprep.subr.mxu0 %v9624_v59 }
 0x462   : > { %7836 = vmatpush3.xpose.msra.mxu1 %v9559_v53 }
 0x463   : > { %7837 = vmatprep.subr.mxu1 %v9579_v33 }
 0x464   : > { %7810 = vmatpush3.xpose.msra.mxu0 %v9624_v59 }
 0x466   : > { %7838 = vmatpush3.xpose.msra.mxu1 %v9579_v33 }
 0x467   : > { %7812 = vmatmul.mubr.f32.vlgmr.msra.gmra.mxu0 %v9597_v60 }
 0x468   : > { %7814 = vmatprep.mubr.f32.mxu0 %v9599_v32 }
 0x469   : > { %7840 = vmatmul.mubr.f32.vlgmr.msra.gmra.mxu1 %v9597_v60 }
 0x46a   : > { %7842 = vmatprep.mubr.f32.mxu1 %v9599_v32 }
 0x46b   : > { %7815 = vmatmul.mubr.f32.gmra.mxu0 %v9615_v21 }
 0x46c   : > { %7817 = vmatprep.mubr.f32.mxu0 %v9626_v2 }
 0x46d   : > { %7843 = vmatmul.mubr.f32.gmra.mxu1 %v9615_v21 }
 0x46e   : > { %7845 = vmatprep.mubr.f32.mxu1 %v9626_v2 }
 0x46f   : > { %7818 = vmatmul.mubr.f32.gmra.mxu0 %v9637_v15 }
 0x470   : > { %7820 = vmatprep.mubr.f32.mxu0 %v9644_v27 }
 0x471   : > { %7846 = vmatmul.mubr.f32.gmra.mxu1 %v9637_v15 }
 0x472   : > { %7848 = vmatprep.mubr.f32.mxu1 %v9644_v27 }
 0x473   : > { %7821 = vmatmul.mubr.f32.gmra.mxu0 %v9656_v8 }
 0x475   : > { %7849 = vmatmul.mubr.f32.gmra.mxu1 %v9656_v8 }
 0x496   : > { %v7533_v9 = vpop.f32.mrf.mxu0 }
 0x497   : > { %v7561_v31 = vpop.f32.mrf.mxu1 }
 0x498   : > { %v3151_v43 = vadd.f32 %v7561_v31, %v7533_v9  ;;  %v2963_v62 = vpop.f32.mrf.mxu0 }
 0x499   : > { %v3144_v57 = vpop.f32.mrf.mxu1 }
 0x49a   : > { %v3145_v19 = vadd.f32 %v3144_v57, %v2963_v62 }
 0x49d   : > { %v7536_v29 = vpop.f32.mrf.mxu0  ;;  %v7564_v36 = vpop.f32.mrf.mxu1 }
 0x49e   : > { %v3163_v12 = vadd.f32 %v7564_v36, %v7536_v29 }
 0x49f   : > { %v2983_v3 = vpop.f32.mrf.mxu0  ;;  %v3156_v5 = vpop.f32.mrf.mxu1 }
 0x4a0   : > { %v3157_v26 = vadd.f32 %v3156_v5, %v2983_v3 }
 0x4a3   : > { %v7539_v23 = vpop.f32.mrf.mxu0  ;;  %v7567_v45 = vpop.f32.mrf.mxu1 }
 0x4a4   : > { %v3175_v63 = vadd.f32 %v7567_v45, %v7539_v23 }
 0x4a5   : > { %v3003_v35 = vpop.f32.mrf.mxu0  ;;  %v3168_v40 = vpop.f32.mrf.mxu1 }
 0x4a6   : > { %v3169_v53 = vadd.f32 %v3168_v40, %v3003_v35 }
 0x4a8   : > { %v7542_v30 = vpop.f32.mrf.mxu0 }
 0x4a9   : > { %v7570_v11 = vpop.f32.mrf.mxu1 }
 0x4aa   : > { %v3187_v33 = vadd.f32 %v7570_v11, %v7542_v30  ;;  %v3023_v39 = vpop.f32.mrf.mxu0 }
 0x4ab   : > { %v3180_v37 = vpop.f32.mrf.mxu1 }
 0x4ac   : > { %v3181_v60 = vadd.f32 %v3180_v37, %v3023_v39 }
 0x4ae   : > { %v7589_v32 = vpop.f32.mrf.mxu0 }
 0x4af   : > { %v3282_v61 = vadd.f32 %v7589_v32, %v3151_v43 }
 0x4b0   : > { %v7617_v38 = vpop.f32.mrf.mxu1  ;;  %v3274_v21 = vpop.f32.mrf.mxu0 }
 0x4b1   : > { %v3413_v1 = vadd.f32 %v7617_v38, %v3282_v61  ;;  %v3275_v59 = vadd.f32 %v3274_v21, %v3145_v19 }
 0x4b2   : > { %v3404_v2 = vpop.f32.mrf.mxu1 }
 0x4b3   : > { %v3405_v14 = vadd.f32 %v3404_v2, %v3275_v59 }
 0x4b4   : > { %v7592_v20 = vpop.f32.mrf.mxu0 }
 0x4b5   : > { %v3296_v18 = vadd.f32 %v7592_v20, %v3163_v12 }
 0x4b6   : > { %v7620_v15 = vpop.f32.mrf.mxu1  ;;  %v3288_v47 = vpop.f32.mrf.mxu0 }
 0x4b7   : > { %v3429_v27 = vadd.f32 %v7620_v15, %v3296_v18  ;;  %v3289_v28 = vadd.f32 %v3288_v47, %v3157_v26 }
 0x4b8   : > { %v3420_v56 = vpop.f32.mrf.mxu1 }
 0x4b9   : > { %v3421_v8 = vadd.f32 %v3420_v56, %v3289_v28 }
 0x4ba   : > { %v7595_v55 = vpop.f32.mrf.mxu0 }
 0x4bb   : > { %v3310_v46 = vadd.f32 %v7595_v55, %v3175_v63 }
 0x4bc   : > { %v7623_v17 = vpop.f32.mrf.mxu1  ;;  %v3302_v58 = vpop.f32.mrf.mxu0 }
 0x4bd   : > { %v3445_v34 = vadd.f32 %v7623_v17, %v3310_v46  ;;  %v3303_v16 = vadd.f32 %v3302_v58, %v3169_v53 }
 0x4be   : > { %v3436_v4 = vpop.f32.mrf.mxu1 }
 0x4bf   : > { %v3437_v52 = vadd.f32 %v3436_v4, %v3303_v16 }
 0x4c0   : > { %v7598_v25 = vpop.f32.mrf.mxu0 }
 0x4c1   : > { %v3324_v22 = vadd.f32 %v7598_v25, %v3187_v33  ;;  %v7626_v10 = vpop.f32.mrf.mxu1 }
 0x4c2   : > { %v3316_v7 = vpop.f32.mrf.mxu0 }
 0x4c3   : > { %v3461_v44 = vadd.f32 %v7626_v10, %v3324_v22  ;;  %v3317_v42 = vadd.f32 %v3316_v7, %v3181_v60  ;;  %v3452_v49 = vpop.f32.mrf.mxu1 }
 0x4c5   : > { %v3453_v24 = vadd.f32 %v3452_v49, %v3317_v42 }
 0x4c6   : > { %v7645_v9 = vpop.f32.mrf.mxu0 }
 0x4c7   : > { %v3562_v31 = vadd.f32 %v7645_v9, %v3413_v1 }
 0x4c8   : > { %v7673_v43 = vpop.f32.mrf.mxu1  ;;  %v3555_v62 = vpop.f32.mrf.mxu0 }
 0x4c9   : > { %v9798_v57 = vadd.f32 %v7673_v43, %v3562_v31  ;;  %v3556_v19 = vadd.f32 %v3555_v62, %v3405_v14 }
 0x4ca   : > { %v3676_v29 = vpop.f32.mrf.mxu1  ;;  %v7648_v36 = vpop.f32.mrf.mxu0 }
 0x4cb   : > { %v9800_v12 = vadd.f32 %v3676_v29, %v3556_v19  ;;  %v3574_v3 = vadd.f32 %v7648_v36, %v3429_v27 }
 0x4cc   : > { %v7676_v5 = vpop.f32.mrf.mxu1  ;;  %v3567_v26 = vpop.f32.mrf.mxu0 }
 0x4cd   : > { %v9802_v23 = vadd.f32 %v7676_v5, %v3574_v3  ;;  %v3568_v45 = vadd.f32 %v3567_v26, %v3421_v8 }
 0x4ce   : > { %v3688_v63 = vpop.f32.mrf.mxu1  ;;  %v7651_v35 = vpop.f32.mrf.mxu0 }
 0x4cf   : > { %v9804_v40 = vadd.f32 %v3688_v63, %v3568_v45  ;;  %v3586_v53 = vadd.f32 %v7651_v35, %v3445_v34 }
 0x4d0   : > { %v7679_v30 = vpop.f32.mrf.mxu1  ;;  %v3579_v11 = vpop.f32.mrf.mxu0 }
 0x4d1   : > { %v9806_v33 = vadd.f32 %v7679_v30, %v3586_v53  ;;  %v3580_v39 = vadd.f32 %v3579_v11, %v3437_v52 }
 0x4d2   : > { %v3700_v37 = vpop.f32.mrf.mxu1  ;;  %v7654_v60 = vpop.f32.mrf.mxu0 }
 0x4d3   : > { %v9808_v32 = vadd.f32 %v3700_v37, %v3580_v39  ;;  %v3598_v61 = vadd.f32 %v7654_v60, %v3461_v44 }
 0x4d4   : > { %v7682_v38 = vpop.f32.mrf.mxu1  ;;  %v3591_v21 = vpop.f32.mrf.mxu0 }
 0x4d5   : > { %v9810_v1 = vadd.f32 %v7682_v38, %v3598_v61  ;;  %v3592_v59 = vadd.f32 %v3591_v21, %v3453_v24 }
 0x4d6   : > { %v3712_v2 = vpop.f32.mrf.mxu1 }
 0x4d7   : > { %v9812_v14 = vadd.f32 %v3712_v2, %v3592_v59 }
 0x4e6   : > { %v7701_v20 = vpop.f32.mrf.mxu0 }
 0x4e8   : > { %v3865_v15 = vpop.f32.mrf.mxu0 }
 0x4e9   : > { %v7729_v18 = vpop.f32.mrf.mxu1 }
 0x4ea   : > { %v4053_v19 = vadd.f32 %v7729_v18, %v7701_v20 }
 0x4eb   : > { %v4046_v47 = vpop.f32.mrf.mxu1  ;;  %v7704_v27 = vpop.f32.mrf.mxu0 }
 0x4ec   : > { %v4047_v36 = vadd.f32 %v4046_v47, %v3865_v15 }
 0x4ed   : > { %v7732_v28 = vpop.f32.mrf.mxu1  ;;  %v3885_v56 = vpop.f32.mrf.mxu0 }
 0x4ee   : > { %v4065_v26 = vadd.f32 %v7732_v28, %v7704_v27 }
 0x4ef   : > { %v4058_v8 = vpop.f32.mrf.mxu1  ;;  %v7707_v55 = vpop.f32.mrf.mxu0 }
 0x4f0   : > { %v4059_v35 = vadd.f32 %v4058_v8, %v3885_v56 }
 0x4f1   : > { %v7735_v46 = vpop.f32.mrf.mxu1  ;;  %v3905_v17 = vpop.f32.mrf.mxu0 }
 0x4f2   : > { %v4077_v11 = vadd.f32 %v7735_v46, %v7707_v55 }
 0x4f3   : > { %v4070_v58 = vpop.f32.mrf.mxu1  ;;  %v7710_v34 = vpop.f32.mrf.mxu0 }
 0x4f4   : > { %v4071_v21 = vadd.f32 %v4070_v58, %v3905_v17 }
 0x4f5   : > { %v7738_v16 = vpop.f32.mrf.mxu1  ;;  %v3925_v4 = vpop.f32.mrf.mxu0 }
 0x4f7   : > { %v4082_v52 = vpop.f32.mrf.mxu1 }
 0x507   : > { %v7757_v25 = vpop.f32.mrf.mxu0 }
 0x508   : > { %v4184_v3 = vadd.f32 %v7757_v25, %v4053_v19  ;;  %v4089_v25 = vadd.f32 %v7738_v16, %v7710_v34 }
 0x509   : > { %v7785_v22 = vpop.f32.mrf.mxu1  ;;  %v4176_v10 = vpop.f32.mrf.mxu0 }
 0x50a   : > { %v4177_v45 = vadd.f32 %v4176_v10, %v4047_v36  ;;  %v4315_v53 = vadd.f32 %v7785_v22, %v4184_v3  ;;  %v4083_v22 = vadd.f32 %v4082_v52, %v3925_v4 }
 0x50b   : > { %v4306_v7 = vpop.f32.mrf.mxu1  ;;  %v7760_v44 = vpop.f32.mrf.mxu0 }
 0x50c   : > { %v4198_v30 = vadd.f32 %v7760_v44, %v4065_v26  ;;  %v4307_v60 = vadd.f32 %v4306_v7, %v4177_v45 }
 0x50d   : > { %v7788_v42 = vpop.f32.mrf.mxu1  ;;  %v4190_v49 = vpop.f32.mrf.mxu0 }
 0x50e   : > { %v4191_v61 = vadd.f32 %v4190_v49, %v4059_v35  ;;  %v4331_v18 = vadd.f32 %v7788_v42, %v4198_v30 }
 0x50f   : > { %v4322_v24 = vpop.f32.mrf.mxu1  ;;  %v7763_v9 = vpop.f32.mrf.mxu0 }
 0x510   : > { %v4212_v59 = vadd.f32 %v7763_v9, %v4077_v11  ;;  %v4323_v56 = vadd.f32 %v4322_v24, %v4191_v61 }
 0x511   : > { %v7791_v31 = vpop.f32.mrf.mxu1  ;;  %v4204_v43 = vpop.f32.mrf.mxu0 }
 0x512   : > { %v4205_v27 = vadd.f32 %v4204_v43, %v4071_v21  ;;  %v4347_v7 = vadd.f32 %v7791_v31, %v4212_v59 }
 0x513   : > { %v4338_v62 = vpop.f32.mrf.mxu1  ;;  %v7766_v29 = vpop.f32.mrf.mxu0 }
 0x514   : > { %v4226_v44 = vadd.f32 %v7766_v29, %v4089_v25  ;;  %v4339_v34 = vadd.f32 %v4338_v62, %v4205_v27 }
 0x515   : > { %v7794_v5 = vpop.f32.mrf.mxu1  ;;  %v4218_v63 = vpop.f32.mrf.mxu0 }
 0x516   : > { %v4219_v16 = vadd.f32 %v4218_v63, %v4083_v22  ;;  %v4363_v29 = vadd.f32 %v7794_v5, %v4226_v44 }
 0x517   : > { %v4354_v39 = vpop.f32.mrf.mxu1 }
 0x527   : > { %v7813_v37 = vpop.f32.mrf.mxu0 }
 0x528   : > { %v4464_v38 = vadd.f32 %v7813_v37, %v4315_v53  ;;  %v4355_v53 = vadd.f32 %v4354_v39, %v4219_v16 }
 0x529   : > { %v4457_v2 = vpop.f32.mrf.mxu0  ;;  %v7841_v20 = vpop.f32.mrf.mxu1 }
 0x52a   : > { %v4458_v15 = vadd.f32 %v4457_v2, %v4307_v60  ;;  %v4585_v47 = vadd.f32 %v7841_v20, %v4464_v38 }
 0x52b   : > { %v7816_v28 = vpop.f32.mrf.mxu0  ;;  %v4578_v10 = vpop.f32.mrf.mxu1 }
 0x52c   : > { %v9814_v8 = vmul.f32 0.35355338, %v4585_v47  ;;  %v4476_v55 = vadd.f32 %v7816_v28, %v4331_v18  ;;  %v4579_v46 = vadd.f32 %v4578_v10, %v4458_v15 }
 0x52d   : > { %v4469_v49 = vpop.f32.mrf.mxu0  ;;  %v7844_v17 = vpop.f32.mrf.mxu1 }
 0x52e   : > { %v4624_v58 = vmul.f32 0.35355338, %v4579_v46  ;;  %v4470_v9 = vadd.f32 %v4469_v49, %v4323_v56  ;;  %v4597_v19 = vadd.f32 %v7844_v17, %v4476_v55  ;;  %v4635_v42 = vsel %vm2747_vm3, %v9814_v8, -inf }
 0x52f   : > { %v4590_v43 = vpop.f32.mrf.mxu1  ;;  %4636 = vmax.xlane.f32.xlu1 %v4635_v42  ;;  %v7819_v24 = vpop.f32.mrf.mxu0 }
 0x530   : > { %v4627_v36 = vmul.f32 0.35355338, %v4597_v19  ;;  %v4591_v3 = vadd.f32 %v4590_v43, %v4470_v9  ;;  %v4488_v26 = vadd.f32 %v7819_v24, %v4347_v7  ;;  %v4632_v4 = vsel %vm2747_vm3, %v4624_v58, -inf }
 0x531   : > { %v4481_v52 = vpop.f32.mrf.mxu0  ;;  %v7847_v31 = vpop.f32.mrf.mxu1  ;;  %4633 = vmax.xlane.f32.xlu0 %v4632_v4 }
 0x532   : > { %v4482_v45 = vadd.f32 %v4481_v52, %v4339_v34  ;;  %v4609_v35 = vadd.f32 %v7847_v31, %v4488_v26  ;;  %v4626_v30 = vmul.f32 0.35355338, %v4591_v3  ;;  %v4641_v61 = vsel %vm2747_vm3, %v4627_v36, -inf }
 0x533   : > { %v7822_v11 = vpop.f32.mrf.mxu0  ;;  %v4602_v37 = vpop.f32.mrf.mxu1 }
 0x534   : > { %v4629_v62 = vmul.f32 0.35355338, %v4609_v35  ;;  %v4500_v63 = vadd.f32 %v7822_v11, %v4363_v29  ;;  %v4603_v60 = vadd.f32 %v4602_v37, %v4482_v45  ;;  %v4638_v47 = vsel %vm2747_vm3, %v4626_v30, -inf }
 0x535   : > { %v4493_v38 = vpop.f32.mrf.mxu0  ;;  %v7850_v21 = vpop.f32.mrf.mxu1  ;;  %4642 = vmax.xlane.f32.xlu0 %v4641_v61 }
 0x536   : > { %v4494_v59 = vadd.f32 %v4493_v38, %v4355_v53  ;;  %v4621_v2 = vadd.f32 %v7850_v21, %v4500_v63  ;;  %v4647_v20 = vsel %vm2747_vm3, %v4629_v62, -inf  ;;  %v4628_v5 = vmul.f32 0.35355338, %v4603_v60 }
 0x537   : > { %v4614_v18 = vpop.f32.mrf.mxu1  ;;  %4648 = vmax.xlane.f32.xlu1 %v4647_v20 }
 0x538   : > { %v4631_v15 = vmul.f32 0.35355338, %v4621_v2  ;;  %v4615_v39 = vadd.f32 %v4614_v18, %v4494_v59  ;;  %v4644_v28 = vsel %vm2747_vm3, %v4628_v5, -inf }
 0x539   : > { %4639 = vmax.xlane.f32.xlu0 %v4638_v47 }
 0x53a   : > { %v4653_v25 = vsel %vm2747_vm3, %v4631_v15, -inf  ;;  %v4630_v27 = vmul.f32 0.35355338, %v4615_v39 }
 0x53b   : > { %4654 = vmax.xlane.f32.xlu1 %v4653_v25 }
 0x53c   : > { %v4650_v10 = vsel %vm2747_vm3, %v4630_v27, -inf }
 0x53d   : > { %4645 = vmax.xlane.f32.xlu0 %v4644_v28 }
 0x541   : > { %4651 = vmax.xlane.f32.xlu0 %v4650_v10 }
 0x54c   : > { %4732 = vrot.lane.b32.xlu1 %v8805_v54, %s8329_s12 }
 0x550   : > { %4730 = vrot.lane.b32.xlu1 %v8783_v51, %s8329_s12 }
 0x554   : > { %4728 = vrot.lane.b32.xlu1 %v8787_v41, %s8329_s12 }
 0x557   : > { %4734 = vrot.lane.b32.xlu0 %v8793_v48, %s8329_s12 }
 0x558   : > { %4724 = vrot.lane.b32.xlu1 %v8829_v0, %s8329_s12 }
 0x55b   : > { %4726 = vrot.lane.b32.xlu0 %v8791_v6, %s8329_s12 }
 0x5b8   : > { %v4637_v56 = vpop.xlane.xlu1 %4636 }
 0x5b9   : > { %v4657_v55 = vsub.f32 %v9814_v8, %v4637_v56 }
 0x5ba   : > { %v4634_v46 = vpop.xlane.xlu0 %4633 }
 0x5bb   : > { %v4666_v54 = vmul.f32 1.442695, %v4657_v55  ;;  %v4656_v22 = vsub.f32 %v4624_v58, %v4634_v46 }
 0x5bd   : > { %8223 = vpow2.f32 %v4666_v54  ;;  %v4664_v51 = vmul.f32 1.442695, %v4656_v22 }
 0x5be   : > { %v4643_v7 = vpop.xlane.xlu0 %4642 }
 0x5bf   : > { %8225 = vpow2.f32 %v4664_v51  ;;  %v4659_v41 = vsub.f32 %v4627_v36, %v4643_v7 }
 0x5c0   : > { %v4649_v44 = vpop.xlane.xlu1 %4648 }
 0x5c1   : > { %v4670_v49 = vmul.f32 1.442695, %v4659_v41  ;;  %v4661_v48 = vsub.f32 %v4629_v62, %v4649_v44 }
 0x5c2   : > { %v4640_v17 = vpop.xlane.xlu0 %4639 }
 0x5c3   : > { %8227 = vpow2.f32 %v4670_v49  ;;  %v4674_v0 = vmul.f32 1.442695, %v4661_v48  ;;  %v4658_v9 = vsub.f32 %v4626_v30, %v4640_v17 }
 0x5c4   : > { %v4655_v19 = vpop.xlane.xlu1 %4654 }
 0x5c5   : > { %8229 = vpow2.f32 %v4674_v0  ;;  %v4668_v6 = vmul.f32 1.442695, %v4658_v9  ;;  %v4663_v42 = vsub.f32 %v4631_v15, %v4655_v19 }
 0x5c6   : > { %v4646_v8 = vpop.xlane.xlu0 %4645 }
 0x5c7   : > { %8231 = vpow2.f32 %v4668_v6  ;;  %v4678_v34 = vmul.f32 1.442695, %v4663_v42  ;;  %v4660_v58 = vsub.f32 %v4628_v5, %v4646_v8 }
 0x5c8   : > { %v4733_v16 = vpop.permute.xlu1 %4732 }
 0x5c9   : > { %8233 = vpow2.f32 %v4678_v34  ;;  %v4672_v43 = vmul.f32 1.442695, %v4660_v58  ;;  %v9840_v3 = vand.u32 4294901760, %v4733_v16 }
 0x5ca   : > { %v9838_v24 = vpop.eup %8223  ;;  %v4652_v36 = vpop.xlane.xlu0 %4651 }
 0x5cb   : > { %8235 = vpow2.f32 %v4672_v43  ;;  %v4662_v26 = vsub.f32 %v4630_v27, %v4652_v36  ;;  %v4683_v4 = vsel %vm2747_vm3, %v9838_v24, 0.0  ;;  %v9851_v30 = vsub.f32 %v4733_v16, %v9840_v3 }
 0x5cc   : > { %v9844_v52 = vpop.eup %8225  ;;  %4684 = vadd.xlane.f32.xlu1 %v4683_v4  ;;  %v4731_v31 = vpop.permute.xlu1 %4730 }
 0x5cd   : > { %v4676_v29 = vmul.f32 1.442695, %v4662_v26  ;;  %v9846_v45 = vand.u32 4294901760, %v4731_v31  ;;  %v4680_v35 = vsel %vm2747_vm3, %v9844_v52, 0.0  ;;  %v9881_v5 = vand.u32 4294901760, %v9851_v30 }
 0x5ce   : > { %4681 = vadd.xlane.f32.xlu0 %v4680_v35  ;;  %v4735_v53 = vpop.permute.xlu0 %4734 }
 0x5cf   : > { %8237 = vpow2.f32 %v4676_v29  ;;  %v9853_v11 = vand.u32 4294901760, %v4735_v53  ;;  %v9858_v62 = vsub.f32 %v4731_v31, %v9846_v45  ;;  %v4948_v22 = vsub.f32 %v9851_v30, %v9881_v5 }
 0x5d0   : > { %v9855_v37 = vpop.eup %8227  ;;  %v4729_v63 = vpop.permute.xlu1 %4728 }
 0x5d1   : > { %v9861_v60 = vsub.f32 %v4735_v53, %v9853_v11  ;;  %v9863_v61 = vand.u32 4294901760, %v4729_v63  ;;  %7851 = vmatprep.subr.mxu0 %v9853_v11  ;;  %v4689_v38 = vsel %vm2747_vm3, %v9855_v37, 0.0  ;;  %v9889_v25 = vand.u32 4294901760, %v9858_v62 }
 0x5d2   : > { %v9868_v21 = vpop.eup %8229  ;;  %4690 = vadd.xlane.f32.xlu1 %v4689_v38  ;;  %7852 = vmatpush3.msra.mxu0 %v9853_v11  ;;  %v4727_v59 = vpop.permute.xlu0 %4726  ;;  %v4949_v17 = vand.u32 4294901760, %v4948_v22 }
 0x5d3   : > { %v9872_v2 = vsub.f32 %v4729_v63, %v9863_v61  ;;  %v9874_v20 = vand.u32 4294901760, %v4727_v59  ;;  %7853 = vmatprep.subr.mxu0 %v9840_v3  ;;  %v9878_v18 = vand.u32 4294901760, %v9861_v60  ;;  %v4695_v47 = vsel %vm2747_vm3, %v9868_v21, 0.0 }
 0x5d4   : > { %v9883_v15 = vpop.eup %8231  ;;  %v4725_v39 = vpop.permute.xlu1 %4724  ;;  %7854 = vmatpush3.msra.mxu0 %v9840_v3  ;;  %v4955_v49 = vsub.f32 %v9858_v62, %v9889_v25 }
 0x5d5   : > { %v9892_v27 = vsub.f32 %v4727_v59, %v9874_v20  ;;  %v9894_v28 = vand.u32 4294901760, %v4725_v39  ;;  %7855 = vmatprep.subr.mxu0 %v9846_v45  ;;  %v4686_v10 = vsel %vm2747_vm3, %v9883_v15, 0.0  ;;  %v4941_v56 = vsub.f32 %v9861_v60, %v9878_v18 }
 0x5d6   : > { %v9901_v55 = vpop.eup %8233  ;;  %4696 = vadd.xlane.f32.xlu1 %v4695_v47  ;;  %4687 = vadd.xlane.f32.xlu0 %v4686_v10  ;;  %v9910_v51 = vand.u32 4294901760, %v9872_v2  ;;  %v4956_v6 = vand.u32 4294901760, %v4955_v49 }
 0x5d7   : > { %v9904_v46 = vsub.f32 %v4725_v39, %v9894_v28  ;;  %7856 = vmatpush3.msra.mxu0 %v9846_v45  ;;  %v4942_v54 = vand.u32 4294901760, %v4941_v56  ;;  %v4701_v41 = vsel %vm2747_vm3, %v9901_v55, 0.0  ;;  %v9923_v48 = vand.u32 4294901760, %v9892_v27 }
 0x5d8   : > { %v9912_v7 = vpop.eup %8235  ;;  %7857 = vmatprep.subr.mxu0 %v9863_v61  ;;  %v4962_v0 = vsub.f32 %v9872_v2, %v9910_v51 }
 0x5d9   : > { %7858 = vmatpush3.msra.mxu0 %v9863_v61  ;;  %7879 = vmatprep.subr.mxu1 %v4942_v54  ;;  %v4692_v44 = vsel %vm2747_vm3, %v9912_v7, 0.0  ;;  %v9930_v9 = vand.u32 4294901760, %v9904_v46  ;;  %v4969_v8 = vsub.f32 %v9892_v27, %v9923_v48 }
 0x5da   : > { %7859 = vmatprep.subr.mxu0 %v9874_v20  ;;  %4702 = vadd.xlane.f32.xlu1 %v4701_v41  ;;  %v4963_v34 = vand.u32 4294901760, %v4962_v0 }
 0x5db   : > { %4693 = vadd.xlane.f32.xlu0 %v4692_v44  ;;  %7860 = vmatpush3.msra.mxu0 %v9874_v20  ;;  %v4976_v58 = vsub.f32 %v9904_v46, %v9930_v9  ;;  %v4970_v16 = vand.u32 4294901760, %v4969_v8 }
 0x5dc   : > { %v9932_v19 = vpop.eup %8237  ;;  %7880 = vmatpush3.msra.mxu1 %v4942_v54  ;;  %7861 = vmatprep.subr.mxu0 %v9894_v28 }
 0x5dd   : > { %7881 = vmatprep.subr.mxu1 %v4949_v17  ;;  %7862 = vmatpush3.msra.mxu0 %v9894_v28  ;;  %v4698_v42 = vsel %vm2747_vm3, %v9932_v19, 0.0  ;;  %v4977_v43 = vand.u32 4294901760, %v4976_v58 }
 0x5de   : > { %7882 = vmatpush3.msra.mxu1 %v4949_v17 }
 0x5df   : > { %7883 = vmatprep.subr.mxu1 %v4956_v6  ;;  %4699 = vadd.xlane.f32.xlu0 %v4698_v42 }
 0x5e0   : > { %7884 = vmatpush3.msra.mxu1 %v4956_v6 }
 0x5e1   : > { %7885 = vmatprep.subr.mxu1 %v4963_v34 }
 0x5e2   : > { %7886 = vmatpush3.msra.mxu1 %v4963_v34 }
 0x5e3   : > { %7887 = vmatprep.subr.mxu1 %v4970_v16 }
 0x5e4   : > { %7888 = vmatpush3.msra.mxu1 %v4970_v16 }
 0x5e5   : > { %7889 = vmatprep.subr.mxu1 %v4977_v43 }
 0x5e6   : > { %7890 = vmatpush3.msra.mxu1 %v4977_v43 }
 0x5eb   : > { %4720 = vrot.lane.b32.xlu1 %v8886_v13, %s8329_s12 }
 0x5f5   : > { %4722 = vrot.lane.b32.xlu0 %v8844_v50, %s8329_s12  ;;  %s6622_s12 = sshll.u32 (%p8423_p7), %s6459_s7, 3 }
 0x5f6   : > { %s6461_s15 = scalar_lea.vmem (%p8423_p7), %s10411_s5, %s6622_s12 }
 0x655   : > { %v4685_v36 = vpop.xlane.xlu1 %4684 }
 0x656   : > { %8239 = vrcp.f32 %v4685_v36 }
 0x657   : > { %v4682_v26 = vpop.xlane.xlu0 %4681 }
 0x658   : > { %8241 = vrcp.f32 %v4682_v26 }
 0x65b   : > { %v4691_v4 = vpop.xlane.xlu1 %4690 }
 0x65c   : > { %8243 = vrcp.f32 %v4691_v4 }
 0x65f   : > { %v4697_v31 = vpop.xlane.xlu1 %4696  ;;  %v4688_v29 = vpop.xlane.xlu0 %4687 }
 0x660   : > { %8245 = vrcp.f32 %v4697_v31 }
 0x661   : > { %8247 = vrcp.f32 %v4688_v29 }
 0x663   : > { %v8240_v35 = vpop.eup %8239  ;;  %v4703_v53 = vpop.xlane.xlu1 %4702 }
 0x664   : > { %v4713_v63 = vmul.f32 %v8240_v35, %v9838_v24  ;;  %8249 = vrcp.f32 %v4703_v53  ;;  %v4694_v38 = vpop.xlane.xlu0 %4693 }
 0x665   : > { %v8242_v13 = vpop.eup %8241  ;;  %8251 = vrcp.f32 %v4694_v38 }
 0x666   : > { %v4748_v50 = vsel %vm2747_vm3, %v4713_v63, 0  ;;  %v4712_v59 = vmul.f32 %v8242_v13, %v9844_v52 }
 0x667   : > { %v9949_v39 = vand.u32 4294901760, %v4748_v50  ;;  %v4721_v47 = vpop.permute.xlu1 %4720 }
 0x668   : > { %v9951_v10 = vand.u32 4294901760, %v4721_v47  ;;  %v4700_v56 = vpop.xlane.xlu0 %4699  ;;  %v4745_v54 = vsel %vm2747_vm3, %v4712_v59, 0 }
 0x669   : > { %v8244_v22 = vpop.eup %8243  ;;  %v9955_v41 = vsub.f32 %v4748_v50, %v9949_v39  ;;  %8253 = vrcp.f32 %v4700_v56  ;;  %v9957_v24 = vand.u32 4294901760, %v4745_v54 }
 0x66a   : > { %v4715_v44 = vmul.f32 %v8244_v22, %v9855_v37  ;;  %v9961_v49 = vsub.f32 %v4721_v47, %v9951_v10 }
 0x66b   : > { %7895 = vmatprep.mubr.f32.mxu1 %v9957_v24  ;;  %v9965_v52 = vsub.f32 %v4745_v54, %v9957_v24  ;;  %v4853_v17 = vand.u32 4294901760, %v9955_v41 }
 0x66c   : > { %v4723_v0 = vpop.permute.xlu0 %4722  ;;  %v4754_v6 = vsel %vm2747_vm3, %v4715_v44, 0  ;;  %v9986_v4 = vand.u32 4294901760, %v9961_v49 }
 0x66d   : > { %v8246_v42 = vpop.eup %8245  ;;  %v9969_v8 = vand.u32 4294901760, %v4723_v0  ;;  %v4843_v34 = vand.u32 4294901760, %v9965_v52  ;;  %v9972_v58 = vand.u32 4294901760, %v4754_v6  ;;  %v4854_v43 = vsub.f32 %v9955_v41, %v4853_v17 }
 0x66e   : > { %v8248_v37 = vpop.eup %8247  ;;  %v4717_v16 = vmul.f32 %v8246_v42, %v9868_v21  ;;  %v4990_v54 = vsub.f32 %v9961_v49, %v9986_v4 }
 0x66f   : > { %v9979_v36 = vsub.f32 %v4723_v0, %v9969_v8  ;;  %7863 = vmatprep.subr.mxu0 %v9969_v8  ;;  %v4844_v26 = vsub.f32 %v9965_v52, %v4843_v34  ;;  %v4714_v31 = vmul.f32 %v8248_v37, %v9883_v15  ;;  %v9991_v21 = vsub.f32 %v4754_v6, %v9972_v58 }
 0x670   : > { %7864 = vmatpush3.msra.mxu0 %v9969_v8  ;;  %v4760_v29 = vsel %vm2747_vm3, %v4717_v16, 0  ;;  %v4855_v15 = vand.u32 4294901760, %v4854_v43 }
 0x671   : > { %v8250_v35 = vpop.eup %8249  ;;  %7865 = vmatprep.subr.mxu0 %v9951_v10  ;;  %v4845_v53 = vand.u32 4294901760, %v4844_v26  ;;  %v9996_v63 = vand.u32 4294901760, %v9979_v36  ;;  %v4751_v38 = vsel %vm2747_vm3, %v4714_v31, 0  ;;  %v10003_v47 = vand.u32 4294901760, %v4760_v29 }
 0x672   : > { %v8252_v13 = vpop.eup %8251  ;;  %v4719_v50 = vmul.f32 %v8250_v35, %v9901_v55  ;;  %7866 = vmatpush3.msra.mxu0 %v9951_v10  ;;  %v10001_v59 = vand.u32 4294901760, %v4751_v38  ;;  %v4873_v44 = vand.u32 4294901760, %v9991_v21  ;;  %v4991_v26 = vand.u32 4294901760, %v4990_v54 }
 0x673   : > { %7907 = vmatprep.subr.mxu0 %v9861_v60  ;;  %7867 = vmatprep.mubr.f32.mxu0 %v4845_v53  ;;  %v4983_v56 = vsub.f32 %v9979_v36, %v9996_v63  ;;  %v4716_v22 = vmul.f32 %v8252_v13, %v9912_v7  ;;  %v10023_v7 = vsub.f32 %v4760_v29, %v10003_v47 }
 0x674   : > { %7868 = vmatmul.mubr.f32.vlgmr.msra.gmra.mxu0 %v4855_v15  ;;  %v10012_v55 = vsub.f32 %v4751_v38, %v10001_v59  ;;  %v4766_v42 = vsel %vm2747_vm3, %v4719_v50, 0  ;;  %v4874_v35 = vsub.f32 %v9991_v21, %v4873_v44 }
 0x675   : > { %7908 = vmatpush3.msra.mxu0 %v9861_v60  ;;  %v4984_v0 = vand.u32 4294901760, %v4983_v56  ;;  %v4757_v6 = vsel %vm2747_vm3, %v4716_v22, 0  ;;  %v10037_v53 = vand.u32 4294901760, %v4766_v42  ;;  %v4893_v13 = vand.u32 4294901760, %v10023_v7 }
 0x676   : > { %v8254_v37 = vpop.eup %8253  ;;  %7909 = vmatprep.subr.mxu0 %v9851_v30  ;;  %v4863_v16 = vand.u32 4294901760, %v10012_v55  ;;  %v10020_v43 = vand.u32 4294901760, %v4757_v6 }
 0x677   : > { %7891 = vmatprep.subr.mxu1 %v4984_v0  ;;  %7910 = vmatpush3.msra.mxu0 %v9851_v30  ;;  %v4718_v60 = vmul.f32 %v8254_v37, %v9932_v19  ;;  %v10056_v54 = vsub.f32 %v4766_v42, %v10037_v53  ;;  %v4894_v22 = vsub.f32 %v10023_v7, %v4893_v13 }
 0x678   : > { %7892 = vmatpush3.msra.mxu1 %v4984_v0  ;;  %7911 = vmatprep.subr.mxu0 %v9858_v62  ;;  %v4864_v31 = vsub.f32 %v10012_v55, %v4863_v16  ;;  %v10035_v29 = vsub.f32 %v4757_v6, %v10020_v43 }
 0x679   : > { %7893 = vmatprep.subr.mxu1 %v4991_v26  ;;  %7912 = vmatpush3.msra.mxu0 %v9858_v62  ;;  %v4763_v30 = vsel %vm2747_vm3, %v4718_v60, 0  ;;  %v4875_v62 = vand.u32 4294901760, %v4874_v35  ;;  %v4913_v42 = vand.u32 4294901760, %v10056_v54 }
 0x67a   : > { %7894 = vmatpush3.msra.mxu1 %v4991_v26  ;;  %7913 = vmatprep.subr.mxu0 %v9872_v2  ;;  %v4865_v19 = vand.u32 4294901760, %v4864_v31  ;;  %v4883_v38 = vand.u32 4294901760, %v10035_v29  ;;  %v10044_v50 = vand.u32 4294901760, %v4763_v30 }
 0x67b   : > { %7896 = vmatmul.mubr.f32.vlgmr.msra.gmra.mxu1 %v9949_v39  ;;  %7914 = vmatpush3.msra.mxu0 %v9872_v2  ;;  %v4914_v26 = vsub.f32 %v10056_v54, %v4913_v42 }
 0x67c   : > { %7935 = vmatprep.subr.mxu1 %v9853_v11  ;;  %7870 = vmatprep.mubr.f32.mxu0 %v4865_v19  ;;  %v4884_v15 = vsub.f32 %v10035_v29, %v4883_v38  ;;  %v10053_v56 = vsub.f32 %v4763_v30, %v10044_v50 }
 0x67d   : > { %7898 = vmatprep.mubr.f32.mxu1 %v10001_v59  ;;  %7915 = vmatprep.subr.mxu0 %v9892_v27 }
 0x67e   : > { %7936 = vmatpush3.msra.mxu1 %v9853_v11  ;;  %7871 = vmatmul.mubr.f32.gmra.mxu0 %v4875_v62  ;;  %v4885_v2 = vand.u32 4294901760, %v4884_v15  ;;  %v4903_v0 = vand.u32 4294901760, %v10053_v56 }
 0x67f   : > { %7916 = vmatpush3.msra.mxu0 %v9892_v27  ;;  %7937 = vmatprep.subr.mxu1 %v9840_v3  ;;  %v4895_v27 = vand.u32 4294901760, %v4894_v22 }
 0x680   : > { %7917 = vmatprep.subr.mxu0 %v9904_v46  ;;  %7938 = vmatpush3.msra.mxu1 %v9840_v3  ;;  %v4904_v6 = vsub.f32 %v10053_v56, %v4903_v0 }
 0x681   : > { %7899 = vmatmul.mubr.f32.gmra.mxu1 %v9972_v58  ;;  %7918 = vmatpush3.msra.mxu0 %v9904_v46  ;;  %v4915_v46 = vand.u32 4294901760, %v4914_v26 }
 0x682   : > { %7939 = vmatprep.subr.mxu1 %v9846_v45  ;;  %7873 = vmatprep.mubr.f32.mxu0 %v4885_v2  ;;  %v4905_v37 = vand.u32 4294901760, %v4904_v6 }
 0x683   : > { %7901 = vmatprep.mubr.f32.mxu1 %v10020_v43  ;;  %7919 = vmatprep.subr.mxu0 %v9979_v36 }
 0x684   : > { %7940 = vmatpush3.msra.mxu1 %v9846_v45  ;;  %7874 = vmatmul.mubr.f32.gmra.mxu0 %v4895_v27 }
 0x685   : > { %7920 = vmatpush3.msra.mxu0 %v9979_v36  ;;  %7941 = vmatprep.subr.mxu1 %v9863_v61 }
 0x686   : > { %7921 = vmatprep.subr.mxu0 %v9961_v49  ;;  %7942 = vmatpush3.msra.mxu1 %v9863_v61 }
 0x687   : > { %7902 = vmatmul.mubr.f32.gmra.mxu1 %v10003_v47  ;;  %7922 = vmatpush3.msra.mxu0 %v9961_v49 }
 0x688   : > { %7943 = vmatprep.subr.mxu1 %v9874_v20  ;;  %7876 = vmatprep.mubr.f32.mxu0 %v4905_v37 }
 0x689   : > { %7904 = vmatprep.mubr.f32.mxu1 %v10044_v50  ;;  %7944 = vmatpush3.msra.mxu1 %v9874_v20 }
 0x68a   : > { %7963 = vmatprep.subr.mxu0 %v9878_v18  ;;  %7877 = vmatmul.mubr.f32.gmra.mxu0 %v4915_v46 }
 0x68b   : > { %7945 = vmatprep.subr.mxu1 %v9894_v28  ;;  %7923 = vmatprep.mubr.f32.mxu0 %v9965_v52 }
 0x68c   : > { %7946 = vmatpush3.msra.mxu1 %v9894_v28 }
 0x68d   : > { %7905 = vmatmul.mubr.f32.gmra.mxu1 %v10037_v53  ;;  %7947 = vmatprep.subr.mxu1 %v9969_v8 }
 0x68e   : > { %7948 = vmatpush3.msra.mxu1 %v9969_v8  ;;  %7951 = vmatprep.mubr.f32.mxu1 %v4843_v34 }
 0x68f   : > { %7924 = vmatmul.mubr.f32.vlgmr.msra.gmra.mxu0 %v9955_v41  ;;  %7949 = vmatprep.subr.mxu1 %v9951_v10 }
 0x690   : > { %7964 = vmatpush3.msra.mxu0 %v9878_v18  ;;  %7926 = vmatprep.mubr.f32.mxu0 %v10012_v55 }
 0x691   : > { %7950 = vmatpush3.msra.mxu1 %v9951_v10  ;;  %7965 = vmatprep.subr.mxu0 %v9881_v5 }
 0x692   : > { %7952 = vmatmul.mubr.f32.vlgmr.msra.gmra.mxu1 %v4853_v17  ;;  %7966 = vmatpush3.msra.mxu0 %v9881_v5 }
 0x693   : > { %7991 = vmatprep.subr.mxu1 %v9853_v11  ;;  %7954 = vmatprep.mubr.f32.mxu1 %v4863_v16 }
 0x694   : > { %7967 = vmatprep.subr.mxu0 %v9889_v25  ;;  %7992 = vmatpush3.msra.mxu1 %v9853_v11 }
 0x695   : > { %7927 = vmatmul.mubr.f32.gmra.mxu0 %v9991_v21  ;;  %7993 = vmatprep.subr.mxu1 %v9840_v3 }
 0x696   : > { %7968 = vmatpush3.msra.mxu0 %v9889_v25  ;;  %7929 = vmatprep.mubr.f32.mxu0 %v10035_v29 }
 0x697   : > { %7969 = vmatprep.subr.mxu0 %v9910_v51  ;;  %7994 = vmatpush3.msra.mxu1 %v9840_v3  ;;  %v5647_v3 = vld [vmem:[%s10409_s3 + $0x8] sm:$0xff] }
 0x698   : > { %7955 = vmatmul.mubr.f32.gmra.mxu1 %v4873_v44  ;;  %7970 = vmatpush3.msra.mxu0 %v9910_v51 }
 0x699   : > { %7995 = vmatprep.subr.mxu1 %v9846_v45  ;;  %7957 = vmatprep.mubr.f32.mxu1 %v4883_v38 }
 0x69a   : > { %7971 = vmatprep.subr.mxu0 %v9923_v48  ;;  %7996 = vmatpush3.msra.mxu1 %v9846_v45  ;;  %v10173_v45 = vand.u32 4294901760, %v5647_v3 }
 0x69b   : > { %7930 = vmatmul.mubr.f32.gmra.mxu0 %v10023_v7  ;;  %7997 = vmatprep.subr.mxu1 %v9863_v61 }
 0x69c   : > { %7972 = vmatpush3.msra.mxu0 %v9923_v48  ;;  %7932 = vmatprep.mubr.f32.mxu0 %v10053_v56 }
 0x69d   : > { %7973 = vmatprep.subr.mxu0 %v9930_v9  ;;  %7998 = vmatpush3.msra.mxu1 %v9863_v61 }
 0x69e   : > { %7958 = vmatmul.mubr.f32.gmra.mxu1 %v4893_v13  ;;  %7974 = vmatpush3.msra.mxu0 %v9930_v9 }
 0x69f   : > { %7999 = vmatprep.subr.mxu1 %v9874_v20  ;;  %7960 = vmatprep.mubr.f32.mxu1 %v4903_v0 }
 0x6a0   : > { %7975 = vmatprep.subr.mxu0 %v9996_v63  ;;  %8000 = vmatpush3.msra.mxu1 %v9874_v20 }
 0x6a1   : > { %7933 = vmatmul.mubr.f32.gmra.mxu0 %v10056_v54  ;;  %8001 = vmatprep.subr.mxu1 %v9894_v28 }
 0x6a2   : > { %7976 = vmatpush3.msra.mxu0 %v9996_v63  ;;  %7979 = vmatprep.mubr.f32.mxu0 %v9957_v24  ;;  %v5646_v63 = vld [vmem:[%s10409_s3] sm:$0xff] }
 0x6a3   : > { %7977 = vmatprep.subr.mxu0 %v9986_v4  ;;  %8002 = vmatpush3.msra.mxu1 %v9894_v28  ;;  %v10187_v55 = vand.u32 4294901760, %v5646_v63 }
 0x6a4   : > { %7961 = vmatmul.mubr.f32.gmra.mxu1 %v4913_v42  ;;  %7978 = vmatpush3.msra.mxu0 %v9986_v4 }
 0x6a5   : > { %8003 = vmatprep.subr.mxu1 %v9969_v8  ;;  %8007 = vmatprep.mubr.f32.mxu1 %v9957_v24 }
 0x6a6   : > { %8004 = vmatpush3.msra.mxu1 %v9969_v8  ;;  %7980 = vmatmul.mubr.f32.vlgmr.msra.gmra.mxu0 %v9949_v39 }
 0x6a7   : > { %8005 = vmatprep.subr.mxu1 %v9951_v10  ;;  %7982 = vmatprep.mubr.f32.mxu0 %v10001_v59 }
 0x6a8   : > { %8006 = vmatpush3.msra.mxu1 %v9951_v10  ;;  %8019 = vmatprep.subr.mxu0 %v10173_v45 }
 0x6a9   : > { %8008 = vmatmul.mubr.f32.vlgmr.msra.gmra.mxu1 %v9949_v39  ;;  %8020 = vmatpush3.msra.mxu0 %v10173_v45 }
 0x6aa   : > { %8010 = vmatprep.mubr.f32.mxu1 %v10001_v59  ;;  %7983 = vmatmul.mubr.f32.gmra.mxu0 %v9972_v58 }
 0x6ab   : > { %7985 = vmatprep.mubr.f32.mxu0 %v10020_v43  ;;  %8021 = vmatprep.subr.mxu0 %v10187_v55 }
 0x6ac   : > { %8022 = vmatpush3.msra.mxu0 %v10187_v55 }
 0x6ad   : > { %8011 = vmatmul.mubr.f32.gmra.mxu1 %v9972_v58 }
 0x6ae   : > { %8013 = vmatprep.mubr.f32.mxu1 %v10020_v43  ;;  %7986 = vmatmul.mubr.f32.gmra.mxu0 %v10003_v47  ;;  %v10193_v43 = vsub.f32 %v5646_v63, %v10187_v55 }
 0x6af   : > { %7988 = vmatprep.mubr.f32.mxu0 %v10044_v50 }
 0x6b0   : > { %v10200_v35 = vand.u32 4294901760, %v10193_v43 }
 0x6b1   : > { %8014 = vmatmul.mubr.f32.gmra.mxu1 %v10003_v47  ;;  %v10185_v47 = vsub.f32 %v5647_v3, %v10173_v45 }
 0x6b2   : > { %8016 = vmatprep.mubr.f32.mxu1 %v10044_v50  ;;  %7989 = vmatmul.mubr.f32.gmra.mxu0 %v10037_v53  ;;  %v5866_v19 = vsub.f32 %v10193_v43, %v10200_v35 }
 0x6b3   : > { %v10190_v16 = vand.u32 4294901760, %v10185_v47  ;;  %8051 = vmatprep.subr.mxu0 %v10185_v47 }
 0x6b4   : > { %v5867_v62 = vand.u32 4294901760, %v5866_v19 }
 0x6b5   : > { %8017 = vmatmul.mubr.f32.gmra.mxu1 %v10037_v53  ;;  %v5859_v31 = vsub.f32 %v10185_v47, %v10190_v16 }
 0x6b7   : > { %v5860_v30 = vand.u32 4294901760, %v5859_v31 }
 0x6b9   : > { %8035 = vmatprep.subr.mxu1 %v5860_v30 }
 0x6ba   : > { %8036 = vmatpush3.msra.mxu1 %v5860_v30 }
 0x6bb   : > { %8037 = vmatprep.subr.mxu1 %v5867_v62 }
 0x6bc   : > { %8038 = vmatpush3.msra.mxu1 %v5867_v62 }
 0x6bd   : > { %8067 = vmatprep.subr.mxu1 %v10173_v45 }
 0x734   : > { %v7869_v11 = vpop.f32.mrf.mxu0 }
 0x736   : > { %v4847_v20 = vpop.f32.mrf.mxu0 }
 0x73b   : > { %v7897_v61 = vpop.f32.mrf.mxu1 }
 0x73c   : > { %v5035_v29 = vadd.f32 %v7897_v61, %v7869_v11 }
 0x73d   : > { %v5028_v18 = vpop.f32.mrf.mxu1 }
 0x73e   : > { %v7872_v5 = vpop.f32.mrf.mxu0  ;;  %v5029_v38 = vadd.f32 %v5028_v18, %v4847_v20 }
 0x740   : > { %v4867_v25 = vpop.f32.mrf.mxu0 }
 0x741   : > { %v7900_v28 = vpop.f32.mrf.mxu1 }
 0x742   : > { %v5047_v15 = vadd.f32 %v7900_v28, %v7872_v5 }
 0x743   : > { %v5040_v51 = vpop.f32.mrf.mxu1 }
 0x744   : > { %v7875_v48 = vpop.f32.mrf.mxu0  ;;  %v5041_v22 = vadd.f32 %v5040_v51, %v4867_v25 }
 0x746   : > { %v4887_v9 = vpop.f32.mrf.mxu0 }
 0x747   : > { %v7903_v39 = vpop.f32.mrf.mxu1 }
 0x748   : > { %v5059_v37 = vadd.f32 %v7903_v39, %v7875_v48 }
 0x749   : > { %v5052_v10 = vpop.f32.mrf.mxu1 }
 0x74a   : > { %v7878_v41 = vpop.f32.mrf.mxu0  ;;  %v5053_v61 = vadd.f32 %v5052_v10, %v4887_v9 }
 0x74c   : > { %v10177_v24 = vpop.f32.mrf.mxu0 }
 0x74d   : > { %v7906_v49 = vpop.f32.mrf.mxu1 }
 0x74e   : > { %v5071_v25 = vadd.f32 %v7906_v49, %v7878_v41 }
 0x74f   : > { %v10179_v52 = vpop.f32.mrf.mxu1  ;;  %v7925_v17 = vpop.f32.mrf.mxu0 }
 0x750   : > { %v5166_v13 = vadd.f32 %v7925_v17, %v5035_v29  ;;  %v5065_v39 = vadd.f32 %v10179_v52, %v10177_v24 }
 0x751   : > { %v5158_v8 = vpop.f32.mrf.mxu0 }
 0x752   : > { %v7953_v34 = vpop.f32.mrf.mxu1  ;;  %v5159_v56 = vadd.f32 %v5158_v8, %v5029_v38 }
 0x753   : > { %v5297_v0 = vadd.f32 %v7953_v34, %v5166_v13 }
 0x754   : > { %v5288_v58 = vpop.f32.mrf.mxu1 }
 0x755   : > { %v7928_v36 = vpop.f32.mrf.mxu0  ;;  %v5289_v26 = vadd.f32 %v5288_v58, %v5159_v56 }
 0x756   : > { %v5180_v6 = vadd.f32 %v7928_v36, %v5047_v15 }
 0x757   : > { %v5172_v4 = vpop.f32.mrf.mxu0 }
 0x758   : > { %v7956_v21 = vpop.f32.mrf.mxu1  ;;  %v5173_v46 = vadd.f32 %v5172_v4, %v5041_v22 }
 0x759   : > { %v5313_v20 = vadd.f32 %v7956_v21, %v5180_v6 }
 0x75a   : > { %v5304_v59 = vpop.f32.mrf.mxu1 }
 0x75b   : > { %v7931_v44 = vpop.f32.mrf.mxu0  ;;  %v5305_v51 = vadd.f32 %v5304_v59, %v5173_v46 }
 0x75c   : > { %v5194_v18 = vadd.f32 %v7931_v44, %v5059_v37 }
 0x75d   : > { %v5186_v7 = vpop.f32.mrf.mxu0 }
 0x75e   : > { %v7959_v60 = vpop.f32.mrf.mxu1  ;;  %v5187_v34 = vadd.f32 %v5186_v7, %v5053_v61 }
 0x75f   : > { %v5329_v9 = vadd.f32 %v7959_v60, %v5194_v18 }
 0x760   : > { %v5320_v53 = vpop.f32.mrf.mxu1 }
 0x761   : > { %v7934_v50 = vpop.f32.mrf.mxu0  ;;  %v5321_v49 = vadd.f32 %v5320_v53, %v5187_v34 }
 0x762   : > { %v5208_v10 = vadd.f32 %v7934_v50, %v5071_v25 }
 0x763   : > { %v5200_v54 = vpop.f32.mrf.mxu0 }
 0x764   : > { %v7962_v2 = vpop.f32.mrf.mxu1  ;;  %v5201_v59 = vadd.f32 %v5200_v54, %v5065_v39 }
 0x765   : > { %v5345_v19 = vadd.f32 %v7962_v2, %v5208_v10 }
 0x766   : > { %v5336_v42 = vpop.f32.mrf.mxu1  ;;  %v7981_v27 = vpop.f32.mrf.mxu0 }
 0x767   : > { %v5446_v3 = vadd.f32 %v7981_v27, %v5297_v0  ;;  %v5337_v60 = vadd.f32 %v5336_v42, %v5201_v59 }
 0x768   : > { %v5439_v11 = vpop.f32.mrf.mxu0 }
 0x769   : > { %v5440_v5 = vadd.f32 %v5439_v11, %v5289_v26  ;;  %v8009_v28 = vpop.f32.mrf.mxu1 }
 0x76a   : > { %v5567_v17 = vadd.f32 %v8009_v28, %v5446_v3  ;;  %v7984_v8 = vpop.f32.mrf.mxu0 }
 0x76b   : > { %v5458_v36 = vadd.f32 %v7984_v8, %v5313_v20  ;;  %v5560_v63 = vpop.f32.mrf.mxu1 }
 0x76c   : > { %v5561_v31 = vadd.f32 %v5560_v63, %v5440_v5  ;;  %5616 = vrot.lane.b32.xlu1 %v5567_v17, %s8330_s17  ;;  %v5451_v48 = vpop.f32.mrf.mxu0 }
 0x76d   : > { %v5452_v58 = vadd.f32 %v5451_v48, %v5305_v51  ;;  %v8012_v4 = vpop.f32.mrf.mxu1 }
 0x76e   : > { %v5579_v21 = vadd.f32 %v8012_v4, %v5458_v36  ;;  %5614 = vrot.lane.b32.xlu0 %v5561_v31, %s8330_s17  ;;  %v7987_v41 = vpop.f32.mrf.mxu0 }
 0x76f   : > { %v5470_v44 = vadd.f32 %v7987_v41, %v5329_v9  ;;  %v5572_v7 = vpop.f32.mrf.mxu1 }
 0x770   : > { %v5573_v29 = vadd.f32 %v5572_v7, %v5452_v58  ;;  %5620 = vrot.lane.b32.xlu1 %v5579_v21, %s8330_s17  ;;  %v5463_v30 = vpop.f32.mrf.mxu0 }
 0x771   : > { %v5464_v38 = vadd.f32 %v5463_v30, %v5321_v49  ;;  %v8015_v13 = vpop.f32.mrf.mxu1 }
 0x772   : > { %v5591_v24 = vadd.f32 %v8015_v13, %v5470_v44  ;;  %5618 = vrot.lane.b32.xlu0 %v5573_v29, %s8330_s17  ;;  %v7990_v52 = vpop.f32.mrf.mxu0 }
 0x773   : > { %v5482_v50 = vadd.f32 %v7990_v52, %v5345_v19  ;;  %v5584_v62 = vpop.f32.mrf.mxu1 }
 0x774   : > { %v5585_v15 = vadd.f32 %v5584_v62, %v5464_v38  ;;  %5624 = vrot.lane.b32.xlu1 %v5591_v24, %s8330_s17  ;;  %v5475_v53 = vpop.f32.mrf.mxu0 }
 0x775   : > { %v5476_v56 = vadd.f32 %v5475_v53, %v5337_v60  ;;  %v8018_v54 = vpop.f32.mrf.mxu1 }
 0x776   : > { %v5603_v22 = vadd.f32 %v8018_v54, %v5482_v50  ;;  %5622 = vrot.lane.b32.xlu0 %v5585_v15, %s8330_s17 }
 0x777   : > { %v5596_v0 = vpop.f32.mrf.mxu1 }
 0x778   : > { %v5597_v2 = vadd.f32 %v5596_v0, %v5476_v56  ;;  %5628 = vrot.lane.b32.xlu1 %v5603_v22, %s8330_s17 }
 0x77a   : > { %5626 = vrot.lane.b32.xlu0 %v5597_v2, %s8330_s17 }
 0x7de   : > { %v5617_v6 = vpop.permute.xlu1 %5616 }
 0x7df   : > { %v5639_v42 = vsel %vm1852_vm2, %v9798_v57, %v5617_v6 }
 0x7e0   : > { %v5660_v27 = vsel %vm5655_vm4, %v5639_v42, 0  ;;  %v5615_v37 = vpop.permute.xlu0 %5614 }
 0x7e1   : > { %v10219_v26 = vand.u32 4294901760, %v5660_v27  ;;  %v5638_v46 = vsel %vm1852_vm2, %v9800_v12, %v5615_v37 }
 0x7e2   : > { %v5657_v3 = vsel %vm5655_vm4, %v5638_v46, 0  ;;  %v5621_v11 = vpop.permute.xlu1 %5620 }
 0x7e3   : > { %v10225_v61 = vsub.f32 %v5660_v27, %v10219_v26  ;;  %v10227_v20 = vand.u32 4294901760, %v5657_v3  ;;  %v5641_v18 = vsel %vm1852_vm2, %v9802_v23, %v5621_v11 }
 0x7e4   : > { %v5666_v57 = vsel %vm5655_vm4, %v5641_v18, 0  ;;  %v5619_v5 = vpop.permute.xlu0 %5618 }
 0x7e5   : > { %v5759_v28 = vand.u32 4294901760, %v10225_v61  ;;  %v10234_v17 = vsub.f32 %v5657_v3, %v10227_v20  ;;  %v10236_v12 = vand.u32 4294901760, %v5666_v57  ;;  %v5640_v8 = vsel %vm1852_vm2, %v9804_v40, %v5619_v5  ;;  %8039 = vmatprep.mubr.f32.mxu1 %v10227_v20 }
 0x7e6   : > { %v5663_v25 = vsel %vm5655_vm4, %v5640_v8, 0  ;;  %v5625_v51 = vpop.permute.xlu1 %5624  ;;  %8040 = vmatmul.mubr.f32.vlgmr.msra.gmra.mxu1 %v10219_v26 }
 0x7e7   : > { %v5760_v23 = vsub.f32 %v10225_v61, %v5759_v28  ;;  %v10247_v34 = vsub.f32 %v5666_v57, %v10236_v12  ;;  %v10249_v36 = vand.u32 4294901760, %v5663_v25  ;;  %v5643_v63 = vsel %vm1852_vm2, %v9806_v33, %v5625_v51  ;;  %8068 = vmatpush3.msra.mxu1 %v10173_v45 }
 0x7e8   : > { %v5672_v40 = vsel %vm5655_vm4, %v5643_v63, 0  ;;  %v5623_v31 = vpop.permute.xlu0 %5622  ;;  %v5749_v48 = vand.u32 4294901760, %v10234_v17  ;;  %8069 = vmatprep.subr.mxu1 %v10187_v55  ;;  %v6617_v63 = vld [vmem:[%s10410_s4] ss:$0 sm:$0xff] }
 0x7e9   : > { %v5779_v39 = vand.u32 4294901760, %v10247_v34  ;;  %v10259_v9 = vsub.f32 %v5663_v25, %v10249_v36  ;;  %v10261_v10 = vand.u32 4294901760, %v5672_v40  ;;  %8042 = vmatprep.mubr.f32.mxu1 %v10249_v36  ;;  %8070 = vmatpush3.msra.mxu1 %v10187_v55  ;;  %v5761_v33 = vand.u32 4294901760, %v5760_v23 }
 0x7ea   : > { %v5642_v58 = vsel %vm1852_vm2, %v9808_v32, %v5623_v31  ;;  %v5629_v4 = vpop.permute.xlu1 %5628  ;;  %8043 = vmatmul.mubr.f32.gmra.mxu1 %v10236_v12  ;;  %v5750_v21 = vsub.f32 %v10234_v17, %v5749_v48  ;;  %8099 = vmatprep.subr.mxu1 %v10173_v45 }
 0x7eb   : > { %v10271_v41 = vsub.f32 %v5672_v40, %v10261_v10  ;;  %v5669_v49 = vsel %vm5655_vm4, %v5642_v58, 0  ;;  %v5645_v59 = vsel %vm1852_vm2, %v9810_v1, %v5629_v4  ;;  %v5769_v44 = vand.u32 4294901760, %v10259_v9 }
 0x7ec   : > { %v10277_v7 = vand.u32 4294901760, %v5669_v49  ;;  %v5678_v32 = vsel %vm5655_vm4, %v5645_v59, 0  ;;  %v5627_v29 = vpop.permute.xlu0 %5626  ;;  %v5751_v30 = vand.u32 4294901760, %v5750_v21  ;;  %v5780_v19 = vsub.f32 %v10247_v34, %v5779_v39 }
 0x7ed   : > { %v5799_v38 = vand.u32 4294901760, %v10271_v41  ;;  %v10284_v13 = vand.u32 4294901760, %v5678_v32  ;;  %v5644_v24 = vsel %vm1852_vm2, %v9812_v14, %v5627_v29  ;;  %v5770_v1 = vsub.f32 %v10259_v9, %v5769_v44 }
 0x7ee   : > { %v5788_v52 = vsub.f32 %v5669_v49, %v10277_v7  ;;  %v5675_v60 = vsel %vm5655_vm4, %v5644_v24, 0  ;;  %8023 = vmatprep.mubr.f32.mxu0 %v5751_v30  ;;  %8045 = vmatprep.mubr.f32.mxu1 %v10277_v7  ;;  %v5781_v54 = vand.u32 4294901760, %v5780_v19 }
 0x7ef   : > { %v5818_v50 = vsub.f32 %v5678_v32, %v10284_v13  ;;  %v10293_v62 = vand.u32 4294901760, %v5675_v60  ;;  %8024 = vmatmul.mubr.f32.vlgmr.msra.gmra.mxu0 %v5761_v33  ;;  %8046 = vmatmul.mubr.f32.gmra.mxu1 %v10261_v10  ;;  %v5771_v15 = vand.u32 4294901760, %v5770_v1  ;;  %v5800_v22 = vsub.f32 %v10271_v41, %v5799_v38 }
 0x7f0   : > { %8052 = vmatpush3.msra.mxu0 %v10185_v47  ;;  %v5789_v14 = vand.u32 4294901760, %v5788_v52 }
 0x7f1   : > { %v5819_v53 = vand.u32 4294901760, %v5818_v50  ;;  %v5808_v56 = vsub.f32 %v5675_v60, %v10293_v62  ;;  %8026 = vmatprep.mubr.f32.mxu0 %v5771_v15  ;;  %8048 = vmatprep.mubr.f32.mxu1 %v10293_v62  ;;  %v5801_v47 = vand.u32 4294901760, %v5800_v22 }
 0x7f2   : > { %v5790_v0 = vsub.f32 %v5788_v52, %v5789_v14  ;;  %8053 = vmatprep.subr.mxu0 %v10193_v43 }
 0x7f3   : > { %8027 = vmatmul.mubr.f32.gmra.mxu0 %v5781_v54  ;;  %8049 = vmatmul.mubr.f32.gmra.mxu1 %v10284_v13  ;;  %v5809_v2 = vand.u32 4294901760, %v5808_v56  ;;  %v5820_v27 = vsub.f32 %v5818_v50, %v5819_v53 }
 0x7f4   : > { %8071 = vmatprep.mubr.f32.mxu1 %v5749_v48  ;;  %v5791_v6 = vand.u32 4294901760, %v5790_v0  ;;  %8054 = vmatpush3.msra.mxu0 %v10193_v43 }
 0x7f5   : > { %v5810_v42 = vsub.f32 %v5808_v56, %v5809_v2  ;;  %8083 = vmatprep.subr.mxu0 %v10190_v16  ;;  %v5821_v46 = vand.u32 4294901760, %v5820_v27 }
 0x7f6   : > { %8029 = vmatprep.mubr.f32.mxu0 %v5791_v6 }
 0x7f7   : > { %8030 = vmatmul.mubr.f32.gmra.mxu0 %v5801_v47  ;;  %8072 = vmatmul.mubr.f32.vlgmr.msra.gmra.mxu1 %v5759_v28  ;;  %v5811_v37 = vand.u32 4294901760, %v5810_v42 }
 0x7f8   : > { %8074 = vmatprep.mubr.f32.mxu1 %v5769_v44  ;;  %8100 = vmatpush3.msra.mxu1 %v10173_v45 }
 0x7f9   : > { %8032 = vmatprep.mubr.f32.mxu0 %v5811_v37  ;;  %8101 = vmatprep.subr.mxu1 %v10187_v55 }
 0x7fa   : > { %8102 = vmatpush3.msra.mxu1 %v10187_v55 }
 0x7fb   : > { %8033 = vmatmul.mubr.f32.gmra.mxu0 %v5821_v46  ;;  %8075 = vmatmul.mubr.f32.gmra.mxu1 %v5779_v39 }
 0x7fc   : > { %8055 = vmatprep.mubr.f32.mxu0 %v10234_v17  ;;  %8077 = vmatprep.mubr.f32.mxu1 %v5789_v14 }
 0x7ff   : > { %8056 = vmatmul.mubr.f32.vlgmr.msra.gmra.mxu0 %v10225_v61  ;;  %8078 = vmatmul.mubr.f32.gmra.mxu1 %v5799_v38 }
 0x800   : > { %8058 = vmatprep.mubr.f32.mxu0 %v10259_v9  ;;  %8080 = vmatprep.mubr.f32.mxu1 %v5809_v2 }
 0x801   : > { %8084 = vmatpush3.msra.mxu0 %v10190_v16 }
 0x802   : > { %8085 = vmatprep.subr.mxu0 %v10200_v35 }
 0x803   : > { %8059 = vmatmul.mubr.f32.gmra.mxu0 %v10247_v34  ;;  %8081 = vmatmul.mubr.f32.gmra.mxu1 %v5819_v53 }
 0x804   : > { %8061 = vmatprep.mubr.f32.mxu0 %v5788_v52  ;;  %8103 = vmatprep.mubr.f32.mxu1 %v10227_v20 }
 0x805   : > { %8086 = vmatpush3.msra.mxu0 %v10200_v35 }
 0x807   : > { %8062 = vmatmul.mubr.f32.gmra.mxu0 %v10271_v41  ;;  %8104 = vmatmul.mubr.f32.vlgmr.msra.gmra.mxu1 %v10219_v26 }
 0x808   : > { %8064 = vmatprep.mubr.f32.mxu0 %v5808_v56  ;;  %8106 = vmatprep.mubr.f32.mxu1 %v10249_v36 }
 0x80b   : > { %8065 = vmatmul.mubr.f32.gmra.mxu0 %v5818_v50  ;;  %8107 = vmatmul.mubr.f32.gmra.mxu1 %v10236_v12 }
 0x80c   : > { %8087 = vmatprep.mubr.f32.mxu0 %v10227_v20  ;;  %8109 = vmatprep.mubr.f32.mxu1 %v10277_v7 }
 0x80f   : > { %8088 = vmatmul.mubr.f32.vlgmr.msra.gmra.mxu0 %v10219_v26  ;;  %8110 = vmatmul.mubr.f32.gmra.mxu1 %v10261_v10 }
 0x810   : > { %8090 = vmatprep.mubr.f32.mxu0 %v10249_v36  ;;  %8112 = vmatprep.mubr.f32.mxu1 %v10293_v62 }
 0x813   : > { %8091 = vmatmul.mubr.f32.gmra.mxu0 %v10236_v12  ;;  %8113 = vmatmul.mubr.f32.gmra.mxu1 %v10284_v13 }
 0x814   : > { %8093 = vmatprep.mubr.f32.mxu0 %v10277_v7 }
 0x817   : > { %8094 = vmatmul.mubr.f32.gmra.mxu0 %v10261_v10 }
 0x818   : > { %8096 = vmatprep.mubr.f32.mxu0 %v10293_v62 }
 0x81b   : > { %8097 = vmatmul.mubr.f32.gmra.mxu0 %v10284_v13 }
 0x8a6   : > { %v8041_v45 = vpop.f32.mrf.mxu1 }
 0x8a8   : > { %v5904_v55 = vpop.f32.mrf.mxu1 }
 0x8aa   : > { %v8044_v16 = vpop.f32.mrf.mxu1 }
 0x8ac   : > { %v5916_v43 = vpop.f32.mrf.mxu1 }
 0x8af   : > { %v8025_v35 = vpop.f32.mrf.mxu0  ;;  %v8047_v26 = vpop.f32.mrf.mxu1 }
 0x8b0   : > { %v5764_v9 = vadd.f32 %v8025_v35, %v6617_v63 }
 0x8b1   : > { %v5753_v3 = vpop.f32.mrf.mxu0  ;;  %v5928_v11 = vpop.f32.mrf.mxu1 }
 0x8b2   : > { %v5754_v58 = vadd.f32 %v6617_v63, %v5753_v3  ;;  %v5911_v49 = vadd.f32 %v8041_v45, %v5764_v9 }
 0x8b3   : > { %v8028_v61 = vpop.f32.mrf.mxu0  ;;  %v8050_v20 = vpop.f32.mrf.mxu1 }
 0x8b4   : > { %v5784_v41 = vadd.f32 %v8028_v61, %v6617_v63  ;;  %v5905_v29 = vadd.f32 %v5904_v55, %v5754_v58 }
 0x8b5   : > { %v5773_v18 = vpop.f32.mrf.mxu0  ;;  %v5940_v57 = vpop.f32.mrf.mxu1 }
 0x8b6   : > { %v5774_v7 = vadd.f32 %v6617_v63, %v5773_v18  ;;  %v5923_v24 = vadd.f32 %v8044_v16, %v5784_v41 }
 0x8b7   : > { %v8031_v5 = vpop.f32.mrf.mxu0  ;;  %v8073_v28 = vpop.f32.mrf.mxu1 }
 0x8b8   : > { %v5804_v38 = vadd.f32 %v8031_v5, %v6617_v63  ;;  %v5917_v50 = vadd.f32 %v5916_v43, %v5774_v7 }
 0x8b9   : > { %v5793_v17 = vpop.f32.mrf.mxu0  ;;  %v6146_v12 = vpop.f32.mrf.mxu1 }
 0x8ba   : > { %v5794_v1 = vadd.f32 %v6617_v63, %v5793_v17  ;;  %v5935_v54 = vadd.f32 %v8047_v26, %v5804_v38 }
 0x8bb   : > { %v8034_v8 = vpop.f32.mrf.mxu0  ;;  %v8076_v25 = vpop.f32.mrf.mxu1 }
 0x8bc   : > { %v5824_v15 = vadd.f32 %v8034_v8, %v6617_v63  ;;  %v5929_v6 = vadd.f32 %v5928_v11, %v5794_v1 }
 0x8bd   : > { %v5813_v51 = vpop.f32.mrf.mxu0  ;;  %v6162_v23 = vpop.f32.mrf.mxu1 }
 0x8be   : > { %v5814_v2 = vadd.f32 %v6617_v63, %v5813_v51  ;;  %v5947_v45 = vadd.f32 %v8050_v20, %v5824_v15 }
 0x8bf   : > { %v8057_v34 = vpop.f32.mrf.mxu0  ;;  %v8079_v36 = vpop.f32.mrf.mxu1 }
 0x8c0   : > { %v6030_v32 = vadd.f32 %v8057_v34, %v5911_v49  ;;  %v5941_v11 = vadd.f32 %v5940_v57, %v5814_v2 }
 0x8c1   : > { %v6022_v40 = vpop.f32.mrf.mxu0  ;;  %v6178_v31 = vpop.f32.mrf.mxu1 }
 0x8c2   : > { %v6023_v13 = vadd.f32 %v6022_v40, %v5905_v29  ;;  %v6155_v62 = vadd.f32 %v8073_v28, %v6030_v32 }
 0x8c3   : > { %v8060_v48 = vpop.f32.mrf.mxu0  ;;  %v10338_v39 = vpop.f32.mrf.mxu1 }
 0x8c4   : > { %v6044_v60 = vadd.f32 %v8060_v48, %v5923_v24  ;;  %v6147_v0 = vadd.f32 %v6146_v12, %v6023_v13 }
 0x8c5   : > { %v6036_v10 = vpop.f32.mrf.mxu0  ;;  %v10340_v33 = vpop.f32.mrf.mxu1 }
 0x8c6   : > { %v6037_v56 = vadd.f32 %v6036_v10, %v5917_v50  ;;  %v6171_v46 = vadd.f32 %v8076_v25, %v6044_v60 }
 0x8c7   : > { %v8063_v4 = vpop.f32.mrf.mxu0  ;;  %v8105_v21 = vpop.f32.mrf.mxu1 }
 0x8c8   : > { %v6058_v42 = vadd.f32 %v8063_v4, %v5935_v54  ;;  %v6163_v3 = vadd.f32 %v6162_v23, %v6037_v56 }
 0x8c9   : > { %v6050_v59 = vpop.f32.mrf.mxu0  ;;  %v6394_v44 = vpop.f32.mrf.mxu1 }
 0x8ca   : > { %v6051_v43 = vadd.f32 %v6050_v59, %v5929_v6  ;;  %v6187_v28 = vadd.f32 %v8079_v36, %v6058_v42 }
 0x8cb   : > { %v8066_v30 = vpop.f32.mrf.mxu0  ;;  %v8108_v19 = vpop.f32.mrf.mxu1 }
 0x8cc   : > { %v6072_v18 = vadd.f32 %v8066_v30, %v5947_v45  ;;  %v6179_v34 = vadd.f32 %v6178_v31, %v6051_v43 }
 0x8cd   : > { %v6064_v52 = vpop.f32.mrf.mxu0  ;;  %v6406_v14 = vpop.f32.mrf.mxu1 }
 0x8ce   : > { %v6065_v8 = vadd.f32 %v6064_v52, %v5941_v11  ;;  %v6203_v40 = vadd.f32 %v10338_v39, %v6072_v18 }
 0x8cf   : > { %v8089_v53 = vpop.f32.mrf.mxu0  ;;  %v8111_v55 = vpop.f32.mrf.mxu1 }
 0x8d0   : > { %v6286_v22 = vadd.f32 %v8089_v53, %v6155_v62  ;;  %v6195_v58 = vadd.f32 %v10340_v33, %v6065_v8 }
 0x8d1   : > { %v6279_v47 = vpop.f32.mrf.mxu0  ;;  %v6418_v17 = vpop.f32.mrf.mxu1 }
 0x8d2   : > { %v6401_v27 = vadd.f32 %v8105_v21, %v6286_v22  ;;  %v6280_v37 = vadd.f32 %v6279_v47, %v6147_v0 }
 0x8d3   : > { %v8092_v16 = vpop.f32.mrf.mxu0  ;;  %v8114_v48 = vpop.f32.mrf.mxu1 }
 0x8d4   : > { %6441 = vst.msk [vmem:[%s10343_s10 + $0x8] sm:$0xff] %vm326_vm1, %v6401_v27  ;;  %v6395_v35 = vadd.f32 %v6394_v44, %v6280_v37  ;;  %v6298_v26 = vadd.f32 %v8092_v16, %v6171_v46 }
 0x8d5   : > { %v6291_v61 = vpop.f32.mrf.mxu0  ;;  %v6430_v41 = vpop.f32.mrf.mxu1 }
 0x8d6   : > { %6440 = vst.msk [vmem:[%s10343_s10] sm:$0xff] %vm326_vm1, %v6395_v35  ;;  %v6413_v20 = vadd.f32 %v8108_v19, %v6298_v26  ;;  %v6292_v5 = vadd.f32 %v6291_v61, %v6163_v3 }
 0x8d7   : > { %v8095_v12 = vpop.f32.mrf.mxu0 }
 0x8d8   : > { %6443 = vst.msk [vmem:[%s10343_s10 + $0x18] sm:$0xff] %vm326_vm1, %v6413_v20  ;;  %v6407_v25 = vadd.f32 %v6406_v14, %v6292_v5  ;;  %v6310_v51 = vadd.f32 %v8095_v12, %v6187_v28 }
 0x8d9   : > { %v6303_v23 = vpop.f32.mrf.mxu0 }
 0x8da   : > { %6442 = vst.msk [vmem:[%s10343_s10 + $0x10] sm:$0xff] %vm326_vm1, %v6407_v25  ;;  %v6425_v57 = vadd.f32 %v8111_v55, %v6310_v51  ;;  %v6304_v63 = vadd.f32 %v6303_v23, %v6179_v34 }
 0x8db   : > { %v8098_v36 = vpop.f32.mrf.mxu0  ;;  %v6506_v33 = vld [vmem:[%s10343_s10 + $0x8] sm:$0xff] (%p8423_p7) }
 0x8dc   : > { %6445 = vst.msk [vmem:[%s10343_s10 + $0x28] sm:$0xff] %vm326_vm1, %v6425_v57  ;;  %v6419_v9 = vadd.f32 %v6418_v17, %v6304_v63  ;;  %v6322_v10 = vadd.f32 %v8098_v36, %v6203_v40  ;;  %6507 = vst [vmem:[%s6461_s15 + $0x10] sm:$0xff] (%p8423_p7), %v6506_v33 }
 0x8dd   : > { %v6315_v4 = vpop.f32.mrf.mxu0  ;;  %v6504_v39 = vld [vmem:[%s10343_s10] sm:$0xff] (%p8423_p7) }
 0x8de   : > { %6444 = vst.msk [vmem:[%s10343_s10 + $0x20] sm:$0xff] %vm326_vm1, %v6419_v9  ;;  %v6437_v31 = vadd.f32 %v8114_v48, %v6322_v10  ;;  %v6316_v21 = vadd.f32 %v6315_v4, %v6195_v58  ;;  %6454 = sbr.rel (!%p8423_p7) target bundleno = 2283 (0x8eb), region = 82  ;;  %6505 = vst [vmem:[%s6461_s15] sm:$0xff] (%p8423_p7), %v6504_v39 }
 0x8df   : > { %v6510_v44 = vld [vmem:[%s10343_s10 + $0x18] sm:$0xff] (%p8423_p7) }
 0x8e0   : > { %6447 = vst.msk [vmem:[%s10343_s10 + $0x38] sm:$0xff] %vm326_vm1, %v6437_v31  ;;  %v6431_v49 = vadd.f32 %v6430_v41, %v6316_v21  ;;  %6511 = vst [vmem:[%s6461_s15 + $0x30] sm:$0xff] (%p8423_p7), %v6510_v44 }
 0x8e1   : > { %v6508_v59 = vld [vmem:[%s10343_s10 + $0x10] sm:$0xff] (%p8423_p7) }
 0x8e2   : > { %6446 = vst.msk [vmem:[%s10343_s10 + $0x30] sm:$0xff] %vm326_vm1, %v6431_v49  ;;  %6509 = vst [vmem:[%s6461_s15 + $0x20] sm:$0xff] (%p8423_p7), %v6508_v59 }
 0x8e3   : > { %v6514_v32 = vld [vmem:[%s10343_s10 + $0x28] sm:$0xff] }
 0x8e4   : > { %6515 = vst [vmem:[%s6461_s15 + $0x50] sm:$0xff] %v6514_v32 }
 0x8e5   : > { %v6512_v7 = vld [vmem:[%s10343_s10 + $0x20] sm:$0xff] }
 0x8e6   : > { %6513 = vst [vmem:[%s6461_s15 + $0x40] sm:$0xff] %v6512_v7 }
 0x8e7   : > { %v6518_v30 = vld [vmem:[%s10343_s10 + $0x38] sm:$0xff] }
 0x8e8   : > { %6519 = vst [vmem:[%s6461_s15 + $0x70] sm:$0xff] %v6518_v30 }
 0x8e9   : > { %v6516_v29 = vld [vmem:[%s10343_s10 + $0x30] sm:$0xff] }
 0x8ea   : > { %6517 = vst [vmem:[%s6461_s15 + $0x60] sm:$0xff] %v6516_v29 }
 0x8eb PF: > { %s15_s26 = sadd.s32 1, %s8325_s26   ;;  %s10473_s18 = smov %s8297_s19 }
 0x8ec   : > { %p12_p13 = scmp.ge.s32.totalorder %s15_s26, 10   ;;  %s10474_s19 = smov %s8437_s14 }
 0x8ed   : > { %s10475_s20 = smov %s8313_s23  ;;  %s10476_s21 = smov %s8317_s24 }
 0x8ee   : > { %s10477_s22 = smov %s8321_s25  ;;  %s10478_s23 = smov %s10482_s27 }
 0x8ef   : > { %s10479_s24 = smov %s10486_s28  ;;  %s10480_s25 = smov %s10490_s30 }
 0x8f0   :  { %14 = sbr.rel (!%p12_p13) target bundleno = 5 (0x5), region = 151 }

</bundles_post_ra>
